<compile_context>
chip_gen: v5e
topology: v5e:2x2
jax: 0.10.0
libtpu: 0.0.40
codegen_flags: <defaults>
</compile_context>

<pallas_src>
import jax
import jax.numpy as jnp
import numpy as np
from jax.experimental import pallas as pl
from jax.experimental.pallas import tpu as pltpu

# Problem constants (match the module + chosen small input size).
CIN, COUT = 3, 32
KH, KW = 3, 3
H, W = 16, 16                # spatial size of the example input
PH, PW = 4, 4                # AdaptiveAvgPool2d target (uniform bins: H%PH==0, W%PW==0)
FEAT = 128                   # feature_dim
KDIM = KH * KW * CIN         # 27 im2col taps
KPAD = 32                    # 27 taps + 1 bias ride-along column + 4 dead columns
MXU_DTYPE = jnp.bfloat16     # matmul-operand dtype (accumulation stays f32)

assert H % PH == 0 and W % PW == 0, "pool matrix assumes uniform bins"


def cnn_kernel(x_ref, wc_ref, pool_ref, wf_ref, bf_ref, o_ref):
    # x_ref:    (B*H*W, KPAD)       im2col patches, col 27 == 1.0 (bias ride-along)
    # wc_ref:   (KPAD, COUT)        conv weight, row 27 == conv bias
    # pool_ref: (B, PH*PW, H*W)     per-image avg-pool matrix, tiled over the block
    # wf_ref:   (PH*PW*COUT, FEAT)  fc weight, rows ordered (ph, pw, c)
    # bf_ref:   (1, FEAT)           fc bias (f32)
    # o_ref:    (B, FEAT)
    bblk = o_ref.shape[0]

    # Conv2d(3->32, k3, s1, p1) + bias (folded) as ONE MXU matmul, then ReLU.
    y = jnp.dot(x_ref[...], wc_ref[...], preferred_element_type=jnp.float32)
    y = jnp.maximum(y, 0.0)                                     # (B*256, 32) f32

    # AdaptiveAvgPool2d((4,4)): per-image pooling matrix contracted against the
    # image's (256, 32) conv output -- a plain batched matmul (no block-diag).
    y3 = y.astype(MXU_DTYPE).reshape(bblk, H * W, COUT)         # leading-dim split: free
    pooled = jnp.einsum("bpk,bkc->bpc", pool_ref[...], y3,
                        preferred_element_type=jnp.float32)     # (B, 16, 32)

    # Flatten in (ph, pw, c) order (fc weight was pre-permuted to match) + Linear.
    feat = pooled.reshape(bblk * PH * PW, COUT)                 # leading-dim merge: free
    feat = feat.reshape(bblk, PH * PW * COUT).astype(MXU_DTYPE)  # small lane relayout
    o_ref[...] = jnp.dot(feat, wf_ref[...],
                         preferred_element_type=jnp.float32) + bf_ref[...]


def _pool_matrix():
    """Per-image AdaptiveAvgPool2d((4,4)) matrix, (PH*PW, H*W), uniform bins."""
    bh, bw = H // PH, W // PW
    m = np.zeros((PH * PW, H * W), np.float32)
    for ph in range(PH):
        for pw in range(PW):
            for iy in range(bh):
                for ix in range(bw):
                    m[ph * PW + pw, (ph * bh + iy) * W + (pw * bw + ix)] = 1.0 / (bh * bw)
    return m


def _pick_batch_block(n):
    """Images per grid step: 32 for real batches (amortizes ~0.35us/step pipeline
    overhead); otherwise keep >=2 grid steps when possible so both v7x TensorCores
    get work (no-op on v5e/v6e).  Must stay a multiple of 8 (sublane tiling)."""
    n8 = -(-n // 8) * 8
    if n8 >= 64:
        return 32
    half = (n8 // 2) // 8 * 8
    return half if half >= 8 else n8


@jax.jit
def simple_cnn_forward(x_nchw, wc_torch, bc, wfc_torch, bfc):
    """x_nchw: (N, 3, H, W) f32.  Weights in PyTorch conventions:
       wc_torch (COUT, CIN, KH, KW), bc (COUT,), wfc_torch (FEAT, COUT*PH*PW), bfc (FEAT,)."""
    N = x_nchw.shape[0]
    bblk = _pick_batch_block(N)
    npad = -(-N // bblk) * bblk

    # ---- im2col in the (jitted) wrapper: lane-dense (rows, 32) layout ----------
    x_nhwc = jnp.transpose(x_nchw, (0, 2, 3, 1)).astype(jnp.float32)
    patches = jax.lax.conv_general_dilated_patches(
        x_nhwc, filter_shape=(KH, KW), window_strides=(1, 1), padding="SAME",
        dimension_numbers=("NHWC", "HWIO", "NHWC"),
        precision=jax.lax.Precision.HIGHEST)                 # (N,H,W,27), col = c*9+ky*3+kx
    patches = patches.reshape(N, H * W, KDIM)
    patches = jnp.concatenate(
        [patches,
         jnp.ones((N, H * W, 1), jnp.float32),               # bias ride-along column (27)
         jnp.zeros((N, H * W, KPAD - KDIM - 1), jnp.float32)], axis=-1)
    patches = jnp.pad(patches, ((0, npad - N), (0, 0), (0, 0)))
    x_cols = patches.reshape(npad * H * W, KPAD).astype(MXU_DTYPE)

    # ---- weights ---------------------------------------------------------------
    # conv weight: rows ordered (c, ky, kx) to match conv_general_dilated_patches;
    # row 27 carries the conv bias, rows 28..31 are dead padding.
    wc = jnp.transpose(wc_torch, (1, 2, 3, 0)).reshape(KDIM, COUT).astype(jnp.float32)
    wc = jnp.concatenate([wc, bc.reshape(1, COUT).astype(jnp.float32),
                          jnp.zeros((KPAD - KDIM - 1, COUT), jnp.float32)], axis=0)
    wc = wc.astype(MXU_DTYPE)                                # (32, 32)

    # fc weight: PyTorch flatten order is (c, ph, pw); kernel produces (ph, pw, c).
    wf = jnp.transpose(wfc_torch.reshape(FEAT, COUT, PH, PW), (2, 3, 1, 0))
    wf = wf.reshape(PH * PW * COUT, FEAT).astype(MXU_DTYPE)  # (512, 128)
    bf2 = bfc.reshape(1, FEAT).astype(jnp.float32)

    # Per-image pool matrix tiled over the batch block (VMEM-resident constant).
    pool_b = jnp.asarray(np.broadcast_to(_pool_matrix(),
                                         (bblk, PH * PW, H * W))).astype(MXU_DTYPE)

    flops = 2 * npad * (H * W * KPAD * COUT          # conv
                        + PH * PW * H * W * COUT     # pool
                        + PH * PW * COUT * FEAT)     # fc
    bytes_accessed = (x_cols.size * x_cols.dtype.itemsize
                      + wc.size * wc.dtype.itemsize
                      + pool_b.size * pool_b.dtype.itemsize
                      + wf.size * wf.dtype.itemsize
                      + bf2.size * bf2.dtype.itemsize
                      + npad * FEAT * 4)

    out = pl.pallas_call(
        cnn_kernel,
        out_shape=jax.ShapeDtypeStruct((npad, FEAT), jnp.float32),
        grid_spec=pltpu.PrefetchScalarGridSpec(
            num_scalar_prefetch=0,
            grid=(npad // bblk,),
            in_specs=[
                pl.BlockSpec((bblk * H * W, KPAD), lambda n: (n, 0)),
                pl.BlockSpec((KPAD, COUT), lambda n: (0, 0)),
                pl.BlockSpec((bblk, PH * PW, H * W), lambda n: (0, 0, 0)),
                pl.BlockSpec((PH * PW * COUT, FEAT), lambda n: (0, 0)),
                pl.BlockSpec((1, FEAT), lambda n: (0, 0)),
            ],
            out_specs=pl.BlockSpec((bblk, FEAT), lambda n: (n, 0)),
        ),
        compiler_params=pltpu.CompilerParams(
            dimension_semantics=("parallel",),
            vmem_limit_bytes=32 * 1024 * 1024),
        cost_estimate=pl.CostEstimate(
            flops=flops, transcendentals=0, bytes_accessed=bytes_accessed),
    )(x_cols, wc, pool_b, wf, bf2)
    return out[:N]


def reference_forward(x_nchw, wc_torch, bc, wfc_torch, bfc):
    """Pure-JAX f32 reference matching PyTorch semantics (NCHW conv, CHW flatten)."""
    N = x_nchw.shape[0]
    x = jnp.transpose(x_nchw, (0, 2, 3, 1))
    y = jax.lax.conv_general_dilated(
        x, jnp.transpose(wc_torch, (2, 3, 1, 0)), (1, 1), "SAME",
        dimension_numbers=("NHWC", "HWIO", "NHWC"),
        precision=jax.lax.Precision.HIGHEST)
    y = jnp.maximum(y + bc.reshape(1, 1, 1, COUT), 0.0)
    y = y.reshape(N, PH, H // PH, PW, W // PW, COUT).mean(axis=(2, 4))   # (N,4,4,C)
    flat = jnp.transpose(y, (0, 3, 1, 2)).reshape(N, -1)                  # (N, C*16)
    return jnp.dot(flat, wfc_torch.T, precision=jax.lax.Precision.HIGHEST) + bfc


if __name__ == "__main__":
    key = jax.random.PRNGKey(0)
    k_x, k_wc, k_bc, k_wf, k_bf = jax.random.split(key, 5)

    N = 2
    x = jax.random.normal(k_x, (N, CIN, H, W), jnp.float32)

    # Deterministic parameters (shapes follow nn.Conv2d / nn.Linear conventions).
    wc_torch = jax.random.normal(k_wc, (COUT, CIN, KH, KW), jnp.float32) * 0.1
    bc = jax.random.normal(k_bc, (COUT,), jnp.float32) * 0.1
    wfc_torch = jax.random.normal(k_wf, (FEAT, COUT * PH * PW), jnp.float32) * 0.05
    bfc = jax.random.normal(k_bf, (FEAT,), jnp.float32) * 0.05

    out = jax.block_until_ready(simple_cnn_forward(x, wc_torch, bc, wfc_torch, bfc))
    ref = reference_forward(x, wc_torch, bc, wfc_torch, bfc)
    assert out.shape == (N, FEAT)

    # bf16 MXU operands with f32 accumulation: error ~ bf16 eps (2^-8) times the
    # contraction depths (K = 32 / 256 / 512), comfortably inside 1e-2.
    tol = 1e-2 if MXU_DTYPE == jnp.bfloat16 else 1e-3
    np.testing.assert_allclose(np.asarray(out), np.asarray(ref), rtol=tol, atol=tol)
    print("KERNEL_OK")
</pallas_src>

<mosaic_0001>
module attributes {stable_mosaic.version = 11 : i64} {
  func.func @cnn_kernel(%arg0: i32, %arg1: memref<2048x32xbf16, #tpu.memory_space<vmem>>, %arg2: memref<32x32xbf16, #tpu.memory_space<vmem>>, %arg3: memref<8x16x256xbf16, #tpu.memory_space<vmem>>, %arg4: memref<512x128xbf16, #tpu.memory_space<vmem>>, %arg5: memref<1x128xf32, #tpu.memory_space<vmem>>, %arg6: memref<8x128xf32, #tpu.memory_space<vmem>>) attributes {dimension_semantics = [#tpu.dimension_semantics<parallel>], iteration_bounds = array<i64: 1>, scalar_prefetch = 0 : i64, scratch_operands = 0 : i64, tpu.core_type = #tpu.core_type<tc>, window_params = [{transform_indices = @transform_0, window_bounds = array<i64: 2048, 32>}, {pipeline_mode = #tpu.pipeline_mode<synchronous>, transform_indices = @transform_1, window_bounds = array<i64: 32, 32>}, {pipeline_mode = #tpu.pipeline_mode<synchronous>, transform_indices = @transform_2, window_bounds = array<i64: 8, 16, 256>}, {pipeline_mode = #tpu.pipeline_mode<synchronous>, transform_indices = @transform_3, window_bounds = array<i64: 512, 128>}, {pipeline_mode = #tpu.pipeline_mode<synchronous>, transform_indices = @transform_4, window_bounds = array<i64: 1, 128>}, {transform_indices = @transform_5, window_bounds = array<i64: 8, 128>}]} {
    %c0 = arith.constant 0 : index
    %c0_0 = arith.constant 0 : index
    %0 = vector.load %arg1[%c0, %c0_0] : memref<2048x32xbf16, #tpu.memory_space<vmem>>, vector<2048x32xbf16>
    %c0_1 = arith.constant 0 : index
    %c0_2 = arith.constant 0 : index
    %1 = vector.load %arg2[%c0_1, %c0_2] : memref<32x32xbf16, #tpu.memory_space<vmem>>, vector<32x32xbf16>
    %cst = arith.constant dense<0.000000e+00> : vector<2048x32xf32>
    %2 = tpu.matmul %0, %1, %cst {dimension_numbers = #tpu.dot_dimension_numbers<[1], [0], [0], [1], [0, 0, 1, 1], [], []>} : vector<2048x32xbf16>, vector<32x32xbf16>, vector<2048x32xf32> -> vector<2048x32xf32>
    %cst_3 = arith.constant 0.000000e+00 : f32
    %3 = vector.broadcast %cst_3 : f32 to vector<2048x32xf32>
    %4 = arith.maximumf %2, %3 : vector<2048x32xf32>
    %5 = arith.truncf %4 : vector<2048x32xf32> to vector<2048x32xbf16>
    %6 = vector.shape_cast %5 : vector<2048x32xbf16> to vector<8x256x32xbf16>
    %c0_4 = arith.constant 0 : index
    %c0_5 = arith.constant 0 : index
    %c0_6 = arith.constant 0 : index
    %7 = vector.load %arg3[%c0_4, %c0_5, %c0_6] : memref<8x16x256xbf16, #tpu.memory_space<vmem>>, vector<8x16x256xbf16>
    "tpu.trace_start"() <{level = 10 : i32, message = "bpk,bkc->bpc"}> : () -> ()
    %cst_7 = arith.constant dense<0.000000e+00> : vector<8x16x32xf32>
    %8 = tpu.matmul %7, %6, %cst_7 {dimension_numbers = #tpu.dot_dimension_numbers<[2], [1], [1], [2], [0, 0, 0, 1, 1, 2], [0], [0]>} : vector<8x16x256xbf16>, vector<8x256x32xbf16>, vector<8x16x32xf32> -> vector<8x16x32xf32>
    "tpu.trace_stop"() : () -> ()
    %9 = vector.shape_cast %8 : vector<8x16x32xf32> to vector<128x32xf32>
    %10 = vector.shape_cast %9 : vector<128x32xf32> to vector<8x512xf32>
    %11 = arith.truncf %10 : vector<8x512xf32> to vector<8x512xbf16>
    %c0_8 = arith.constant 0 : index
    %c0_9 = arith.constant 0 : index
    %12 = vector.load %arg4[%c0_8, %c0_9] : memref<512x128xbf16, #tpu.memory_space<vmem>>, vector<512x128xbf16>
    %cst_10 = arith.constant dense<0.000000e+00> : vector<8x128xf32>
    %13 = tpu.matmul %11, %12, %cst_10 {dimension_numbers = #tpu.dot_dimension_numbers<[1], [0], [0], [1], [0, 0, 1, 1], [], []>} : vector<8x512xbf16>, vector<512x128xbf16>, vector<8x128xf32> -> vector<8x128xf32>
    %c0_11 = arith.constant 0 : index
    %c0_12 = arith.constant 0 : index
    %14 = vector.load %arg5[%c0_11, %c0_12] : memref<1x128xf32, #tpu.memory_space<vmem>>, vector<1x128xf32>
    %15 = vector.broadcast %14 : vector<1x128xf32> to vector<8x128xf32>
    %16 = arith.addf %13, %15 : vector<8x128xf32>
    %c0_13 = arith.constant 0 : index
    %c0_14 = arith.constant 0 : index
    %17 = vector.load %arg6[%c0_13, %c0_14] : memref<8x128xf32, #tpu.memory_space<vmem>>, vector<8x128xf32>
    tpu.vector_store %arg6[%c0_13, %c0_14], %16 {strides = array<i32>} : memref<8x128xf32, #tpu.memory_space<vmem>>, vector<8x128xf32>,
    return
  }
  func.func @transform_0(%arg0: i32) -> (i32, i32) {
    %c0_i32 = arith.constant 0 : i32
    %c0_i32_0 = arith.constant 0 : i32
    return %arg0, %c0_i32 : i32, i32
  }
  func.func @transform_1(%arg0: i32) -> (i32, i32) {
    %c0_i32 = arith.constant 0 : i32
    %c0_i32_0 = arith.constant 0 : i32
    %c0_i32_1 = arith.constant 0 : i32
    return %c0_i32, %c0_i32_0 : i32, i32
  }
  func.func @transform_2(%arg0: i32) -> (i32, i32, i32) {
    %c0_i32 = arith.constant 0 : i32
    %c0_i32_0 = arith.constant 0 : i32
    %c0_i32_1 = arith.constant 0 : i32
    %c0_i32_2 = arith.constant 0 : i32
    return %c0_i32, %c0_i32_0, %c0_i32_1 : i32, i32, i32
  }
  func.func @transform_3(%arg0: i32) -> (i32, i32) {
    %c0_i32 = arith.constant 0 : i32
    %c0_i32_0 = arith.constant 0 : i32
    %c0_i32_1 = arith.constant 0 : i32
    return %c0_i32, %c0_i32_0 : i32, i32
  }
  func.func @transform_4(%arg0: i32) -> (i32, i32) {
    %c0_i32 = arith.constant 0 : i32
    %c0_i32_0 = arith.constant 0 : i32
    %c0_i32_1 = arith.constant 0 : i32
    return %c0_i32, %c0_i32_0 : i32, i32
  }
  func.func @transform_5(%arg0: i32) -> (i32, i32) {
    %c0_i32 = arith.constant 0 : i32
    %c0_i32_0 = arith.constant 0 : i32
    return %arg0, %c0_i32 : i32, i32
  }
}

</mosaic_0001>

<bundles_post_ra>
// kernel: simple_cnn_forward.1
= control target key start
LH: loop header
LB: loop body
LE: loop exit
PB: predicated region body
PF: predicated region fallthrough
CT: control target
= control target key end

     0   :  { %vm933_vm0 = vcmask 261120   ;;  %vm3568_vm1 = vcmask 1047556   ;;  %s5227_s20 = smov 96   ;;  %s5228_s24 = smov 32   ;;  %vm3841_vm2 = vcmask 523264   ;;  %vm3843_vm3 = vcmask 785408   ;;  %s6709_s1 = inlined_call_operand.vmem [shape: bf16[32,32], index: 1, kind: input, shape index: {}]   ;;  %s6710_s0 = inlined_call_operand.vmem [shape: bf16[2048,32], index: 0, kind: input, shape index: {}]   ;;  %s6711_s2 = inlined_call_operand.vmem [shape: bf16[8,16,256], index: 2, kind: input, shape index: {}]   ;;  %s6712_s3 = inlined_call_operand.vmem [shape: bf16[512,128], index: 3, kind: input, shape index: {}]   ;;  %s6713_s4 = inlined_call_operand.vmem [shape: f32[1,128], index: 4, kind: input, shape index: {}]   ;;  %s6714_s5 = inlined_call_operand.vmem [shape: f32[8,128], index: 5, kind: output, shape index: {}]  }
   0x1   :  { %v5144_v0 = vld [vmem:[%s6709_s1 + $0x8] sm:$0xff]  ;;  %v5143_v1 = vld [vmem:[%s6709_s1] sm:$0xff]  ;;  %v5017_v4 = vld [vmem:[%s6710_s0 + $0x10] sm:$0xff]  ;;  %s5229_s27 = smov 64  }
   0x2   :  { %1324 = vmatpush.bf16.msra.mxu0 %v5144_v0  ;;  %5193 = vmatpush.bf16.msra.mxu1 %v5144_v0  ;;  %v5015_v2 = vld [vmem:[%s6710_s0] sm:$0xff]  ;;  %v5016_v3 = vld [vmem:[%s6710_s0 + $0x8] sm:$0xff]  ;;  %v5018_v5 = vld [vmem:[%s6710_s0 + $0x18] sm:$0xff] }
   0x3   :  { %5195 = vmatpush.bf16.msra.mxu3 %v5144_v0  ;;  %5194 = vmatpush.bf16.msra.mxu2 %v5144_v0  ;;  %v5019_v6 = vld [vmem:[%s6710_s0 + $0x20] sm:$0xff]  ;;  %v5020_v7 = vld [vmem:[%s6710_s0 + $0x28] sm:$0xff]  ;;  %v5021_v8 = vld [vmem:[%s6710_s0 + $0x30] sm:$0xff] }
   0x4   :  { %v5112_v9 = vld [vmem:[%s6710_s0 + $0x308] sm:$0xff]  ;;  %v5022_v10 = vld [vmem:[%s6710_s0 + $0x38] sm:$0xff]  ;;  %v5113_v11 = vld [vmem:[%s6710_s0 + $0x310] sm:$0xff] }
   0x5   :  { %v5023_v12 = vld [vmem:[%s6710_s0 + $0x40] sm:$0xff]  ;;  %v5114_v13 = vld [vmem:[%s6710_s0 + $0x318] sm:$0xff]  ;;  %v5024_v22 = vld [vmem:[%s6710_s0 + $0x48] sm:$0xff] }
   0x6   :  { %1325 = vmatpush.bf16.msra.mxu0 %v5143_v1  ;;  %5196 = vmatpush.bf16.msra.mxu1 %v5143_v1  ;;  %v5115_v24 = vld [vmem:[%s6710_s0 + $0x320] sm:$0xff]  ;;  %v5025_v33 = vld [vmem:[%s6710_s0 + $0x50] sm:$0xff]  ;;  %v5116_v35 = vld [vmem:[%s6710_s0 + $0x328] sm:$0xff] }
   0x7   :  { %5198 = vmatpush.bf16.msra.mxu3 %v5143_v1  ;;  %5197 = vmatpush.bf16.msra.mxu2 %v5143_v1  ;;  %v5057_v42 = vld [vmem:[%s6710_s0 + $0x150] sm:$0xff]  ;;  %v5086_v45 = vld [vmem:[%s6710_s0 + $0x238] sm:$0xff]  ;;  %v5087_v58 = vld [vmem:[%s6710_s0 + $0x240] sm:$0xff] }
   0x8   :  { %v5026_v46 = vld [vmem:[%s6710_s0 + $0x58] sm:$0xff]  ;;  %v5117_v48 = vld [vmem:[%s6710_s0 + $0x330] sm:$0xff]  ;;  %v5027_v59 = vld [vmem:[%s6710_s0 + $0x60] sm:$0xff] }
   0x9   :  { %4695 = vmatmul.msk.bf16.vlgmr.msra.gmra.mxu0 %vm933_vm0, %v5015_v2  ;;  %4737 = vmatmul.msk.bf16.vlgmr.msra.gmra.mxu1 %vm933_vm0, %v5057_v42  ;;  %v5058_v55 = vld [vmem:[%s6710_s0 + $0x158] sm:$0xff]  ;;  %v5059_v0 = vld [vmem:[%s6710_s0 + $0x160] sm:$0xff]  ;;  %v5088_v1 = vld [vmem:[%s6710_s0 + $0x248] sm:$0xff] }
   0xa   :  { %4792 = vmatmul.msk.bf16.vlgmr.msra.gmra.mxu3 %vm933_vm0, %v5112_v9  ;;  %4766 = vmatmul.msk.bf16.vlgmr.msra.gmra.mxu2 %vm933_vm0, %v5086_v45  ;;  %v5118_v61 = vld [vmem:[%s6710_s0 + $0x338] sm:$0xff]  ;;  %v5028_v2 = vld [vmem:[%s6710_s0 + $0x68] sm:$0xff]  ;;  %v5031_v42 = vld [vmem:[%s6710_s0 + $0x80] sm:$0xff] }
   0xb   :  { %v5120_v9 = vld [vmem:[%s6710_s0 + $0x348] sm:$0xff] }
  0x19   :  { %4696 = vmatmul.msk.bf16.gmra.mxu0 %vm933_vm0, %v5016_v3  ;;  %4738 = vmatmul.msk.bf16.gmra.mxu1 %vm933_vm0, %v5058_v55  ;;  %v5119_v3 = vld [vmem:[%s6710_s0 + $0x340] sm:$0xff] }
  0x1a   :  { %4793 = vmatmul.msk.bf16.gmra.mxu3 %vm933_vm0, %v5113_v11  ;;  %4767 = vmatmul.msk.bf16.gmra.mxu2 %vm933_vm0, %v5087_v58 }
  0x29   :  { %4697 = vmatmul.msk.bf16.gmra.mxu0 %vm933_vm0, %v5017_v4  ;;  %4739 = vmatmul.msk.bf16.gmra.mxu1 %vm933_vm0, %v5059_v0 }
  0x2a   :  { %4794 = vmatmul.msk.bf16.gmra.mxu3 %vm933_vm0, %v5114_v13  ;;  %4768 = vmatmul.msk.bf16.gmra.mxu2 %vm933_vm0, %v5088_v1  ;;  %v5061_v13 = vld [vmem:[%s6710_s0 + $0x170] sm:$0xff]  ;;  %v5063_v1 = vld [vmem:[%s6710_s0 + $0x180] sm:$0xff] }
  0x39   :  { %4698 = vmatmul.msk.bf16.gmra.mxu0 %vm933_vm0, %v5018_v5 }
  0x3a   :  { %4795 = vmatmul.msk.bf16.gmra.mxu3 %vm933_vm0, %v5115_v24 }
  0x49   :  { %4699 = vmatmul.msk.bf16.gmra.mxu0 %vm933_vm0, %v5019_v6  ;;  %v5060_v6 = vld [vmem:[%s6710_s0 + $0x168] sm:$0xff] }
  0x4a   :  { %4796 = vmatmul.msk.bf16.gmra.mxu3 %vm933_vm0, %v5116_v35  ;;  %4740 = vmatmul.msk.bf16.gmra.mxu1 %vm933_vm0, %v5060_v6  ;;  %v5032_v6 = vld [vmem:[%s6710_s0 + $0x88] sm:$0xff] }
  0x59   :  { %4700 = vmatmul.msk.bf16.gmra.mxu0 %vm933_vm0, %v5020_v7  ;;  %v5089_v7 = vld [vmem:[%s6710_s0 + $0x250] sm:$0xff] }
  0x5a   :  { %4797 = vmatmul.msk.bf16.gmra.mxu3 %vm933_vm0, %v5117_v48  ;;  %4769 = vmatmul.msk.bf16.gmra.mxu2 %vm933_vm0, %v5089_v7 }
  0x5b   :  { %4741 = vmatmul.msk.bf16.gmra.mxu1 %vm933_vm0, %v5061_v13 }
  0x69   :  { %4701 = vmatmul.msk.bf16.gmra.mxu0 %vm933_vm0, %v5021_v8  ;;  %v5029_v8 = vld [vmem:[%s6710_s0 + $0x70] sm:$0xff] }
  0x6a   :  { %4798 = vmatmul.msk.bf16.gmra.mxu3 %vm933_vm0, %v5118_v61 }
  0x79   :  { %4702 = vmatmul.msk.bf16.gmra.mxu0 %vm933_vm0, %v5022_v10 }
  0x7a   :  { %4799 = vmatmul.msk.bf16.gmra.mxu3 %vm933_vm0, %v5119_v3 }
  0x86   :  { %v1327_v14 = vpop.f32.mrf.mxu0 }
  0x87   :  { %v1967_v15 = vmax.f32 %v1327_v14, 0.0 }
  0x89   :  { %4703 = vmatmul.msk.bf16.gmra.mxu0 %vm933_vm0, %v5023_v12  ;;  %v2223_v17 = vpack.c.bf16 %v1967_v15, %v1967_v15  ;;  %v5090_v15 = vld [vmem:[%s6710_s0 + $0x258] sm:$0xff] }
  0x8a   :  { %4800 = vmatmul.msk.bf16.gmra.mxu3 %vm933_vm0, %v5120_v9  ;;  %4770 = vmatmul.msk.bf16.gmra.mxu2 %vm933_vm0, %v5090_v15 }
  0x8b   :  { %v2537_v20 = vunpack.c.l.b16 %v2223_v17  ;;  %v5121_v17 = vld [vmem:[%s6710_s0 + $0x350] sm:$0xff] }
  0x8d   :  { %v5406_v11 = vpop.f32.mrf.mxu3 }
  0x8e   :  { %v1329_v16 = vpop.f32.mrf.mxu0  ;;  %6716 = vst [vmem:[#allocation2_spill] sm:$0xff] %v5406_v11 }
  0x8f   :  { %v1968_v18 = vmax.f32 %v1329_v16, 0.0  ;;  %v5030_v16 = vld [vmem:[%s6710_s0 + $0x78] sm:$0xff] }
  0x91   :  { %v2224_v19 = vpack.c.bf16 %v1968_v18, %v1968_v18 }
  0x93   :  { %v2538_v21 = vunpack.c.l.b16 %v2224_v19 }
  0x95   :  { %v5317_v23 = vpack.c.b16 %v2538_v21, %v2537_v20  ;;  %v5411_v14 = vpop.f32.mrf.mxu3 }
  0x96   :  { %v1332_v25 = vpop.f32.mrf.mxu0  ;;  %6717 = vst [vmem:[#allocation3_spill] sm:$0xff] %v5411_v14 }
  0x97   :  { %v1969_v26 = vmax.f32 %v1332_v25, 0.0 }
  0x99   :  { %4704 = vmatmul.msk.bf16.gmra.mxu0 %vm933_vm0, %v5024_v22  ;;  %v2225_v28 = vpack.c.bf16 %v1969_v26, %v1969_v26 }
  0x9a   :  { %4801 = vmatmul.msk.bf16.gmra.mxu3 %vm933_vm0, %v5121_v17 }
  0x9b   :  { %v2539_v31 = vunpack.c.l.b16 %v2225_v28 }
  0x9d   :  { %v5426_v19 = vpop.f32.mrf.mxu3 }
  0x9e   :  { %v1334_v27 = vpop.f32.mrf.mxu0  ;;  %6718 = vst [vmem:[#allocation4_spill] sm:$0xff] %v5426_v19 }
  0x9f   :  { %v1970_v29 = vmax.f32 %v1334_v27, 0.0 }
  0xa1   :  { %v2226_v30 = vpack.c.bf16 %v1970_v29, %v1970_v29 }
  0xa3   :  { %v2540_v32 = vunpack.c.l.b16 %v2226_v30  ;;  %v5062_v30 = vld [vmem:[%s6710_s0 + $0x178] sm:$0xff] }
  0xa4   :  { %4742 = vmatmul.msk.bf16.gmra.mxu1 %vm933_vm0, %v5062_v30 }
  0xa5   :  { %v5327_v34 = vpack.c.b16 %v2540_v32, %v2539_v31  ;;  %v5431_v31 = vpop.f32.mrf.mxu3 }
  0xa6   :  { %v1337_v36 = vpop.f32.mrf.mxu0  ;;  %6719 = vst [vmem:[#allocation5_spill] sm:$0xff] %v5431_v31 }
  0xa7   :  { %v1971_v37 = vmax.f32 %v1337_v36, 0.0 }
  0xa9   :  { %4705 = vmatmul.msk.bf16.gmra.mxu0 %vm933_vm0, %v5025_v33  ;;  %v2227_v39 = vpack.c.bf16 %v1971_v37, %v1971_v37  ;;  %v5091_v37 = vld [vmem:[%s6710_s0 + $0x260] sm:$0xff] }
  0xaa   :  { %4771 = vmatmul.msk.bf16.gmra.mxu2 %vm933_vm0, %v5091_v37  ;;  %v5094_v37 = vld [vmem:[%s6710_s0 + $0x278] sm:$0xff] }
  0xab   :  { %v2541_v43 = vunpack.c.l.b16 %v2227_v39 }
  0xae   :  { %v1339_v38 = vpop.f32.mrf.mxu0 }
  0xaf   :  { %v1972_v40 = vmax.f32 %v1339_v38, 0.0 }
  0xb1   :  { %v2228_v41 = vpack.c.bf16 %v1972_v40, %v1972_v40 }
  0xb3   :  { %v2542_v44 = vunpack.c.l.b16 %v2228_v41 }
  0xb4   :  { %4743 = vmatmul.msk.bf16.gmra.mxu1 %vm933_vm0, %v5063_v1  ;;  %v5095_v1 = vld [vmem:[%s6710_s0 + $0x280] sm:$0xff] }
  0xb5   :  { %v5344_v47 = vpack.c.b16 %v2542_v44, %v2541_v43  ;;  %v5122_v43 = vld [vmem:[%s6710_s0 + $0x358] sm:$0xff] }
  0xb6   :  { %v1342_v49 = vpop.f32.mrf.mxu0  ;;  %4802 = vmatmul.msk.bf16.gmra.mxu3 %vm933_vm0, %v5122_v43  ;;  %v5518_v43 = vpop.f32.mrf.mxu2 }
  0xb7   :  { %v1973_v50 = vmax.f32 %v1342_v49, 0.0  ;;  %6723 = vst [vmem:[#allocation9_spill] sm:$0xff] %v5518_v43 }
  0xb9   :  { %4706 = vmatmul.msk.bf16.gmra.mxu0 %vm933_vm0, %v5026_v46  ;;  %v2229_v52 = vpack.c.bf16 %v1973_v50, %v1973_v50 }
  0xbb   :  { %v2543_v56 = vunpack.c.l.b16 %v2229_v52  ;;  %v5448_v52 = vpop.f32.mrf.mxu3 }
  0xbc   :  { %6720 = vst [vmem:[#allocation6_spill] sm:$0xff] %v5448_v52 }
  0xbe   :  { %v1344_v51 = vpop.f32.mrf.mxu0 }
  0xbf   :  { %v1974_v53 = vmax.f32 %v1344_v51, 0.0 }
  0xc1   :  { %v2230_v54 = vpack.c.bf16 %v1974_v53, %v1974_v53 }
  0xc3   :  { %v2544_v57 = vunpack.c.l.b16 %v2230_v54 }
  0xc5   :  { %v5362_v60 = vpack.c.b16 %v2544_v57, %v2543_v56 }
  0xc6   :  { %v5367_v62 = vpop.f32.mrf.mxu0 }
  0xc7   :  { %v1975_v45 = vmax.f32 %v5367_v62, 0.0 }
  0xc9   :  { %4707 = vmatmul.msk.bf16.gmra.mxu0 %vm933_vm0, %v5027_v59  ;;  %v2231_v53 = vpack.c.bf16 %v1975_v45, %v1975_v45 }
  0xcb   :  { %v2545_v59 = vunpack.c.l.b16 %v2231_v53 }
  0xce   :  { %v5372_v63 = vpop.f32.mrf.mxu0 }
  0xcf   :  { %v1976_v38 = vmax.f32 %v5372_v63, 0.0 }
  0xd1   :  { %v2232_v49 = vpack.c.bf16 %v1976_v38, %v1976_v38  ;;  %v5034_v38 = vld [vmem:[%s6710_s0 + $0x98] sm:$0xff] }
  0xd3   :  { %v2546_v56 = vunpack.c.l.b16 %v2232_v49 }
  0xd5   :  { %v2573_v0 = vpack.c.b16 %v2546_v56, %v2545_v59 }
  0xd6   :  { %v1352_v4 = vpop.f32.mrf.mxu0 }
  0xd7   :  { %v1977_v32 = vmax.f32 %v1352_v4, 0.0 }
  0xd9   :  { %4708 = vmatmul.msk.bf16.gmra.mxu0 %vm933_vm0, %v5028_v2  ;;  %v2233_v46 = vpack.c.bf16 %v1977_v32, %v1977_v32  ;;  %v5453_v2 = vpop.f32.mrf.mxu3  ;;  %v5065_v32 = vld [vmem:[%s6710_s0 + $0x190] sm:$0xff] }
  0xda   :  { %6721 = vst [vmem:[#allocation7_spill] sm:$0xff] %v5453_v2 }
  0xdb   :  { %v2547_v54 = vunpack.c.l.b16 %v2233_v46 }
  0xde   :  { %v1354_v5 = vpop.f32.mrf.mxu0 }
  0xdf   :  { %v1978_v27 = vmax.f32 %v1354_v5, 0.0  ;;  %v5092_v5 = vld [vmem:[%s6710_s0 + $0x268] sm:$0xff] }
  0xe0   :  { %4772 = vmatmul.msk.bf16.gmra.mxu2 %vm933_vm0, %v5092_v5  ;;  %v5126_v5 = vld [vmem:[%s6710_s0 + $0x378] sm:$0xff] }
  0xe1   :  { %v2234_v39 = vpack.c.bf16 %v1978_v27, %v1978_v27 }
  0xe3   :  { %v2548_v50 = vunpack.c.l.b16 %v2234_v39 }
  0xe5   :  { %v2574_v57 = vpack.c.b16 %v2548_v50, %v2547_v54 }
  0xe6   :  { %v1357_v10 = vpop.f32.mrf.mxu0 }
  0xe7   :  { %v1979_v24 = vmax.f32 %v1357_v10, 0.0  ;;  %v5471_v10 = vpop.f32.mrf.mxu3 }
  0xe9   :  { %4709 = vmatmul.msk.bf16.gmra.mxu0 %vm933_vm0, %v5029_v8  ;;  %v2235_v33 = vpack.c.bf16 %v1979_v24, %v1979_v24  ;;  %v5123_v8 = vld [vmem:[%s6710_s0 + $0x360] sm:$0xff]  ;;  %v5124_v24 = vld [vmem:[%s6710_s0 + $0x368] sm:$0xff] }
  0xea   :  { %4803 = vmatmul.msk.bf16.gmra.mxu3 %vm933_vm0, %v5123_v8 }
  0xeb   :  { %v2549_v48 = vunpack.c.l.b16 %v2235_v33 }
  0xee   :  { %v1359_v12 = vpop.f32.mrf.mxu0 }
  0xef   :  { %v1980_v21 = vmax.f32 %v1359_v12, 0.0 }
  0xf1   :  { %v2236_v28 = vpack.c.bf16 %v1980_v21, %v1980_v21 }
  0xf3   :  { %v2550_v40 = vunpack.c.l.b16 %v2236_v28 }
  0xf5   :  { %v2575_v51 = vpack.c.b16 %v2550_v40, %v2549_v48  ;;  %v5125_v40 = vld [vmem:[%s6710_s0 + $0x370] sm:$0xff] }
  0xf6   :  { %v1362_v18 = vpop.f32.mrf.mxu0 }
  0xf7   :  { %v1981_v20 = vmax.f32 %v1362_v18, 0.0  ;;  %v5064_v18 = vld [vmem:[%s6710_s0 + $0x188] sm:$0xff] }
  0xf8   :  { %4744 = vmatmul.msk.bf16.gmra.mxu1 %vm933_vm0, %v5064_v18 }
  0xf9   :  { %4710 = vmatmul.msk.bf16.gmra.mxu0 %vm933_vm0, %v5030_v16  ;;  %v2237_v25 = vpack.c.bf16 %v1981_v20, %v1981_v20 }
  0xfa   :  { %4804 = vmatmul.msk.bf16.gmra.mxu3 %vm933_vm0, %v5124_v24 }
  0xfb   :  { %v2551_v35 = vunpack.c.l.b16 %v2237_v25 }
  0xfe   :  { %v1364_v22 = vpop.f32.mrf.mxu0 }
  0xff   :  { %v1982_v26 = vmax.f32 %v1364_v22, 0.0 }
 0x101   :  { %v2238_v29 = vpack.c.bf16 %v1982_v26, %v1982_v26 }
 0x103   :  { %v2552_v36 = vunpack.c.l.b16 %v2238_v29 }
 0x105   :  { %v2576_v41 = vpack.c.b16 %v2552_v36, %v2551_v35 }
 0x106   :  { %v1367_v44 = vpop.f32.mrf.mxu0 }
 0x107   :  { %2601 = vmatpush.bf16.msrb.mxu1 %v2576_v41  ;;  %v1983_v55 = vmax.f32 %v1367_v44, 0.0 }
 0x108   :  { %4745 = vmatmul.msk.bf16.gmra.mxu1 %vm933_vm0, %v5065_v32 }
 0x109   :  { %4711 = vmatmul.msk.bf16.gmra.mxu0 %vm933_vm0, %v5031_v42  ;;  %v2239_v61 = vpack.c.bf16 %v1983_v55, %v1983_v55  ;;  %v1537_v42 = vpop.f32.mrf.mxu1  ;;  %v5522_v55 = vpop.f32.mrf.mxu2 }
 0x10a   :  { %4805 = vmatmul.msk.bf16.gmra.mxu3 %vm933_vm0, %v5125_v40  ;;  %6724 = vst [vmem:[#allocation10_spill] sm:$0xff] %v5522_v55 }
 0x10b   :  { %2602 = vmatpush.bf16.msrb.mxu1 %v2575_v51  ;;  %v2553_v3 = vunpack.c.l.b16 %v2239_v61  ;;  %v2051_v51 = vmax.f32 %v1537_v42, 0.0 }
 0x10d   :  { %v2307_v56 = vpack.c.bf16 %v2051_v51, %v2051_v51 }
 0x10e   :  { %v1369_v58 = vpop.f32.mrf.mxu0 }
 0x10f   :  { %v1984_v62 = vmax.f32 %v1369_v58, 0.0  ;;  %2603 = vmatpush.bf16.msrb.mxu1 %v2574_v57  ;;  %v5066_v57 = vld [vmem:[%s6710_s0 + $0x198] sm:$0xff] }
 0x111   :  { %v2240_v63 = vpack.c.bf16 %v1984_v62, %v1984_v62  ;;  %v1539_v50 = vpop.f32.mrf.mxu1 }
 0x112   :  { %v2052_v53 = vmax.f32 %v1539_v50, 0.0 }
 0x113   :  { %v2554_v4 = vunpack.c.l.b16 %v2240_v63  ;;  %2604 = vmatpush.bf16.msrb.mxu1 %v2573_v0  ;;  %v2825_v63 = vunpack.c.l.b16 %v2307_v56  ;;  %v5037_v56 = vld [vmem:[%s6710_s0 + $0xb0] sm:$0xff] }
 0x114   :  { %v2308_v58 = vpack.c.bf16 %v2052_v53, %v2052_v53 }
 0x115   :  { %v5462_v7 = vpack.c.b16 %v2554_v4, %v2553_v3  ;;  %v5035_v3 = vld [vmem:[%s6710_s0 + $0xa0] sm:$0xff] }
 0x116   :  { %v1372_v9 = vpop.f32.mrf.mxu0  ;;  %v2826_v0 = vunpack.c.l.b16 %v2308_v58 }
 0x117   :  { %2605 = vmatpush.bf16.msrb.mxu1 %v5362_v60  ;;  %v1985_v12 = vmax.f32 %v1372_v9, 0.0  ;;  %v5478_v60 = vpop.f32.mrf.mxu3 }
 0x118   :  { %6722 = vst [vmem:[#allocation8_spill] sm:$0xff] %v5478_v60  ;;  %4746 = vmatmul.msk.bf16.gmra.mxu1 %vm933_vm0, %v5066_v57  ;;  %v5544_v8 = vpack.c.b16 %v2826_v0, %v2825_v63  ;;  %v5128_v57 = vld [vmem:[%s6710_s0 + $0x388] sm:$0xff] }
 0x119   :  { %4712 = vmatmul.msk.bf16.gmra.mxu0 %vm933_vm0, %v5032_v6  ;;  %v2241_v15 = vpack.c.bf16 %v1985_v12, %v1985_v12  ;;  %v1542_v9 = vpop.f32.mrf.mxu1  ;;  %v5548_v12 = vpop.f32.mrf.mxu2 }
 0x11a   :  { %4806 = vmatmul.msk.bf16.gmra.mxu3 %vm933_vm0, %v5126_v5 }
 0x11b   :  { %2606 = vmatpush.bf16.msrb.mxu1 %v5344_v47  ;;  %v2555_v20 = vunpack.c.l.b16 %v2241_v15  ;;  %v5093_v47 = vld [vmem:[%s6710_s0 + $0x270] sm:$0xff] }
 0x11c   :  { %4773 = vmatmul.msk.bf16.gmra.mxu2 %vm933_vm0, %v5093_v47  ;;  %v5067_v47 = vld [vmem:[%s6710_s0 + $0x1a0] sm:$0xff] }
 0x11e   :  { %v1374_v13 = vpop.f32.mrf.mxu0 }
 0x11f   :  { %v1986_v16 = vmax.f32 %v1374_v13, 0.0  ;;  %2607 = vmatpush.bf16.msrb.mxu1 %v5327_v34  ;;  %v5033_v34 = vld [vmem:[%s6710_s0 + $0x90] sm:$0xff] }
 0x121   :  { %v2242_v17 = vpack.c.bf16 %v1986_v16, %v1986_v16  ;;  %v1544_v16 = vpop.f32.mrf.mxu1 }
 0x122   :  { %v2054_v18 = vmax.f32 %v1544_v16, 0.0 }
 0x123   :  { %v2556_v21 = vunpack.c.l.b16 %v2242_v17  ;;  %2608 = vmatpush.bf16.msrb.mxu1 %v5317_v23  ;;  %v5496_v23 = vpop.f32.mrf.mxu3  ;;  %v2053_v17 = vmax.f32 %v1542_v9, 0.0 }
 0x125   :  { %v5488_v22 = vpack.c.b16 %v2556_v21, %v2555_v20  ;;  %v5554_v20 = vpop.f32.mrf.mxu2  ;;  %v2309_v21 = vpack.c.bf16 %v2053_v17, %v2053_v17 }
 0x126   :  { %v1377_v25 = vpop.f32.mrf.mxu0 }
 0x127   :  { %v1987_v26 = vmax.f32 %v1377_v25, 0.0  ;;  %v2827_v25 = vunpack.c.l.b16 %v2309_v21 }
 0x128   :  { %4747 = vmatmul.msk.bf16.gmra.mxu1 %vm933_vm0, %v5067_v47 }
 0x129   :  { %4713 = vmatmul.msk.bf16.gmra.mxu0 %vm933_vm0, %v5033_v34  ;;  %v2243_v28 = vpack.c.bf16 %v1987_v26, %v1987_v26  ;;  %v2310_v34 = vpack.c.bf16 %v2054_v18, %v2054_v18  ;;  %v5069_v18 = vld [vmem:[%s6710_s0 + $0x1b0] sm:$0xff] }
 0x12b   :  { %v5501_v33 = vpop.f32.mrf.mxu3  ;;  %v2557_v35 = vunpack.c.l.b16 %v2243_v28  ;;  %v2828_v26 = vunpack.c.l.b16 %v2310_v34  ;;  %v5036_v28 = vld [vmem:[%s6710_s0 + $0xa8] sm:$0xff] }
 0x12c   :  { %4774 = vmatmul.msk.bf16.gmra.mxu2 %vm933_vm0, %v5094_v37 }
 0x12d   :  { %v5574_v32 = vpack.c.b16 %v2828_v26, %v2827_v25  ;;  %v5098_v26 = vld [vmem:[%s6710_s0 + $0x298] sm:$0xff] }
 0x12e   :  { %v1379_v27 = vpop.f32.mrf.mxu0 }
 0x12f   :  { %v1988_v29 = vmax.f32 %v1379_v27, 0.0  ;;  %v5096_v27 = vld [vmem:[%s6710_s0 + $0x288] sm:$0xff] }
 0x131   :  { %v2244_v30 = vpack.c.bf16 %v1988_v29, %v1988_v29  ;;  %v5127_v29 = vld [vmem:[%s6710_s0 + $0x380] sm:$0xff] }
 0x132   :  { %4807 = vmatmul.msk.bf16.gmra.mxu3 %vm933_vm0, %v5127_v29 }
 0x133   :  { %v2558_v36 = vunpack.c.l.b16 %v2244_v30  ;;  %v5520_v44 = vpop.f32.mrf.mxu3 }
 0x135   :  { %v5510_v39 = vpack.c.b16 %v2558_v36, %v2557_v35  ;;  %v1547_v35 = vpop.f32.mrf.mxu1  ;;  %v5578_v36 = vpop.f32.mrf.mxu2 }
 0x136   :  { %v1382_v41 = vpop.f32.mrf.mxu0 }
 0x137   :  { %v1989_v45 = vmax.f32 %v1382_v41, 0.0  ;;  %v2055_v41 = vmax.f32 %v1547_v35, 0.0 }
 0x139   :  { %4714 = vmatmul.msk.bf16.gmra.mxu0 %vm933_vm0, %v5034_v38  ;;  %v2245_v48 = vpack.c.bf16 %v1989_v45, %v1989_v45 }
 0x13b   :  { %v5527_v59 = vpop.f32.mrf.mxu3  ;;  %v2559_v61 = vunpack.c.l.b16 %v2245_v48  ;;  %v5068_v48 = vld [vmem:[%s6710_s0 + $0x1a8] sm:$0xff] }
 0x13c   :  { %4775 = vmatmul.msk.bf16.gmra.mxu2 %vm933_vm0, %v5095_v1  ;;  %4748 = vmatmul.msk.bf16.gmra.mxu1 %vm933_vm0, %v5068_v48 }
 0x13d   :  { %v1549_v40 = vpop.f32.mrf.mxu1  ;;  %v5584_v45 = vpop.f32.mrf.mxu2 }
 0x13e   :  { %v1384_v46 = vpop.f32.mrf.mxu0  ;;  %v2056_v42 = vmax.f32 %v1549_v40, 0.0 }
 0x13f   :  { %v1990_v49 = vmax.f32 %v1384_v46, 0.0  ;;  %v2311_v46 = vpack.c.bf16 %v2055_v41, %v2055_v41 }
 0x141   :  { %v2246_v54 = vpack.c.bf16 %v1990_v49, %v1990_v49  ;;  %v2312_v49 = vpack.c.bf16 %v2056_v42, %v2056_v42  ;;  %v2829_v51 = vunpack.c.l.b16 %v2311_v46 }
 0x142   :  { %4808 = vmatmul.msk.bf16.gmra.mxu3 %vm933_vm0, %v5128_v57 }
 0x143   :  { %v2560_v62 = vunpack.c.l.b16 %v2246_v54  ;;  %v5550_v13 = vpop.f32.mrf.mxu3  ;;  %v2830_v53 = vunpack.c.l.b16 %v2312_v49  ;;  %v5097_v54 = vld [vmem:[%s6710_s0 + $0x290] sm:$0xff] }
 0x145   :  { %v5536_v4 = vpack.c.b16 %v2560_v62, %v2559_v61  ;;  %v5602_v61 = vpack.c.b16 %v2830_v53, %v2829_v51  ;;  %v1552_v62 = vpop.f32.mrf.mxu1  ;;  %v5606_v63 = vpop.f32.mrf.mxu2 }
 0x146   :  { %v5541_v6 = vpop.f32.mrf.mxu0  ;;  %v2057_v5 = vmax.f32 %v1552_v62, 0.0 }
 0x148   :  { %v2313_v17 = vpack.c.bf16 %v2057_v5, %v2057_v5 }
 0x149   :  { %4715 = vmatmul.msk.bf16.gmra.mxu0 %vm933_vm0, %v5035_v3 }
 0x14a   :  { %v2831_v34 = vunpack.c.l.b16 %v2313_v17 }
 0x14b   :  { %v5559_v24 = vpop.f32.mrf.mxu3 }
 0x14c   :  { %4776 = vmatmul.msk.bf16.gmra.mxu2 %vm933_vm0, %v5096_v27  ;;  %4749 = vmatmul.msk.bf16.gmra.mxu1 %vm933_vm0, %v5069_v18  ;;  %v5038_v27 = vld [vmem:[%s6710_s0 + $0xb8] sm:$0xff] }
 0x14d   :  { %v1554_v3 = vpop.f32.mrf.mxu1  ;;  %v5610_v16 = vpop.f32.mrf.mxu2 }
 0x14e   :  { %v5552_v15 = vpop.f32.mrf.mxu0  ;;  %v2058_v9 = vmax.f32 %v1554_v3, 0.0 }
 0x150   :  { %v2314_v21 = vpack.c.bf16 %v2058_v9, %v2058_v9 }
 0x152   :  { %v2832_v25 = vunpack.c.l.b16 %v2314_v21  ;;  %v5070_v21 = vld [vmem:[%s6710_s0 + $0x1b8] sm:$0xff] }
 0x153   :  { %v5580_v37 = vpop.f32.mrf.mxu3 }
 0x154   :  { %6725 = vst [vmem:[#allocation11_spill] sm:$0xff] %v5580_v37  ;;  %v5628_v35 = vpack.c.b16 %v2832_v25, %v2831_v34 }
 0x155   :  { %v1557_v40 = vpop.f32.mrf.mxu1  ;;  %v5632_v41 = vpop.f32.mrf.mxu2 }
 0x156   :  { %v5571_v30 = vpop.f32.mrf.mxu0  ;;  %v2059_v57 = vmax.f32 %v1557_v40, 0.0  ;;  %v1992_v40 = vmax.f32 %v5552_v15, 0.0 }
 0x158   :  { %v2315_v18 = vpack.c.bf16 %v2059_v57, %v2059_v57 }
 0x159   :  { %4716 = vmatmul.msk.bf16.gmra.mxu0 %vm933_vm0, %v5036_v28  ;;  %v5129_v28 = vld [vmem:[%s6710_s0 + $0x390] sm:$0xff] }
 0x15a   :  { %4809 = vmatmul.msk.bf16.gmra.mxu3 %vm933_vm0, %v5129_v28  ;;  %v2833_v28 = vunpack.c.l.b16 %v2315_v18 }
 0x15b   :  { %v5589_v50 = vpop.f32.mrf.mxu3 }
 0x15c   :  { %6726 = vst [vmem:[#allocation12_spill] sm:$0xff] %v5589_v50  ;;  %4777 = vmatmul.msk.bf16.gmra.mxu2 %vm933_vm0, %v5097_v54  ;;  %4750 = vmatmul.msk.bf16.gmra.mxu1 %vm933_vm0, %v5070_v21 }
 0x15d   :  { %v5637_v17 = vpop.f32.mrf.mxu2 }
 0x15e   :  { %v5582_v38 = vpop.f32.mrf.mxu0 }
 0x15f   :  { %v1994_v3 = vmax.f32 %v5582_v38, 0.0 }
 0x163   :  { %v5608_v0 = vpop.f32.mrf.mxu3 }
 0x164   :  { %6727 = vst [vmem:[#allocation13_spill] sm:$0xff] %v5608_v0 }
 0x165   :  { %v5662_v18 = vpop.f32.mrf.mxu2 }
 0x166   :  { %v1397_v58 = vpop.f32.mrf.mxu0 }
 0x167   :  { %v1995_v51 = vmax.f32 %v1397_v58, 0.0  ;;  %v1993_v58 = vmax.f32 %v5571_v30, 0.0  ;;  %v5039_v30 = vld [vmem:[%s6710_s0 + $0xc0] sm:$0xff] }
 0x169   :  { %4717 = vmatmul.msk.bf16.gmra.mxu0 %vm933_vm0, %v5037_v56  ;;  %v1559_v56 = vpop.f32.mrf.mxu1  ;;  %v2251_v25 = vpack.c.bf16 %v1995_v51, %v1995_v51  ;;  %v5130_v51 = vld [vmem:[%s6710_s0 + $0x398] sm:$0xff]  ;;  %v2249_v57 = vpack.c.bf16 %v1993_v58, %v1993_v58 }
 0x16a   :  { %v2060_v62 = vmax.f32 %v1559_v56, 0.0  ;;  %v1991_v56 = vmax.f32 %v5541_v6, 0.0  ;;  %4810 = vmatmul.msk.bf16.gmra.mxu3 %vm933_vm0, %v5130_v51 }
 0x16b   :  { %v5615_v47 = vpop.f32.mrf.mxu3  ;;  %v2565_v15 = vunpack.c.l.b16 %v2251_v25 }
 0x16c   :  { %6728 = vst [vmem:[#allocation14_spill] sm:$0xff] %v5615_v47  ;;  %4778 = vmatmul.msk.bf16.gmra.mxu2 %vm933_vm0, %v5098_v26  ;;  %v2316_v34 = vpack.c.bf16 %v2060_v62, %v2060_v62 }
 0x16d   :  { %v5666_v51 = vpop.f32.mrf.mxu2 }
 0x16e   :  { %v1399_v1 = vpop.f32.mrf.mxu0  ;;  %v2834_v38 = vunpack.c.l.b16 %v2316_v34  ;;  %v2247_v34 = vpack.c.bf16 %v1991_v56, %v1991_v56 }
 0x16f   :  { %v1996_v48 = vmax.f32 %v1399_v1, 0.0 }
 0x171   :  { %v2252_v5 = vpack.c.bf16 %v1996_v48, %v1996_v48  ;;  %v1562_v62 = vpop.f32.mrf.mxu1 }
 0x173   :  { %v5634_v42 = vpop.f32.mrf.mxu3  ;;  %v2566_v48 = vunpack.c.l.b16 %v2252_v5 }
 0x174   :  { %6729 = vst [vmem:[#allocation15_spill] sm:$0xff] %v5634_v42 }
 0x176   :  { %v1402_v29 = vpop.f32.mrf.mxu0 }
 0x177   :  { %v1997_v46 = vmax.f32 %v1402_v29, 0.0  ;;  %v5099_v29 = vld [vmem:[%s6710_s0 + $0x2a0] sm:$0xff] }
 0x179   :  { %4718 = vmatmul.msk.bf16.gmra.mxu0 %vm933_vm0, %v5038_v27  ;;  %v2253_v53 = vpack.c.bf16 %v1997_v46, %v1997_v46  ;;  %v2250_v46 = vpack.c.bf16 %v1994_v3, %v1994_v3  ;;  %v2248_v3 = vpack.c.bf16 %v1992_v40, %v1992_v40  ;;  %v1564_v40 = vpop.f32.mrf.mxu1 }
 0x17b   :  { %v5642_v1 = vpop.f32.mrf.mxu3  ;;  %v2567_v26 = vunpack.c.l.b16 %v2253_v53  ;;  %v2564_v5 = vunpack.c.l.b16 %v2250_v46  ;;  %v2562_v6 = vunpack.c.l.b16 %v2248_v3  ;;  %v2061_v46 = vmax.f32 %v1562_v62, 0.0 }
 0x17c   :  { %6730 = vst [vmem:[#allocation16_spill] sm:$0xff] %v5642_v1  ;;  %4779 = vmatmul.msk.bf16.gmra.mxu2 %vm933_vm0, %v5099_v29 }
 0x17e   :  { %v1404_v49 = vpop.f32.mrf.mxu0 }
 0x17f   :  { %v1998_v54 = vmax.f32 %v1404_v49, 0.0 }
 0x181   :  { %v2254_v9 = vpack.c.bf16 %v1998_v54, %v1998_v54  ;;  %v5657_v54 = vpack.c.b16 %v2834_v38, %v2833_v28  ;;  %v2561_v28 = vunpack.c.l.b16 %v2247_v34  ;;  %v5100_v34 = vld [vmem:[%s6710_s0 + $0x2a8] sm:$0xff] }
 0x183   :  { %v2568_v27 = vunpack.c.l.b16 %v2254_v9  ;;  %v2583_v9 = vpack.c.b16 %v2566_v48, %v2565_v15  ;;  %v5664_v21 = vpop.f32.mrf.mxu3  ;;  %v2581_v48 = vpack.c.b16 %v2562_v6, %v2561_v28  ;;  %v2317_v15 = vpack.c.bf16 %v2061_v46, %v2061_v46  ;;  %v5131_v6 = vld [vmem:[%s6710_s0 + $0x3a0] sm:$0xff]  ;;  %v1567_v28 = vpop.f32.mrf.mxu1 }
 0x184   :  { %6731 = vst [vmem:[#allocation17_spill] sm:$0xff] %v5664_v21  ;;  %4811 = vmatmul.msk.bf16.gmra.mxu3 %vm933_vm0, %v5131_v6  ;;  %v5101_v6 = vld [vmem:[%s6710_s0 + $0x2b0] sm:$0xff] }
 0x185   :  { %v2584_v49 = vpack.c.b16 %v2568_v27, %v2567_v26  ;;  %v2563_v26 = vunpack.c.l.b16 %v2249_v57 }
 0x186   :  { %v1407_v53 = vpop.f32.mrf.mxu0 }
 0x187   :  { %2615 = vmatpush.bf16.msrb.mxu2 %v2584_v49  ;;  %v1999_v27 = vmax.f32 %v1407_v53, 0.0  ;;  %v2582_v58 = vpack.c.b16 %v2564_v5, %v2563_v26  ;;  %v2062_v49 = vmax.f32 %v1564_v40, 0.0  ;;  %v5071_v53 = vld [vmem:[%s6710_s0 + $0x1c0] sm:$0xff]  ;;  %v5040_v26 = vld [vmem:[%s6710_s0 + $0xc8] sm:$0xff] }
 0x188   :  { %4751 = vmatmul.msk.bf16.gmra.mxu1 %vm933_vm0, %v5071_v53 }
 0x189   :  { %4719 = vmatmul.msk.bf16.gmra.mxu0 %vm933_vm0, %v5039_v30  ;;  %v2255_v38 = vpack.c.bf16 %v1999_v27, %v1999_v27  ;;  %v2318_v56 = vpack.c.bf16 %v2062_v49, %v2062_v49 }
 0x18b   :  { %2616 = vmatpush.bf16.msrb.mxu2 %v2583_v9  ;;  %v5671_v57 = vpop.f32.mrf.mxu3  ;;  %v2671_v3 = vunpack.c.l.b16 %v2255_v38  ;;  %v2835_v9 = vunpack.c.l.b16 %v2317_v15  ;;  %v2836_v62 = vunpack.c.l.b16 %v2318_v56  ;;  %v5691_v38 = vpop.f32.mrf.mxu2  ;;  %v2063_v15 = vmax.f32 %v1567_v28, 0.0 }
 0x18c   :  { %6732 = vst [vmem:[#allocation18_spill] sm:$0xff] %v5671_v57  ;;  %4780 = vmatmul.msk.bf16.gmra.mxu2 %vm933_vm0, %v5100_v34 }
 0x18e   :  { %v1409_v25 = vpop.f32.mrf.mxu0 }
 0x18f   :  { %v2000_v29 = vmax.f32 %v1409_v25, 0.0  ;;  %2617 = vmatpush.bf16.msrb.mxu2 %v2582_v58  ;;  %v5685_v25 = vpack.c.b16 %v2836_v62, %v2835_v9 }
 0x191   :  { %v2256_v30 = vpack.c.bf16 %v2000_v29, %v2000_v29 }
 0x193   :  { %v2672_v5 = vunpack.c.l.b16 %v2256_v30  ;;  %2618 = vmatpush.bf16.msrb.mxu2 %v2581_v48  ;;  %v5693_v29 = vpop.f32.mrf.mxu3  ;;  %v1569_v48 = vpop.f32.mrf.mxu1 }
 0x194   :  { %6733 = vst [vmem:[#allocation19_spill] sm:$0xff] %v5693_v29  ;;  %v5697_v56 = vpop.f32.mrf.mxu2 }
 0x195   :  { %v5680_v27 = vpack.c.b16 %v2672_v5, %v2671_v3  ;;  %v2319_v3 = vpack.c.bf16 %v2063_v15, %v2063_v15  ;;  %v5072_v5 = vld [vmem:[%s6710_s0 + $0x1c8] sm:$0xff] }
 0x196   :  { %v1412_v58 = vpop.f32.mrf.mxu0 }
 0x197   :  { %2619 = vmatpush.bf16.msrb.mxu2 %v5536_v4  ;;  %v2001_v40 = vmax.f32 %v1412_v58, 0.0  ;;  %v2064_v4 = vmax.f32 %v1569_v48, 0.0  ;;  %v5041_v58 = vld [vmem:[%s6710_s0 + $0xd0] sm:$0xff] }
 0x198   :  { %4752 = vmatmul.msk.bf16.gmra.mxu1 %vm933_vm0, %v5072_v5 }
 0x199   :  { %4720 = vmatmul.msk.bf16.gmra.mxu0 %vm933_vm0, %v5040_v26  ;;  %v2257_v49 = vpack.c.bf16 %v2001_v40, %v2001_v40  ;;  %v2320_v9 = vpack.c.bf16 %v2064_v4, %v2064_v4  ;;  %v2939_v26 = vunpack.c.l.b16 %v2319_v3  ;;  %v5132_v40 = vld [vmem:[%s6710_s0 + $0x3a8] sm:$0xff] }
 0x19a   :  { %4812 = vmatmul.msk.bf16.gmra.mxu3 %vm933_vm0, %v5132_v40 }
 0x19b   :  { %2620 = vmatpush.bf16.msrb.mxu2 %v5510_v39  ;;  %v5702_v62 = vpop.f32.mrf.mxu3  ;;  %v2673_v39 = vunpack.c.l.b16 %v2257_v49  ;;  %v1572_v49 = vpop.f32.mrf.mxu1 }
 0x19c   :  { %6734 = vst [vmem:[#allocation20_spill] sm:$0xff] %v5702_v62  ;;  %4781 = vmatmul.msk.bf16.gmra.mxu2 %vm933_vm0, %v5101_v6 }
 0x19e   :  { %v1414_v46 = vpop.f32.mrf.mxu0 }
 0x19f   :  { %v2002_v30 = vmax.f32 %v1414_v46, 0.0  ;;  %2621 = vmatpush.bf16.msrb.mxu2 %v5488_v22  ;;  %v2940_v22 = vunpack.c.l.b16 %v2320_v9  ;;  %v2065_v9 = vmax.f32 %v1572_v49, 0.0  ;;  %v5102_v49 = vld [vmem:[%s6710_s0 + $0x2b8] sm:$0xff] }
 0x1a1   :  { %v2258_v53 = vpack.c.bf16 %v2002_v30, %v2002_v30  ;;  %v5722_v30 = vpop.f32.mrf.mxu2 }
 0x1a3   :  { %v2674_v34 = vunpack.c.l.b16 %v2258_v53  ;;  %2622 = vmatpush.bf16.msrb.mxu2 %v5462_v7  ;;  %v5718_v7 = vpack.c.b16 %v2940_v22, %v2939_v26  ;;  %v5724_v48 = vpop.f32.mrf.mxu3  ;;  %v1574_v5 = vpop.f32.mrf.mxu1  ;;  %v2321_v26 = vpack.c.bf16 %v2065_v9, %v2065_v9  ;;  %v5073_v22 = vld [vmem:[%s6710_s0 + $0x1d0] sm:$0xff] }
 0x1a4   :  { %6735 = vst [vmem:[#allocation21_spill] sm:$0xff] %v5724_v48  ;;  %v5104_v48 = vld [vmem:[%s6710_s0 + $0x2c8] sm:$0xff] }
 0x1a5   :  { %v5712_v28 = vpack.c.b16 %v2674_v34, %v2673_v39  ;;  %v2066_v39 = vmax.f32 %v1574_v5, 0.0  ;;  %v5133_v5 = vld [vmem:[%s6710_s0 + $0x3b0] sm:$0xff] }
 0x1a6   :  { %v1417_v46 = vpop.f32.mrf.mxu0 }
 0x1a7   :  { %v2003_v15 = vmax.f32 %v1417_v46, 0.0  ;;  %v2941_v46 = vunpack.c.l.b16 %v2321_v26 }
 0x1a8   :  { %4753 = vmatmul.msk.bf16.gmra.mxu1 %vm933_vm0, %v5073_v22 }
 0x1a9   :  { %4721 = vmatmul.msk.bf16.gmra.mxu0 %vm933_vm0, %v5041_v58  ;;  %v2259_v53 = vpack.c.bf16 %v2003_v15, %v2003_v15  ;;  %v5726_v6 = vpop.f32.mrf.mxu2  ;;  %v2322_v58 = vpack.c.bf16 %v2066_v39, %v2066_v39 }
 0x1aa   :  { %4813 = vmatmul.msk.bf16.gmra.mxu3 %vm933_vm0, %v5133_v5 }
 0x1ab   :  { %v5731_v40 = vpop.f32.mrf.mxu3  ;;  %v2675_v50 = vunpack.c.l.b16 %v2259_v53  ;;  %v2942_v15 = vunpack.c.l.b16 %v2322_v58  ;;  %v1577_v39 = vpop.f32.mrf.mxu1 }
 0x1ac   :  { %6736 = vst [vmem:[#allocation22_spill] sm:$0xff] %v5731_v40  ;;  %4782 = vmatmul.msk.bf16.gmra.mxu2 %vm933_vm0, %v5102_v49  ;;  %v2067_v0 = vmax.f32 %v1577_v39, 0.0 }
 0x1ad   :  { %v5746_v9 = vpack.c.b16 %v2942_v15, %v2941_v46  ;;  %v5074_v15 = vld [vmem:[%s6710_s0 + $0x1d8] sm:$0xff] }
 0x1ae   :  { %v1419_v4 = vpop.f32.mrf.mxu0  ;;  %v2323_v46 = vpack.c.bf16 %v2067_v0, %v2067_v0  ;;  %v5043_v0 = vld [vmem:[%s6710_s0 + $0xe0] sm:$0xff] }
 0x1af   :  { %v2004_v3 = vmax.f32 %v1419_v4, 0.0  ;;  %v5042_v4 = vld [vmem:[%s6710_s0 + $0xd8] sm:$0xff] }
 0x1b1   :  { %v2260_v34 = vpack.c.bf16 %v2004_v3, %v2004_v3 }
 0x1b3   :  { %v2676_v37 = vunpack.c.l.b16 %v2260_v34  ;;  %v5750_v34 = vpop.f32.mrf.mxu2  ;;  %v5752_v26 = vpop.f32.mrf.mxu3 }
 0x1b4   :  { %6737 = vst [vmem:[#allocation23_spill] sm:$0xff] %v5752_v26  ;;  %v1579_v47 = vpop.f32.mrf.mxu1 }
 0x1b5   :  { %v5740_v3 = vpack.c.b16 %v2676_v37, %v2675_v50  ;;  %v2068_v1 = vmax.f32 %v1579_v47, 0.0  ;;  %v5103_v47 = vld [vmem:[%s6710_s0 + $0x2c0] sm:$0xff] }
 0x1b6   :  { %v1422_v53 = vpop.f32.mrf.mxu0 }
 0x1b7   :  { %v2005_v37 = vmax.f32 %v1422_v53, 0.0  ;;  %v2943_v53 = vunpack.c.l.b16 %v2323_v46 }
 0x1b8   :  { %4754 = vmatmul.msk.bf16.gmra.mxu1 %vm933_vm0, %v5074_v15 }
 0x1b9   :  { %4722 = vmatmul.msk.bf16.gmra.mxu0 %vm933_vm0, %v5042_v4  ;;  %v2261_v22 = vpack.c.bf16 %v2005_v37, %v2005_v37  ;;  %v2324_v4 = vpack.c.bf16 %v2068_v1, %v2068_v1  ;;  %v5134_v1 = vld [vmem:[%s6710_s0 + $0x3b8] sm:$0xff] }
 0x1ba   :  { %4814 = vmatmul.msk.bf16.gmra.mxu3 %vm933_vm0, %v5134_v1 }
 0x1bb   :  { %v5754_v49 = vpop.f32.mrf.mxu2  ;;  %v5759_v5 = vpop.f32.mrf.mxu3  ;;  %v2677_v21 = vunpack.c.l.b16 %v2261_v22  ;;  %v2944_v37 = vunpack.c.l.b16 %v2324_v4 }
 0x1bc   :  { %6738 = vst [vmem:[#allocation24_spill] sm:$0xff] %v5759_v5  ;;  %4783 = vmatmul.msk.bf16.gmra.mxu2 %vm933_vm0, %v5103_v47  ;;  %v1582_v22 = vpop.f32.mrf.mxu1 }
 0x1bd   :  { %v2069_v15 = vmax.f32 %v1582_v22, 0.0  ;;  %v5044_v22 = vld [vmem:[%s6710_s0 + $0xe8] sm:$0xff] }
 0x1be   :  { %v1424_v50 = vpop.f32.mrf.mxu0 }
 0x1bf   :  { %v2006_v58 = vmax.f32 %v1424_v50, 0.0  ;;  %v2325_v40 = vpack.c.bf16 %v2069_v15, %v2069_v15 }
 0x1c1   :  { %v2262_v57 = vpack.c.bf16 %v2006_v58, %v2006_v58 }
 0x1c3   :  { %v2678_v62 = vunpack.c.l.b16 %v2262_v57  ;;  %v5776_v57 = vpack.c.b16 %v2944_v37, %v2943_v53  ;;  %v5780_v58 = vpop.f32.mrf.mxu2  ;;  %v5782_v46 = vpop.f32.mrf.mxu3  ;;  %v5075_v53 = vld [vmem:[%s6710_s0 + $0x1e0] sm:$0xff] }
 0x1c4   :  { %6739 = vst [vmem:[#allocation25_spill] sm:$0xff] %v5780_v58 }
 0x1c5   :  { %v5768_v39 = vpack.c.b16 %v2678_v62, %v2677_v21  ;;  %6740 = vst [vmem:[#allocation26_spill] sm:$0xff] %v5782_v46  ;;  %v1584_v62 = vpop.f32.mrf.mxu1 }
 0x1c6   :  { %v5773_v50 = vpop.f32.mrf.mxu0  ;;  %v2070_v4 = vmax.f32 %v1584_v62, 0.0  ;;  %v5135_v62 = vld [vmem:[%s6710_s0 + $0x3c0] sm:$0xff] }
 0x1c8   :  { %v2326_v37 = vpack.c.bf16 %v2070_v4, %v2070_v4  ;;  %4755 = vmatmul.msk.bf16.gmra.mxu1 %vm933_vm0, %v5075_v53 }
 0x1c9   :  { %4723 = vmatmul.msk.bf16.gmra.mxu0 %vm933_vm0, %v5043_v0  ;;  %v2945_v0 = vunpack.c.l.b16 %v2325_v40 }
 0x1ca   :  { %v2946_v1 = vunpack.c.l.b16 %v2326_v37  ;;  %4815 = vmatmul.msk.bf16.gmra.mxu3 %vm933_vm0, %v5135_v62 }
 0x1cb   :  { %v5786_v29 = vpop.f32.mrf.mxu2  ;;  %v5791_v47 = vpop.f32.mrf.mxu3 }
 0x1cc   :  { %6741 = vst [vmem:[#allocation27_spill] sm:$0xff] %v5786_v29  ;;  %4784 = vmatmul.msk.bf16.gmra.mxu2 %vm933_vm0, %v5104_v48  ;;  %v5806_v40 = vpack.c.b16 %v2946_v1, %v2945_v0  ;;  %v5076_v48 = vld [vmem:[%s6710_s0 + $0x1e8] sm:$0xff] }
 0x1cd   :  { %6742 = vst [vmem:[#allocation28_spill] sm:$0xff] %v5791_v47  ;;  %v1587_v4 = vpop.f32.mrf.mxu1 }
 0x1ce   :  { %v5784_v21 = vpop.f32.mrf.mxu0  ;;  %v2071_v47 = vmax.f32 %v1587_v4, 0.0 }
 0x1d0   :  { %v2327_v58 = vpack.c.bf16 %v2071_v47, %v2071_v47  ;;  %v5136_v47 = vld [vmem:[%s6710_s0 + $0x3c8] sm:$0xff] }
 0x1d3   :  { %v5810_v53 = vpop.f32.mrf.mxu2  ;;  %v5812_v37 = vpop.f32.mrf.mxu3 }
 0x1d4   :  { %6743 = vst [vmem:[#allocation29_spill] sm:$0xff] %v5810_v53 }
 0x1d5   :  { %6744 = vst [vmem:[#allocation30_spill] sm:$0xff] %v5812_v37  ;;  %v1589_v26 = vpop.f32.mrf.mxu1  ;;  %v5105_v37 = vld [vmem:[%s6710_s0 + $0x2d0] sm:$0xff] }
 0x1d6   :  { %v5803_v15 = vpop.f32.mrf.mxu0  ;;  %v2072_v46 = vmax.f32 %v1589_v26, 0.0  ;;  %v5045_v26 = vld [vmem:[%s6710_s0 + $0xf0] sm:$0xff] }
 0x1d8   :  { %v2328_v0 = vpack.c.bf16 %v2072_v46, %v2072_v46  ;;  %4756 = vmatmul.msk.bf16.gmra.mxu1 %vm933_vm0, %v5076_v48 }
 0x1d9   :  { %4724 = vmatmul.msk.bf16.gmra.mxu0 %vm933_vm0, %v5044_v22  ;;  %v2947_v22 = vunpack.c.l.b16 %v2327_v58 }
 0x1da   :  { %v2948_v62 = vunpack.c.l.b16 %v2328_v0  ;;  %4816 = vmatmul.msk.bf16.gmra.mxu3 %vm933_vm0, %v5136_v47 }
 0x1db   :  { %v5816_v29 = vpop.f32.mrf.mxu2  ;;  %v5821_v1 = vpop.f32.mrf.mxu3 }
 0x1dc   :  { %6745 = vst [vmem:[#allocation31_spill] sm:$0xff] %v5816_v29  ;;  %4785 = vmatmul.msk.bf16.gmra.mxu2 %vm933_vm0, %v5105_v37  ;;  %v5834_v46 = vpack.c.b16 %v2948_v62, %v2947_v22  ;;  %v5077_v37 = vld [vmem:[%s6710_s0 + $0x1f0] sm:$0xff] }
 0x1dd   :  { %6746 = vst [vmem:[#allocation32_spill] sm:$0xff] %v5821_v1  ;;  %v1592_v58 = vpop.f32.mrf.mxu1 }
 0x1de   :  { %v5814_v5 = vpop.f32.mrf.mxu0  ;;  %v2073_v53 = vmax.f32 %v1592_v58, 0.0 }
 0x1e0   :  { %v2329_v43 = vpack.c.bf16 %v2073_v53, %v2073_v53  ;;  %v5137_v53 = vld [vmem:[%s6710_s0 + $0x3d0] sm:$0xff] }
 0x1e2   :  { %v2949_v47 = vunpack.c.l.b16 %v2329_v43 }
 0x1e3   :  { %v5838_v48 = vpop.f32.mrf.mxu2  ;;  %v5840_v0 = vpop.f32.mrf.mxu3 }
 0x1e4   :  { %6747 = vst [vmem:[#allocation33_spill] sm:$0xff] %v5838_v48 }
 0x1e5   :  { %6748 = vst [vmem:[#allocation34_spill] sm:$0xff] %v5840_v0  ;;  %v1594_v29 = vpop.f32.mrf.mxu1  ;;  %v5106_v0 = vld [vmem:[%s6710_s0 + $0x2d8] sm:$0xff] }
 0x1e6   :  { %v1437_v4 = vpop.f32.mrf.mxu0  ;;  %v2074_v42 = vmax.f32 %v1594_v29, 0.0  ;;  %v5046_v29 = vld [vmem:[%s6710_s0 + $0xf8] sm:$0xff] }
 0x1e7   :  { %v2011_v14 = vmax.f32 %v1437_v4, 0.0  ;;  %v2009_v4 = vmax.f32 %v5803_v15, 0.0  ;;  %v5047_v15 = vld [vmem:[%s6710_s0 + $0x100] sm:$0xff] }
 0x1e8   :  { %v2330_v22 = vpack.c.bf16 %v2074_v42, %v2074_v42  ;;  %4757 = vmatmul.msk.bf16.gmra.mxu1 %vm933_vm0, %v5077_v37 }
 0x1e9   :  { %4725 = vmatmul.msk.bf16.gmra.mxu0 %vm933_vm0, %v5045_v26 }
 0x1ea   :  { %v2950_v26 = vunpack.c.l.b16 %v2330_v22  ;;  %4817 = vmatmul.msk.bf16.gmra.mxu3 %vm933_vm0, %v5137_v53 }
 0x1eb   :  { %v5842_v55 = vpop.f32.mrf.mxu2  ;;  %v5847_v62 = vpop.f32.mrf.mxu3 }
 0x1ec   :  { %6749 = vst [vmem:[#allocation35_spill] sm:$0xff] %v5842_v55  ;;  %4786 = vmatmul.msk.bf16.gmra.mxu2 %vm933_vm0, %v5106_v0  ;;  %v5860_v42 = vpack.c.b16 %v2950_v26, %v2949_v47  ;;  %v2010_v47 = vmax.f32 %v5814_v5, 0.0 }
 0x1ed   :  { %6750 = vst [vmem:[#allocation36_spill] sm:$0xff] %v5847_v62  ;;  %v1597_v43 = vpop.f32.mrf.mxu1 }
 0x1ee   :  { %v1439_v1 = vpop.f32.mrf.mxu0  ;;  %v2075_v2 = vmax.f32 %v1597_v43, 0.0  ;;  %v2266_v5 = vpack.c.bf16 %v2010_v47, %v2010_v47 }
 0x1ef   :  { %v2012_v55 = vmax.f32 %v1439_v1, 0.0 }
 0x1f1   :  { %v2268_v26 = vpack.c.bf16 %v2012_v55, %v2012_v55 }
 0x1f3   :  { %v5864_v37 = vpop.f32.mrf.mxu2  ;;  %v5866_v22 = vpop.f32.mrf.mxu3 }
 0x1f4   :  { %6751 = vst [vmem:[#allocation37_spill] sm:$0xff] %v5864_v37 }
 0x1f5   :  { %6752 = vst [vmem:[#allocation38_spill] sm:$0xff] %v5866_v22  ;;  %v1599_v19 = vpop.f32.mrf.mxu1  ;;  %v5078_v22 = vld [vmem:[%s6710_s0 + $0x1f8] sm:$0xff] }
 0x1f6   :  { %v1442_v58 = vpop.f32.mrf.mxu0  ;;  %v2076_v0 = vmax.f32 %v1599_v19, 0.0 }
 0x1f7   :  { %v2013_v62 = vmax.f32 %v1442_v58, 0.0 }
 0x1f8   :  { %v2332_v58 = vpack.c.bf16 %v2076_v0, %v2076_v0  ;;  %4758 = vmatmul.msk.bf16.gmra.mxu1 %vm933_vm0, %v5078_v22  ;;  %v2007_v22 = vmax.f32 %v5773_v50, 0.0 }
 0x1f9   :  { %4726 = vmatmul.msk.bf16.gmra.mxu0 %vm933_vm0, %v5046_v29  ;;  %v2269_v11 = vpack.c.bf16 %v2013_v62, %v2013_v62  ;;  %v2331_v29 = vpack.c.bf16 %v2075_v2, %v2075_v2  ;;  %v2008_v2 = vmax.f32 %v5784_v21, 0.0 }
 0x1fa   :  { %v2952_v55 = vunpack.c.l.b16 %v2332_v58  ;;  %v2682_v58 = vunpack.c.l.b16 %v2266_v5 }
 0x1fb   :  { %v5869_v53 = vpop.f32.mrf.mxu2  ;;  %v5874_v1 = vpop.f32.mrf.mxu3  ;;  %v2685_v62 = vunpack.c.l.b16 %v2269_v11  ;;  %v2951_v19 = vunpack.c.l.b16 %v2331_v29  ;;  %v5138_v11 = vld [vmem:[%s6710_s0 + $0x3d8] sm:$0xff]  ;;  %v2265_v29 = vpack.c.bf16 %v2009_v4, %v2009_v4 }
 0x1fc   :  { %6753 = vst [vmem:[#allocation39_spill] sm:$0xff] %v5869_v53  ;;  %v2684_v53 = vunpack.c.l.b16 %v2268_v26  ;;  %4818 = vmatmul.msk.bf16.gmra.mxu3 %vm933_vm0, %v5138_v11  ;;  %v2264_v26 = vpack.c.bf16 %v2008_v2, %v2008_v2 }
 0x1fd   :  { %6754 = vst [vmem:[#allocation40_spill] sm:$0xff] %v5874_v1  ;;  %v1602_v47 = vpop.f32.mrf.mxu1 }
 0x1fe   :  { %v1444_v48 = vpop.f32.mrf.mxu0  ;;  %v2680_v50 = vunpack.c.l.b16 %v2264_v26  ;;  %v2077_v5 = vmax.f32 %v1602_v47, 0.0 }
 0x1ff   :  { %v2014_v31 = vmax.f32 %v1444_v48, 0.0  ;;  %v2267_v48 = vpack.c.bf16 %v2011_v14, %v2011_v14 }
 0x201   :  { %v2270_v52 = vpack.c.bf16 %v2014_v31, %v2014_v31  ;;  %v5107_v31 = vld [vmem:[%s6710_s0 + $0x2e0] sm:$0xff]  ;;  %v2683_v21 = vunpack.c.l.b16 %v2267_v48 }
 0x202   :  { %4787 = vmatmul.msk.bf16.gmra.mxu2 %vm933_vm0, %v5107_v31  ;;  %v2263_v31 = vpack.c.bf16 %v2007_v22, %v2007_v22 }
 0x203   :  { %v2686_v43 = vunpack.c.l.b16 %v2270_v52  ;;  %v5889_v52 = vpack.c.b16 %v2952_v55, %v2951_v19  ;;  %v5896_v1 = vpop.f32.mrf.mxu3  ;;  %v2681_v19 = vunpack.c.l.b16 %v2265_v29 }
 0x204   :  { %6756 = vst [vmem:[#allocation42_spill] sm:$0xff] %v5896_v1 }
 0x205   :  { %v2710_v0 = vpack.c.b16 %v2686_v43, %v2685_v62  ;;  %v2709_v62 = vpack.c.b16 %v2684_v53, %v2683_v21  ;;  %v5894_v43 = vpop.f32.mrf.mxu2  ;;  %v2708_v4 = vpack.c.b16 %v2682_v58, %v2681_v19  ;;  %v1604_v2 = vpop.f32.mrf.mxu1 }
 0x206   :  { %v1447_v14 = vpop.f32.mrf.mxu0  ;;  %6755 = vst [vmem:[#allocation41_spill] sm:$0xff] %v5894_v43  ;;  %v2078_v11 = vmax.f32 %v1604_v2, 0.0  ;;  %v2333_v43 = vpack.c.bf16 %v2077_v5, %v2077_v5 }
 0x207   :  { %2735 = vmatpush.bf16.msrb.mxu3 %v2710_v0  ;;  %v2015_v55 = vmax.f32 %v1447_v14, 0.0  ;;  %v2679_v0 = vunpack.c.l.b16 %v2263_v31  ;;  %v5079_v14 = vld [vmem:[%s6710_s0 + $0x200] sm:$0xff]  ;;  %v5048_v31 = vld [vmem:[%s6710_s0 + $0x108] sm:$0xff] }
 0x208   :  { %v2334_v22 = vpack.c.bf16 %v2078_v11, %v2078_v11  ;;  %4759 = vmatmul.msk.bf16.gmra.mxu1 %vm933_vm0, %v5079_v14 }
 0x209   :  { %4727 = vmatmul.msk.bf16.gmra.mxu0 %vm933_vm0, %v5047_v15  ;;  %v2271_v37 = vpack.c.bf16 %v2015_v55, %v2015_v55  ;;  %v2707_v53 = vpack.c.b16 %v2680_v50, %v2679_v0 }
 0x20a   :  { %v2954_v47 = vunpack.c.l.b16 %v2334_v22 }
 0x20b   :  { %2736 = vmatpush.bf16.msrb.mxu3 %v2709_v62  ;;  %v5903_v29 = vpop.f32.mrf.mxu3  ;;  %v2687_v26 = vunpack.c.l.b16 %v2271_v37  ;;  %v2953_v62 = vunpack.c.l.b16 %v2333_v43  ;;  %v5139_v37 = vld [vmem:[%s6710_s0 + $0x3e0] sm:$0xff] }
 0x20c   :  { %6758 = vst [vmem:[#allocation44_spill] sm:$0xff] %v5903_v29  ;;  %4819 = vmatmul.msk.bf16.gmra.mxu3 %vm933_vm0, %v5139_v37  ;;  %v5109_v37 = vld [vmem:[%s6710_s0 + $0x2f0] sm:$0xff] }
 0x20d   :  { %v5898_v21 = vpop.f32.mrf.mxu2  ;;  %v5917_v50 = vpack.c.b16 %v2954_v47, %v2953_v62  ;;  %v1607_v43 = vpop.f32.mrf.mxu1 }
 0x20e   :  { %v1449_v48 = vpop.f32.mrf.mxu0  ;;  %6757 = vst [vmem:[#allocation43_spill] sm:$0xff] %v5898_v21 }
 0x20f   :  { %v2016_v60 = vmax.f32 %v1449_v48, 0.0  ;;  %2737 = vmatpush.bf16.msrb.mxu3 %v2708_v4 }
 0x211   :  { %v2272_v15 = vpack.c.bf16 %v2016_v60, %v2016_v60  ;;  %v5108_v60 = vld [vmem:[%s6710_s0 + $0x2e8] sm:$0xff] }
 0x212   :  { %4788 = vmatmul.msk.bf16.gmra.mxu2 %vm933_vm0, %v5108_v60 }
 0x213   :  { %v2688_v58 = vunpack.c.l.b16 %v2272_v15  ;;  %2738 = vmatpush.bf16.msrb.mxu3 %v2707_v53  ;;  %v5925_v48 = vpop.f32.mrf.mxu3  ;;  %v2079_v53 = vmax.f32 %v1607_v43, 0.0 }
 0x214   :  { %6760 = vst [vmem:[#allocation46_spill] sm:$0xff] %v5925_v48 }
 0x215   :  { %v5912_v19 = vpack.c.b16 %v2688_v58, %v2687_v26  ;;  %v5923_v4 = vpop.f32.mrf.mxu2  ;;  %v1609_v15 = vpop.f32.mrf.mxu1  ;;  %v2335_v26 = vpack.c.bf16 %v2079_v53, %v2079_v53  ;;  %v5080_v58 = vld [vmem:[%s6710_s0 + $0x208] sm:$0xff] }
 0x216   :  { %v1452_v55 = vpop.f32.mrf.mxu0  ;;  %6759 = vst [vmem:[#allocation45_spill] sm:$0xff] %v5923_v4 }
 0x217   :  { %2739 = vmatpush.bf16.msrb.mxu3 %v5768_v39  ;;  %v2017_v0 = vmax.f32 %v1452_v55, 0.0  ;;  %v2080_v39 = vmax.f32 %v1609_v15, 0.0  ;;  %v5049_v55 = vld [vmem:[%s6710_s0 + $0x110] sm:$0xff] }
 0x218   :  { %4760 = vmatmul.msk.bf16.gmra.mxu1 %vm933_vm0, %v5080_v58 }
 0x219   :  { %4728 = vmatmul.msk.bf16.gmra.mxu0 %vm933_vm0, %v5048_v31  ;;  %v2273_v5 = vpack.c.bf16 %v2017_v0, %v2017_v0  ;;  %v2336_v62 = vpack.c.bf16 %v2080_v39, %v2080_v39 }
 0x21b   :  { %2740 = vmatpush.bf16.msrb.mxu3 %v5740_v3  ;;  %v5934_v47 = vpop.f32.mrf.mxu3  ;;  %v2689_v3 = vunpack.c.l.b16 %v2273_v5  ;;  %v2956_v31 = vunpack.c.l.b16 %v2336_v62 }
 0x21c   :  { %6762 = vst [vmem:[#allocation48_spill] sm:$0xff] %v5934_v47 }
 0x21d   :  { %v5929_v22 = vpop.f32.mrf.mxu2 }
 0x21e   :  { %v1454_v2 = vpop.f32.mrf.mxu0  ;;  %6761 = vst [vmem:[#allocation47_spill] sm:$0xff] %v5929_v22 }
 0x21f   :  { %v2018_v11 = vmax.f32 %v1454_v2, 0.0  ;;  %2741 = vmatpush.bf16.msrb.mxu3 %v5712_v28  ;;  %v2955_v28 = vunpack.c.l.b16 %v2335_v26  ;;  %v1612_v2 = vpop.f32.mrf.mxu1 }
 0x220   :  { %v2081_v58 = vmax.f32 %v1612_v2, 0.0  ;;  %v5050_v2 = vld [vmem:[%s6710_s0 + $0x118] sm:$0xff] }
 0x221   :  { %v2274_v14 = vpack.c.bf16 %v2018_v11, %v2018_v11 }
 0x222   :  { %4789 = vmatmul.msk.bf16.gmra.mxu2 %vm933_vm0, %v5109_v37 }
 0x223   :  { %v2690_v60 = vunpack.c.l.b16 %v2274_v14  ;;  %2742 = vmatpush.bf16.msrb.mxu3 %v5680_v27  ;;  %v5140_v27 = vld [vmem:[%s6710_s0 + $0x3e8] sm:$0xff]  ;;  %v5958_v11 = vpop.f32.mrf.mxu3 }
 0x224   :  { %4820 = vmatmul.msk.bf16.gmra.mxu3 %vm933_vm0, %v5140_v27  ;;  %6765 = vst [vmem:[#allocation51_spill] sm:$0xff] %v5958_v11 }
 0x225   :  { %v5945_v43 = vpack.c.b16 %v2690_v60, %v2689_v3  ;;  %v5955_v5 = vpop.f32.mrf.mxu2  ;;  %v2337_v60 = vpack.c.bf16 %v2081_v58, %v2081_v58 }
 0x226   :  { %v1457_v0 = vpop.f32.mrf.mxu0  ;;  %6764 = vst [vmem:[#allocation50_spill] sm:$0xff] %v5955_v5 }
 0x227   :  { %2883 = vmatpush.bf16.msra.mxu3 %v5685_v25  ;;  %v5951_v25 = vpack.c.b16 %v2956_v31, %v2955_v28  ;;  %v2019_v15 = vmax.f32 %v1457_v0, 0.0  ;;  %v1614_v26 = vpop.f32.mrf.mxu1  ;;  %v5081_v28 = vld [vmem:[%s6710_s0 + $0x210] sm:$0xff]  ;;  %v2957_v27 = vunpack.c.l.b16 %v2337_v60  ;;  %v5110_v0 = vld [vmem:[%s6710_s0 + $0x2f8] sm:$0xff] }
 0x228   :  { %v2082_v62 = vmax.f32 %v1614_v26, 0.0  ;;  %4761 = vmatmul.msk.bf16.gmra.mxu1 %vm933_vm0, %v5081_v28 }
 0x229   :  { %6763 = vst [vmem:[#allocation49_spill] sm:$0xff] %v5951_v25  ;;  %4729 = vmatmul.msk.bf16.gmra.mxu0 %vm933_vm0, %v5049_v55  ;;  %v2275_v39 = vpack.c.bf16 %v2019_v15, %v2019_v15 }
 0x22a   :  { %v2338_v31 = vpack.c.bf16 %v2082_v62, %v2082_v62 }
 0x22b   :  { %2884 = vmatpush.bf16.msra.mxu3 %v5657_v54  ;;  %v5967_v37 = vpop.f32.mrf.mxu3 }
 0x22c   :  { %6767 = vst [vmem:[#allocation53_spill] sm:$0xff] %v5967_v37  ;;  %v5052_v37 = vld [vmem:[%s6710_s0 + $0x128] sm:$0xff] }
 0x22d   :  { %v5962_v3 = vpop.f32.mrf.mxu2 }
 0x22e   :  { %v1459_v53 = vpop.f32.mrf.mxu0  ;;  %6766 = vst [vmem:[#allocation52_spill] sm:$0xff] %v5962_v3 }
 0x22f   :  { %2885 = vmatpush.bf16.msra.mxu3 %v5628_v35  ;;  %v2020_v14 = vmax.f32 %v1459_v53, 0.0  ;;  %v2691_v35 = vunpack.c.l.b16 %v2275_v39  ;;  %v5141_v53 = vld [vmem:[%s6710_s0 + $0x3f0] sm:$0xff] }
 0x231   :  { %v2276_v54 = vpack.c.bf16 %v2020_v14, %v2020_v14  ;;  %v1617_v14 = vpop.f32.mrf.mxu1 }
 0x232   :  { %4790 = vmatmul.msk.bf16.gmra.mxu2 %vm933_vm0, %v5110_v0 }
 0x233   :  { %2886 = vmatpush.bf16.msra.mxu3 %v5602_v61  ;;  %v2692_v55 = vunpack.c.l.b16 %v2276_v54  ;;  %v2958_v61 = vunpack.c.l.b16 %v2338_v31  ;;  %v5990_v58 = vpop.f32.mrf.mxu3 }
 0x234   :  { %4821 = vmatmul.msk.bf16.gmra.mxu3 %vm933_vm0, %v5141_v53  ;;  %6770 = vst [vmem:[#allocation56_spill] sm:$0xff] %v5990_v58 }
 0x235   :  { %v5977_v15 = vpack.c.b16 %v2692_v55, %v2691_v35  ;;  %v5987_v26 = vpop.f32.mrf.mxu2  ;;  %v2083_v35 = vmax.f32 %v1617_v14, 0.0  ;;  %v5111_v14 = vld [vmem:[%s6710_s0 + $0x300] sm:$0xff] }
 0x236   :  { %v1462_v39 = vpop.f32.mrf.mxu0  ;;  %6769 = vst [vmem:[#allocation55_spill] sm:$0xff] %v5987_v26 }
 0x237   :  { %2887 = vmatpush.bf16.msra.mxu3 %v5574_v32  ;;  %v5983_v32 = vpack.c.b16 %v2958_v61, %v2957_v27  ;;  %v2021_v62 = vmax.f32 %v1462_v39, 0.0  ;;  %v2339_v0 = vpack.c.bf16 %v2083_v35, %v2083_v35 }
 0x239   :  { %6768 = vst [vmem:[#allocation54_spill] sm:$0xff] %v5983_v32  ;;  %4730 = vmatmul.msk.bf16.gmra.mxu0 %vm933_vm0, %v5050_v2  ;;  %v2277_v60 = vpack.c.bf16 %v2021_v62, %v2021_v62  ;;  %v1619_v31 = vpop.f32.mrf.mxu1  ;;  %v2959_v39 = vunpack.c.l.b16 %v2339_v0 }
 0x23a   :  { %v2084_v55 = vmax.f32 %v1619_v31, 0.0  ;;  %v5142_v31 = vld [vmem:[%s6710_s0 + $0x3f8] sm:$0xff] }
 0x23b   :  { %2888 = vmatpush.bf16.msra.mxu3 %v5544_v8  ;;  %v5082_v8 = vld [vmem:[%s6710_s0 + $0x218] sm:$0xff]  ;;  %v5997_v29 = vpop.f32.mrf.mxu3  ;;  %v2693_v53 = vunpack.c.l.b16 %v2277_v60 }
 0x23c   :  { %v2340_v2 = vpack.c.bf16 %v2084_v55, %v2084_v55  ;;  %6772 = vst [vmem:[#allocation58_spill] sm:$0xff] %v5997_v29  ;;  %4762 = vmatmul.msk.bf16.gmra.mxu1 %vm933_vm0, %v5082_v8 }
 0x23d   :  { %v5992_v61 = vpop.f32.mrf.mxu2 }
 0x23e   :  { %v1464_v54 = vpop.f32.mrf.mxu0  ;;  %6771 = vst [vmem:[#allocation57_spill] sm:$0xff] %v5992_v61  ;;  %v2960_v62 = vunpack.c.l.b16 %v2340_v2 }
 0x23f   :  { %v2022_v28 = vmax.f32 %v1464_v54, 0.0  ;;  %v5051_v54 = vld [vmem:[%s6710_s0 + $0x120] sm:$0xff] }
 0x240   :  { %v6014_v35 = vpack.c.b16 %v2960_v62, %v2959_v39  ;;  %v5083_v39 = vld [vmem:[%s6710_s0 + $0x220] sm:$0xff] }
 0x241   :  { %v2278_v27 = vpack.c.bf16 %v2022_v28, %v2022_v28  ;;  %v1622_v55 = vpop.f32.mrf.mxu1 }
 0x242   :  { %4791 = vmatmul.msk.bf16.gmra.mxu2 %vm933_vm0, %v5111_v14  ;;  %6773 = vst [vmem:[#allocation59_spill] sm:$0xff] %v6014_v35  ;;  %v2085_v2 = vmax.f32 %v1622_v55, 0.0 }
 0x243   :  { %v2694_v1 = vunpack.c.l.b16 %v2278_v27  ;;  %v6020_v0 = vpop.f32.mrf.mxu3 }
 0x244   :  { %4822 = vmatmul.msk.bf16.gmra.mxu3 %vm933_vm0, %v5142_v31  ;;  %6775 = vst [vmem:[#allocation61_spill] sm:$0xff] %v6020_v0  ;;  %v2341_v48 = vpack.c.bf16 %v2085_v2, %v2085_v2 }
 0x245   :  { %v6006_v28 = vpack.c.b16 %v2694_v1, %v2693_v53  ;;  %v6017_v27 = vpop.f32.mrf.mxu2 }
 0x246   :  { %v6011_v60 = vpop.f32.mrf.mxu0  ;;  %6774 = vst [vmem:[#allocation60_spill] sm:$0xff] %v6017_v27 }
 0x249   :  { %4731 = vmatmul.msk.bf16.gmra.mxu0 %vm933_vm0, %v5051_v54  ;;  %v1624_v8 = vpop.f32.mrf.mxu1  ;;  %v2961_v54 = vunpack.c.l.b16 %v2341_v48 }
 0x24a   :  { %v2086_v53 = vmax.f32 %v1624_v8, 0.0 }
 0x24b   :  { %v6029_v14 = vpop.f32.mrf.mxu3 }
 0x24c   :  { %v2342_v62 = vpack.c.bf16 %v2086_v53, %v2086_v53  ;;  %6777 = vst [vmem:[#allocation63_spill] sm:$0xff] %v6029_v14  ;;  %4763 = vmatmul.msk.bf16.gmra.mxu1 %vm933_vm0, %v5083_v39 }
 0x24d   :  { %v6024_v47 = vpop.f32.mrf.mxu2 }
 0x24e   :  { %v6022_v1 = vpop.f32.mrf.mxu0  ;;  %6776 = vst [vmem:[#allocation62_spill] sm:$0xff] %v6024_v47  ;;  %v2962_v31 = vunpack.c.l.b16 %v2342_v62  ;;  %v5084_v62 = vld [vmem:[%s6710_s0 + $0x228] sm:$0xff] }
 0x250   :  { %v6035_v8 = vpack.c.b16 %v2962_v31, %v2961_v54 }
 0x251   :  { %v6037_v11 = vpop.f32.mrf.mxu1 }
 0x252   :  { %6778 = vst [vmem:[#allocation64_spill] sm:$0xff] %v6035_v8 }
 0x253   :  { %6779 = vst [vmem:[#allocation65_spill] sm:$0xff] %v6037_v11  ;;  %v6042_v53 = vpop.f32.mrf.mxu3 }
 0x255   :  { %v6040_v2 = vpop.f32.mrf.mxu2 }
 0x256   :  { %v1472_v55 = vpop.f32.mrf.mxu0  ;;  %6780 = vst [vmem:[#allocation66_spill] sm:$0xff] %v6040_v2 }
 0x259   :  { %4732 = vmatmul.msk.bf16.gmra.mxu0 %vm933_vm0, %v5052_v37  ;;  %v6044_v48 = vpop.f32.mrf.mxu1  ;;  %v5053_v37 = vld [vmem:[%s6710_s0 + $0x130] sm:$0xff] }
 0x25a   :  { %6781 = vst [vmem:[#allocation67_spill] sm:$0xff] %v6044_v48  ;;  %v4825_v48 = vld [vmem:[%s6711_s2] sm:$0xf] }
 0x25b   :  { %v6051_v58 = vpop.f32.mrf.mxu3 }
 0x25c   :  { %4764 = vmatmul.msk.bf16.gmra.mxu1 %vm933_vm0, %v5084_v62  ;;  %v5085_v62 = vld [vmem:[%s6710_s0 + $0x230] sm:$0xff] }
 0x25d   :  { %v6046_v39 = vpop.f32.mrf.mxu2 }
 0x25e   :  { %v1474_v29 = vpop.f32.mrf.mxu0  ;;  %6782 = vst [vmem:[#allocation68_spill] sm:$0xff] %v6046_v39 }
 0x25f   :  { %v2026_v5 = vmax.f32 %v1474_v29, 0.0  ;;  %v2024_v29 = vmax.f32 %v6022_v1, 0.0 }
 0x261   :  { %v6057_v31 = vpop.f32.mrf.mxu1 }
 0x262   :  { %6783 = vst [vmem:[#allocation69_spill] sm:$0xff] %v6057_v31  ;;  %v5055_v31 = vld [vmem:[%s6710_s0 + $0x140] sm:$0xff] }
 0x263   :  { %v6062_v0 = vpop.f32.mrf.mxu3 }
 0x265   :  { %v6060_v14 = vpop.f32.mrf.mxu2 }
 0x266   :  { %v1477_v54 = vpop.f32.mrf.mxu0  ;;  %6784 = vst [vmem:[#allocation70_spill] sm:$0xff] %v6060_v14 }
 0x267   :  { %v2027_v4 = vmax.f32 %v1477_v54, 0.0 }
 0x269   :  { %4733 = vmatmul.msk.bf16.gmra.mxu0 %vm933_vm0, %v5053_v37  ;;  %v6064_v27 = vpop.f32.mrf.mxu1  ;;  %v5054_v37 = vld [vmem:[%s6710_s0 + $0x138] sm:$0xff] }
 0x26a   :  { %6785 = vst [vmem:[#allocation71_spill] sm:$0xff] %v6064_v27 }
 0x26b   :  { %v6071_v2 = vpop.f32.mrf.mxu3 }
 0x26c   :  { %4765 = vmatmul.msk.bf16.gmra.mxu1 %vm933_vm0, %v5085_v62 }
 0x26d   :  { %v6066_v39 = vpop.f32.mrf.mxu2 }
 0x26e   :  { %v1479_v47 = vpop.f32.mrf.mxu0  ;;  %6786 = vst [vmem:[#allocation72_spill] sm:$0xff] %v6066_v39 }
 0x26f   :  { %v2028_v35 = vmax.f32 %v1479_v47, 0.0  ;;  %v2283_v47 = vpack.c.bf16 %v2027_v4, %v2027_v4 }
 0x271   :  { %v6077_v25 = vpop.f32.mrf.mxu1  ;;  %v2284_v61 = vpack.c.bf16 %v2028_v35, %v2028_v35  ;;  %v2282_v35 = vpack.c.bf16 %v2026_v5, %v2026_v5 }
 0x272   :  { %6787 = vst [vmem:[#allocation73_spill] sm:$0xff] %v6077_v25 }
 0x273   :  { %v6082_v39 = vpop.f32.mrf.mxu3 }
 0x275   :  { %v6080_v32 = vpop.f32.mrf.mxu2 }
 0x276   :  { %v1482_v14 = vpop.f32.mrf.mxu0  ;;  %6788 = vst [vmem:[#allocation74_spill] sm:$0xff] %v6080_v32 }
 0x277   :  { %v2029_v21 = vmax.f32 %v1482_v14, 0.0  ;;  %v2025_v14 = vmax.f32 %v1472_v55, 0.0  ;;  %v2023_v55 = vmax.f32 %v6011_v60, 0.0 }
 0x279   :  { %4734 = vmatmul.msk.bf16.gmra.mxu0 %vm933_vm0, %v5054_v37  ;;  %v2285_v3 = vpack.c.bf16 %v2029_v21, %v2029_v21  ;;  %v6084_v62 = vpop.f32.mrf.mxu1  ;;  %v5146_v37 = vld [vmem:[%s6711_s2 + $0x4] sm:$0xf0]  ;;  %v2281_v4 = vpack.c.bf16 %v2025_v14, %v2025_v14  ;;  %v2279_v5 = vpack.c.bf16 %v2023_v55, %v2023_v55 }
 0x27a   :  { %6789 = vst [vmem:[#allocation75_spill] sm:$0xff] %v6084_v62  ;;  %v4826_v32 = vor.u32 %v5146_v37, %v4825_v48  ;;  %v2698_v48 = vunpack.c.l.b16 %v2282_v35 }
 0x27b   :  { %v2701_v11 = vunpack.c.l.b16 %v2285_v3  ;;  %v2699_v3 = vunpack.c.l.b16 %v2283_v47  ;;  %v2695_v14 = vunpack.c.l.b16 %v2279_v5 }
 0x27c   :  { %2609 = vmatmul.bf16.vlgmr.msrb.gmra.mxu1 %v4826_v32  ;;  %v2280_v32 = vpack.c.bf16 %v2024_v29, %v2024_v29 }
 0x27d   :  { %v6092_v21 = vpop.f32.mrf.mxu2 }
 0x27e   :  { %v1484_v22 = vpop.f32.mrf.mxu0  ;;  %6790 = vst [vmem:[#allocation76_spill] sm:$0xff] %v6092_v21  ;;  %v2696_v1 = vunpack.c.l.b16 %v2280_v32 }
 0x27f   :  { %v2030_v8 = vmax.f32 %v1484_v22, 0.0  ;;  %v6094_v22 = vpop.f32.mrf.mxu3 }
 0x281   :  { %v2286_v26 = vpack.c.bf16 %v2030_v8, %v2030_v8  ;;  %v2700_v8 = vunpack.c.l.b16 %v2284_v61  ;;  %v2697_v61 = vunpack.c.l.b16 %v2281_v4  ;;  %v5056_v4 = vld [vmem:[%s6710_s0 + $0x148] sm:$0xff] }
 0x283   :  { %v2702_v54 = vunpack.c.l.b16 %v2286_v26  ;;  %v6101_v26 = vpop.f32.mrf.mxu1  ;;  %v2717_v37 = vpack.c.b16 %v2700_v8, %v2699_v3  ;;  %v2715_v8 = vpack.c.b16 %v2696_v1, %v2695_v14  ;;  %v4835_v1 = vld [vmem:[%s6711_s2 + $0x18] sm:$0xf0] }
 0x285   :  { %v2718_v27 = vpack.c.b16 %v2702_v54, %v2701_v11  ;;  %v2716_v54 = vpack.c.b16 %v2698_v48, %v2697_v61  ;;  %v6104_v21 = vpop.f32.mrf.mxu2 }
 0x286   :  { %v1487_v62 = vpop.f32.mrf.mxu0  ;;  %6791 = vst [vmem:[#allocation77_spill] sm:$0xff] %v6104_v21 }
 0x287   :  { %2749 = vmatpush.bf16.msra.mxu1 %v2718_v27  ;;  %v2031_v11 = vmax.f32 %v1487_v62, 0.0  ;;  %v6106_v60 = vpop.f32.mrf.mxu3 }
 0x289   :  { %4735 = vmatmul.msk.bf16.gmra.mxu0 %vm933_vm0, %v5055_v31  ;;  %v2287_v27 = vpack.c.bf16 %v2031_v11, %v2031_v11 }
 0x28b   :  { %2750 = vmatpush.bf16.msra.mxu1 %v2717_v37  ;;  %v6108_v29 = vpop.f32.mrf.mxu1  ;;  %v2805_v31 = vunpack.c.l.b16 %v2287_v27 }
 0x28e   :  { %v1489_v25 = vpop.f32.mrf.mxu0 }
 0x28f   :  { %v2032_v47 = vmax.f32 %v1489_v25, 0.0  ;;  %2751 = vmatpush.bf16.msra.mxu1 %v2716_v54  ;;  %v6118_v25 = vpop.f32.mrf.mxu2  ;;  %v6120_v48 = vpop.f32.mrf.mxu3 }
 0x290   :  { %6792 = vst [vmem:[#allocation78_spill] sm:$0xff] %v6118_v25 }
 0x291   :  { %v2288_v35 = vpack.c.bf16 %v2032_v47, %v2032_v47 }
 0x293   :  { %v2806_v55 = vunpack.c.l.b16 %v2288_v35  ;;  %2752 = vmatpush.bf16.msra.mxu1 %v2715_v8  ;;  %v6116_v32 = vpop.f32.mrf.mxu1 }
 0x295   :  { %v6110_v62 = vpack.c.b16 %v2806_v55, %v2805_v31 }
 0x296   :  { %v1492_v3 = vpop.f32.mrf.mxu0 }
 0x297   :  { %2753 = vmatpush.bf16.msra.mxu1 %v6006_v28  ;;  %v2033_v37 = vmax.f32 %v1492_v3, 0.0  ;;  %v5147_v28 = vld [vmem:[%s6711_s2 + $0x14] sm:$0xf]  ;;  %v6133_v27 = vpop.f32.mrf.mxu2 }
 0x298   :  { %6793 = vst [vmem:[#allocation79_spill] sm:$0xff] %v6133_v27  ;;  %v4838_v47 = vor.u32 %v5147_v28, %v4835_v1  ;;  %v2125_v28 = vmax.f32 %v5750_v34, 0.0  ;;  %v2126_v1 = vmax.f32 %v5754_v49, 0.0  ;;  %v2121_v49 = vmax.f32 %v5691_v38, 0.0 }
 0x299   :  { %4736 = vmatmul.msk.bf16.gmra.mxu0 %vm933_vm0, %v5056_v4  ;;  %v2289_v61 = vpack.c.bf16 %v2033_v37, %v2033_v37  ;;  %v2120_v38 = vmax.f32 %v5666_v51, 0.0  ;;  %v2118_v51 = vmax.f32 %v5637_v17, 0.0  ;;  %v2116_v17 = vmax.f32 %v5610_v16, 0.0 }
 0x29b   :  { %2754 = vmatpush.bf16.msra.mxu1 %v5977_v15  ;;  %v6131_v54 = vpop.f32.mrf.mxu1  ;;  %v6135_v15 = vpop.f32.mrf.mxu3  ;;  %v2807_v35 = vunpack.c.l.b16 %v2289_v61  ;;  %v2372_v16 = vpack.c.bf16 %v2116_v17, %v2116_v17  ;;  %v2172_v17 = vmax.f32 %v5527_v59, 0.0 }
 0x29e   :  { %v1494_v5 = vpop.f32.mrf.mxu0 }
 0x29f   :  { %v2034_v11 = vmax.f32 %v1494_v5, 0.0  ;;  %2755 = vmatpush.bf16.msra.mxu1 %v5945_v43  ;;  %v6144_v3 = vpop.f32.mrf.mxu2 }
 0x2a0   :  { %6794 = vst [vmem:[#allocation80_spill] sm:$0xff] %v6144_v3 }
 0x2a1   :  { %v2290_v14 = vpack.c.bf16 %v2034_v11, %v2034_v11 }
 0x2a3   :  { %v2808_v8 = vunpack.c.l.b16 %v2290_v14  ;;  %2756 = vmatpush.bf16.msra.mxu1 %v5912_v19  ;;  %v6141_v55 = vpop.f32.mrf.mxu1  ;;  %v6147_v37 = vpop.f32.mrf.mxu3 }
 0x2a5   :  { %v6139_v43 = vpack.c.b16 %v2808_v8, %v2807_v35  ;;  %v2123_v35 = vmax.f32 %v5722_v30, 0.0  ;;  %v2124_v8 = vmax.f32 %v5726_v6, 0.0  ;;  %v4849_v30 = vld [vmem:[%s6711_s2 + $0x30] sm:$0xf]  ;;  %v5152_v6 = vld [vmem:[%s6711_s2 + $0x34] sm:$0xf0] }
 0x2a6   :  { %v1497_v31 = vpop.f32.mrf.mxu0  ;;  %2757 = vmatmul.bf16.vlgmr.msra.gmra.mxu1 %v4838_v47 }
 0x2a7   :  { %3003 = vmatpush.bf16.msrb.mxu1 %v5917_v50  ;;  %v2035_v4 = vmax.f32 %v1497_v31, 0.0 }
 0x2a9   :  { %v2291_v61 = vpack.c.bf16 %v2035_v4, %v2035_v4 }
 0x2ab   :  { %3004 = vmatpush.bf16.msrb.mxu1 %v5889_v52  ;;  %v6149_v11 = vpop.f32.mrf.mxu1  ;;  %v2809_v52 = vunpack.c.l.b16 %v2291_v61  ;;  %v6161_v4 = vpop.f32.mrf.mxu3  ;;  %v2379_v61 = vpack.c.bf16 %v2123_v35, %v2123_v35 }
 0x2ae   :  { %v1499_v5 = vpop.f32.mrf.mxu0 }
 0x2af   :  { %3005 = vmatpush.bf16.msrb.mxu1 %v5860_v42  ;;  %v2036_v19 = vmax.f32 %v1499_v5, 0.0  ;;  %v6157_v42 = vpop.f32.mrf.mxu2  ;;  %v2382_v5 = vpack.c.bf16 %v2126_v1, %v2126_v1  ;;  %v3101_v1 = vunpack.c.l.b16 %v2379_v61  ;;  %v2376_v61 = vpack.c.bf16 %v2120_v38, %v2120_v38 }
 0x2b0   :  { %6795 = vst [vmem:[#allocation81_spill] sm:$0xff] %v6157_v42 }
 0x2b1   :  { %v2292_v50 = vpack.c.bf16 %v2036_v19, %v2036_v19  ;;  %v2380_v19 = vpack.c.bf16 %v2124_v8, %v2124_v8 }
 0x2b3   :  { %3006 = vmatpush.bf16.msrb.mxu1 %v5834_v46  ;;  %v2810_v14 = vunpack.c.l.b16 %v2292_v50  ;;  %v2381_v46 = vpack.c.bf16 %v2125_v28, %v2125_v28  ;;  %v1657_v34 = vpop.f32.mrf.mxu1  ;;  %v3102_v35 = vunpack.c.l.b16 %v2380_v19  ;;  %v6178_v42 = vpop.f32.mrf.mxu3 }
 0x2b4   :  { %v2099_v3 = vmax.f32 %v1657_v34, 0.0 }
 0x2b5   :  { %v6155_v47 = vpack.c.b16 %v2810_v14, %v2809_v52  ;;  %v3103_v50 = vunpack.c.l.b16 %v2381_v46  ;;  %v3104_v52 = vunpack.c.l.b16 %v2382_v5  ;;  %v4850_v5 = vor.u32 %v5152_v6, %v4849_v30 }
 0x2b6   :  { %v1502_v31 = vpop.f32.mrf.mxu0 }
 0x2b7   :  { %3007 = vmatpush.bf16.msrb.mxu1 %v5806_v40  ;;  %v2122_v40 = vmax.f32 %v5697_v56, 0.0  ;;  %v2037_v14 = vmax.f32 %v1502_v31, 0.0  ;;  %v2377_v56 = vpack.c.bf16 %v2121_v49, %v2121_v49  ;;  %v3120_v31 = vpack.c.b16 %v3104_v52, %v3103_v50  ;;  %v6175_v21 = vpop.f32.mrf.mxu2 }
 0x2b8   :  { %v2355_v50 = vpack.c.bf16 %v2099_v3, %v2099_v3 }
 0x2b9   :  { %v2378_v28 = vpack.c.bf16 %v2122_v40, %v2122_v40  ;;  %v2293_v46 = vpack.c.bf16 %v2037_v14, %v2037_v14  ;;  %v3099_v19 = vunpack.c.l.b16 %v2377_v56  ;;  %v3098_v56 = vunpack.c.l.b16 %v2376_v61 }
 0x2bb   :  { %3008 = vmatpush.bf16.msrb.mxu1 %v5776_v57  ;;  %v2119_v57 = vmax.f32 %v5662_v18, 0.0  ;;  %v1659_v25 = vpop.f32.mrf.mxu1  ;;  %v2117_v18 = vmax.f32 %v5632_v41, 0.0  ;;  %v3100_v14 = vunpack.c.l.b16 %v2378_v28  ;;  %v2811_v30 = vunpack.c.l.b16 %v2293_v46 }
 0x2bc   :  { %v2100_v27 = vmax.f32 %v1659_v25, 0.0  ;;  %v2115_v41 = vmax.f32 %v5606_v63, 0.0  ;;  %v2114_v46 = vmax.f32 %v5584_v45, 0.0  ;;  %v6194_v63 = vpop.f32.mrf.mxu3  ;;  %v2173_v45 = vmax.f32 %v5550_v13, 0.0 }
 0x2bd   :  { %v2375_v49 = vpack.c.bf16 %v2119_v57, %v2119_v57  ;;  %v2373_v57 = vpack.c.bf16 %v2117_v18, %v2117_v18  ;;  %v3118_v28 = vpack.c.b16 %v3100_v14, %v3099_v19  ;;  %v2169_v13 = vmax.f32 %v5496_v23, 0.0  ;;  %v4859_v23 = vld [vmem:[%s6711_s2 + $0x48] sm:$0xf0] }
 0x2be   :  { %v1504_v8 = vpop.f32.mrf.mxu0  ;;  %v2356_v52 = vpack.c.bf16 %v2100_v27, %v2100_v27  ;;  %v2374_v27 = vpack.c.bf16 %v2118_v51, %v2118_v51  ;;  %v2111_v51 = vmax.f32 %v5548_v12, 0.0 }
 0x2bf   :  { %3009 = vmatpush.bf16.msrb.mxu1 %v5746_v9  ;;  %v2038_v9 = vmax.f32 %v1504_v8, 0.0  ;;  %v3119_v8 = vpack.c.b16 %v3102_v35, %v3101_v1  ;;  %v3097_v3 = vunpack.c.l.b16 %v2375_v49  ;;  %v6190_v1 = vpop.f32.mrf.mxu2  ;;  %v2113_v35 = vmax.f32 %v5578_v36, 0.0 }
 0x2c0   :  { %v3078_v25 = vunpack.c.l.b16 %v2356_v52  ;;  %v3096_v18 = vunpack.c.l.b16 %v2374_v27  ;;  %v2112_v49 = vmax.f32 %v5554_v20, 0.0  ;;  %v3094_v36 = vunpack.c.l.b16 %v2372_v16 }
 0x2c1   :  { %v2294_v40 = vpack.c.bf16 %v2038_v9, %v2038_v9  ;;  %v2371_v9 = vpack.c.bf16 %v2115_v41, %v2115_v41  ;;  %v2369_v61 = vpack.c.bf16 %v2113_v35, %v2113_v35  ;;  %v2171_v20 = vmax.f32 %v5520_v44, 0.0 }
 0x2c2   :  { %v2428_v16 = vpack.c.bf16 %v2172_v17, %v2172_v17 }
 0x2c3   :  { %3010 = vmatpush.bf16.msrb.mxu1 %v5718_v7  ;;  %v2812_v6 = vunpack.c.l.b16 %v2294_v40  ;;  %v3077_v7 = vunpack.c.l.b16 %v2355_v50  ;;  %v3117_v40 = vpack.c.b16 %v3098_v56, %v3097_v3  ;;  %v2370_v50 = vpack.c.bf16 %v2114_v46, %v2114_v46  ;;  %v6212_v59 = vpop.f32.mrf.mxu1 }
 0x2c4   :  { %v3093_v52 = vunpack.c.l.b16 %v2371_v9  ;;  %v6206_v3 = vpop.f32.mrf.mxu3  ;;  %v2170_v56 = vmax.f32 %v5501_v33, 0.0  ;;  %v2427_v9 = vpack.c.bf16 %v2171_v20, %v2171_v20  ;;  %v2167_v33 = vmax.f32 %v5471_v10, 0.0 }
 0x2c5   :  { %v6182_v34 = vpack.c.b16 %v2812_v6, %v2811_v30  ;;  %v6188_v38 = vpack.c.b16 %v3078_v25, %v3077_v7  ;;  %v2174_v30 = vmax.f32 %v5559_v24, 0.0  ;;  %v2367_v6 = vpack.c.bf16 %v2111_v51, %v2111_v51 }
 0x2c6   :  { %3011 = vmatmul.bf16.vlgmr.msrb.gmra.mxu1 %v4850_v5  ;;  %v3095_v5 = vunpack.c.l.b16 %v2373_v57  ;;  %v3091_v7 = vunpack.c.l.b16 %v2369_v61  ;;  %v3092_v25 = vunpack.c.l.b16 %v2370_v50  ;;  %v3115_v41 = vpack.c.b16 %v3094_v36, %v3093_v52 }
 0x2c7   :  { %3151 = vmatpush.bf16.msra.mxu1 %v3120_v31  ;;  %v6186_v31 = vpop.f32.mrf.mxu0  ;;  %v6202_v12 = vpop.f32.mrf.mxu2  ;;  %v2429_v57 = vpack.c.bf16 %v2173_v45, %v2173_v45  ;;  %v2430_v27 = vpack.c.bf16 %v2174_v30, %v2174_v30  ;;  %v2426_v61 = vpack.c.bf16 %v2170_v56, %v2170_v56  ;;  %v3353_v52 = vunpack.c.l.b16 %v2427_v9  ;;  %v6799_v56 = vld [vmem:[#allocation4_spill] sm:$0xff] }
 0x2c8   :  { %v3116_v14 = vpack.c.b16 %v3096_v18, %v3095_v5  ;;  %v3114_v46 = vpack.c.b16 %v3092_v25, %v3091_v7  ;;  %v5153_v18 = vld [vmem:[%s6711_s2 + $0x44] sm:$0xf]  ;;  %v3354_v36 = vunpack.c.l.b16 %v2428_v16  ;;  %v2423_v10 = vpack.c.bf16 %v2167_v33, %v2167_v33 }
 0x2c9   :  { %v3355_v5 = vunpack.c.l.b16 %v2429_v57  ;;  %v3356_v44 = vunpack.c.l.b16 %v2430_v27  ;;  %v4862_v45 = vor.u32 %v5153_v18, %v4859_v23  ;;  %v6797_v7 = vld [vmem:[#allocation6_spill] sm:$0xff]  ;;  %v3352_v27 = vunpack.c.l.b16 %v2426_v61 }
 0x2ca   :  { %v2165_v25 = vmax.f32 %v6797_v7, 0.0  ;;  %v5145_v33 = vld [vmem:[%s6711_s2 + $0x4] sm:$0xf] }
 0x2cb   :  { %3152 = vmatpush.bf16.msra.mxu1 %v3119_v8  ;;  %v2368_v8 = vpack.c.bf16 %v2112_v49, %v2112_v49  ;;  %v2425_v49 = vpack.c.bf16 %v2169_v13, %v2169_v13  ;;  %v3379_v13 = vpack.c.b16 %v3354_v36, %v3353_v52  ;;  %v6228_v16 = vpop.f32.mrf.mxu1  ;;  %v6801_v61 = vld [vmem:[#allocation2_spill] sm:$0xff]  ;;  %v6802_v52 = vld [vmem:[#allocation3_spill] sm:$0xff] }
 0x2cc   :  { %v2421_v9 = vpack.c.bf16 %v2165_v25, %v2165_v25  ;;  %v2162_v36 = vmax.f32 %v6802_v52, 0.0  ;;  %v2217_v52 = vmax.f32 %v6161_v4, 0.0 }
 0x2cd   :  { %v3090_v35 = vunpack.c.l.b16 %v2368_v8  ;;  %v1962_v8 = vpop.f32.mrf.mxu3  ;;  %v3351_v57 = vunpack.c.l.b16 %v2425_v49 }
 0x2ce   :  { %v3347_v25 = vunpack.c.l.b16 %v2421_v9  ;;  %v2219_v9 = vmax.f32 %v6194_v63, 0.0  ;;  %v2215_v63 = vmax.f32 %v6135_v15, 0.0 }
 0x2cf   :  { %3153 = vmatpush.bf16.msra.mxu1 %v3118_v28  ;;  %v6198_v19 = vpop.f32.mrf.mxu0  ;;  %v3089_v28 = vunpack.c.l.b16 %v2367_v6  ;;  %v1807_v30 = vpop.f32.mrf.mxu2  ;;  %v3378_v23 = vpack.c.b16 %v3352_v27, %v3351_v57 }
 0x2d1   :  { %v3113_v50 = vpack.c.b16 %v3090_v35, %v3089_v28  ;;  %v2163_v28 = vmax.f32 %v6799_v56, 0.0  ;;  %v6800_v35 = vld [vmem:[#allocation5_spill] sm:$0xff] }
 0x2d3   :  { %3154 = vmatpush.bf16.msra.mxu1 %v3117_v40  ;;  %v6796_v40 = vld [vmem:[#allocation8_spill] sm:$0xff] }
 0x2d4   :  { %v2168_v51 = vmax.f32 %v6796_v40, 0.0  ;;  %v4827_v40 = vld [vmem:[%s6711_s2 + $0x8] sm:$0xf0] }
 0x2d6   :  { %v2424_v17 = vpack.c.bf16 %v2168_v51, %v2168_v51  ;;  %v4830_v51 = vor.u32 %v5145_v33, %v4827_v40 }
 0x2d7   :  { %3155 = vmatpush.bf16.msra.mxu1 %v3116_v14  ;;  %v6209_v24 = vpop.f32.mrf.mxu0  ;;  %v3380_v14 = vpack.c.b16 %v3356_v44, %v3355_v5  ;;  %v3349_v44 = vunpack.c.l.b16 %v2423_v10  ;;  %v1964_v10 = vpop.f32.mrf.mxu3 }
 0x2d8   :  { %v3350_v18 = vunpack.c.l.b16 %v2424_v17  ;;  %2623 = vmatmul.bf16.vlgmr.msrb.gmra.mxu2 %v4830_v51  ;;  %v2159_v17 = vmax.f32 %v1807_v30, 0.0  ;;  %v2222_v56 = vmax.f32 %v1964_v10, 0.0 }
 0x2da   :  { %v2415_v51 = vpack.c.bf16 %v2159_v17, %v2159_v17  ;;  %v2478_v30 = vpack.c.bf16 %v2222_v56, %v2222_v56 }
 0x2db   :  { %3156 = vmatpush.bf16.msra.mxu1 %v3115_v41  ;;  %v6798_v41 = vld [vmem:[#allocation7_spill] sm:$0xff] }
 0x2dc   :  { %v2166_v20 = vmax.f32 %v6798_v41, 0.0 }
 0x2de   :  { %v2422_v5 = vpack.c.bf16 %v2166_v20, %v2166_v20  ;;  %v3377_v20 = vpack.c.b16 %v3350_v18, %v3349_v44 }
 0x2df   :  { %3157 = vmatpush.bf16.msra.mxu1 %v3114_v46  ;;  %v6222_v6 = vpop.f32.mrf.mxu0  ;;  %v2164_v46 = vmax.f32 %v6800_v35, 0.0  ;;  %v2418_v35 = vpack.c.bf16 %v2162_v36, %v2162_v36  ;;  %v2218_v36 = vmax.f32 %v6178_v42, 0.0 }
 0x2e0   :  { %v3348_v41 = vunpack.c.l.b16 %v2422_v5  ;;  %v2220_v5 = vmax.f32 %v6206_v3, 0.0  ;;  %v2216_v3 = vmax.f32 %v6147_v37, 0.0 }
 0x2e1   :  { %v2420_v7 = vpack.c.bf16 %v2164_v46, %v2164_v46 }
 0x2e2   :  { %v3376_v40 = vpack.c.b16 %v3348_v41, %v3347_v25  ;;  %v2476_v25 = vpack.c.bf16 %v2220_v5, %v2220_v5  ;;  %v5148_v5 = vld [vmem:[%s6711_s2 + $0x14] sm:$0xf0] }
 0x2e3   :  { %3158 = vmatpush.bf16.msra.mxu1 %v3113_v50  ;;  %v2161_v50 = vmax.f32 %v6801_v61, 0.0  ;;  %v3346_v33 = vunpack.c.l.b16 %v2420_v7  ;;  %v6240_v61 = vpop.f32.mrf.mxu1  ;;  %v2475_v7 = vpack.c.bf16 %v2219_v9, %v2219_v9  ;;  %v4833_v9 = vld [vmem:[%s6711_s2 + $0x10] sm:$0xf] }
 0x2e4   :  { %v3504_v42 = vunpack.c.l.b16 %v2476_v25  ;;  %v2211_v25 = vmax.f32 %v6082_v39, 0.0  ;;  %v2040_v39 = vmax.f32 %v6198_v19, 0.0  ;;  %v2207_v19 = vmax.f32 %v6042_v53, 0.0 }
 0x2e5   :  { %v2417_v27 = vpack.c.bf16 %v2161_v50, %v2161_v50  ;;  %v3344_v50 = vunpack.c.l.b16 %v2418_v35  ;;  %v3503_v4 = vunpack.c.l.b16 %v2475_v7 }
 0x2e6   :  { %3159 = vmatmul.bf16.vlgmr.msra.gmra.mxu1 %v4862_v45  ;;  %v1809_v45 = vpop.f32.mrf.mxu2 }
 0x2e7   :  { %3405 = vmatpush.bf16.msrb.mxu1 %v3380_v14  ;;  %v6236_v49 = vpop.f32.mrf.mxu0  ;;  %v2419_v14 = vpack.c.bf16 %v2163_v28, %v2163_v28  ;;  %v2160_v57 = vmax.f32 %v1809_v45, 0.0  ;;  %v3343_v18 = vunpack.c.l.b16 %v2417_v27  ;;  %v2474_v27 = vpack.c.bf16 %v2218_v36, %v2218_v36 }
 0x2e9   :  { %v2416_v46 = vpack.c.bf16 %v2160_v57, %v2160_v57  ;;  %v3374_v10 = vpack.c.b16 %v3344_v50, %v3343_v18  ;;  %v2473_v57 = vpack.c.bf16 %v2217_v52, %v2217_v52  ;;  %v3502_v15 = vunpack.c.l.b16 %v2474_v27 }
 0x2eb   :  { %3406 = vmatpush.bf16.msrb.mxu1 %v3379_v13  ;;  %v2221_v13 = vmax.f32 %v1962_v8, 0.0  ;;  %v3342_v45 = vunpack.c.l.b16 %v2416_v46  ;;  %v6248_v56 = vpop.f32.mrf.mxu1  ;;  %v3501_v46 = vunpack.c.l.b16 %v2473_v57 }
 0x2ed   :  { %v2477_v44 = vpack.c.bf16 %v2221_v13, %v2221_v13 }
 0x2ef   :  { %3407 = vmatpush.bf16.msrb.mxu1 %v3378_v23  ;;  %v3345_v23 = vunpack.c.l.b16 %v2419_v14  ;;  %v1519_v28 = vpop.f32.mrf.mxu0  ;;  %v3341_v14 = vunpack.c.l.b16 %v2415_v51  ;;  %v3505_v41 = vunpack.c.l.b16 %v2477_v44  ;;  %v2214_v51 = vmax.f32 %v6120_v48, 0.0 }
 0x2f0   :  { %v3521_v44 = vpack.c.b16 %v3504_v42, %v3503_v4  ;;  %v2044_v18 = vmax.f32 %v1519_v28, 0.0  ;;  %v2043_v48 = vmax.f32 %v6236_v49, 0.0  ;;  %v2042_v28 = vmax.f32 %v6222_v6, 0.0 }
 0x2f1   :  { %v3375_v8 = vpack.c.b16 %v3346_v33, %v3345_v23  ;;  %v3373_v13 = vpack.c.b16 %v3342_v45, %v3341_v14  ;;  %v2471_v23 = vpack.c.bf16 %v2215_v63, %v2215_v63  ;;  %v2472_v33 = vpack.c.bf16 %v2216_v3, %v2216_v3 }
 0x2f2   :  { %v2470_v36 = vpack.c.bf16 %v2214_v51, %v2214_v51  ;;  %v3520_v14 = vpack.c.b16 %v3502_v15, %v3501_v46  ;;  %v2299_v49 = vpack.c.bf16 %v2043_v48, %v2043_v48  ;;  %v2467_v42 = vpack.c.bf16 %v2211_v25, %v2211_v25 }
 0x2f3   :  { %3408 = vmatpush.bf16.msrb.mxu1 %v3377_v20  ;;  %v3506_v20 = vunpack.c.l.b16 %v2478_v30  ;;  %v4834_v30 = vor.u32 %v5148_v5, %v4833_v9  ;;  %v3499_v50 = vunpack.c.l.b16 %v2471_v23  ;;  %v6263_v3 = vpop.f32.mrf.mxu1 }
 0x2f4   :  { %v3498_v57 = vunpack.c.l.b16 %v2470_v36  ;;  %v2817_v15 = vunpack.c.l.b16 %v2299_v49 }
 0x2f5   :  { %v3522_v35 = vpack.c.b16 %v3506_v20, %v3505_v41  ;;  %2743 = vmatmul.bf16.vlgmr.msrb.gmra.mxu3 %v4834_v30  ;;  %v2212_v41 = vmax.f32 %v6094_v22, 0.0  ;;  %v2041_v20 = vmax.f32 %v6209_v24, 0.0  ;;  %v2209_v22 = vmax.f32 %v6062_v0, 0.0 }
 0x2f6   :  { %v2298_v24 = vpack.c.bf16 %v2042_v28, %v2042_v28  ;;  %v2208_v0 = vmax.f32 %v6051_v58, 0.0 }
 0x2f7   :  { %3409 = vmatpush.bf16.msrb.mxu1 %v3376_v40  ;;  %v1522_v17 = vpop.f32.mrf.mxu0  ;;  %v2213_v40 = vmax.f32 %v6106_v60, 0.0  ;;  %v3500_v60 = vunpack.c.l.b16 %v2472_v33  ;;  %v2210_v33 = vmax.f32 %v6071_v2, 0.0  ;;  %v2297_v51 = vpack.c.bf16 %v2041_v20, %v2041_v20 }
 0x2f8   :  { %v2045_v37 = vmax.f32 %v1522_v17, 0.0  ;;  %v2816_v30 = vunpack.c.l.b16 %v2298_v24  ;;  %v2464_v36 = vpack.c.bf16 %v2208_v0, %v2208_v0  ;;  %v6806_v24 = vld [vmem:[#allocation10_spill] sm:$0xff] }
 0x2f9   :  { %v2469_v52 = vpack.c.bf16 %v2213_v40, %v2213_v40  ;;  %v3519_v27 = vpack.c.b16 %v3500_v60, %v3499_v50  ;;  %v2039_v40 = vmax.f32 %v6186_v31, 0.0  ;;  %v2465_v50 = vpack.c.bf16 %v2209_v22, %v2209_v22 }
 0x2fa   :  { %v2301_v45 = vpack.c.bf16 %v2045_v37, %v2045_v37  ;;  %v3495_v37 = vunpack.c.l.b16 %v2467_v42  ;;  %v2466_v2 = vpack.c.bf16 %v2210_v33, %v2210_v33  ;;  %v2815_v31 = vunpack.c.l.b16 %v2297_v51  ;;  %v6804_v42 = vld [vmem:[#allocation73_spill] sm:$0xff] }
 0x2fb   :  { %3410 = vmatpush.bf16.msrb.mxu1 %v3375_v8  ;;  %v3497_v17 = vunpack.c.l.b16 %v2469_v52  ;;  %v2295_v60 = vpack.c.bf16 %v2039_v40, %v2039_v40  ;;  %v2463_v52 = vpack.c.bf16 %v2207_v19, %v2207_v19  ;;  %v3492_v28 = vunpack.c.l.b16 %v2464_v36 }
 0x2fc   :  { %v3494_v25 = vunpack.c.l.b16 %v2466_v2 }
 0x2fd   :  { %v3518_v5 = vpack.c.b16 %v3498_v57, %v3497_v17  ;;  %v3491_v20 = vunpack.c.l.b16 %v2463_v52  ;;  %v2093_v17 = vmax.f32 %v6101_v26, 0.0  ;;  %v2094_v57 = vmax.f32 %v6108_v29, 0.0  ;;  %v6807_v26 = vld [vmem:[#allocation69_spill] sm:$0xff] }
 0x2fe   :  { %v2089_v29 = vmax.f32 %v6807_v26, 0.0  ;;  %v6809_v52 = vld [vmem:[#allocation65_spill] sm:$0xff] }
 0x2ff   :  { %3411 = vmatpush.bf16.msrb.mxu1 %v3374_v10  ;;  %v1524_v8 = vpop.f32.mrf.mxu0  ;;  %v2300_v10 = vpack.c.bf16 %v2044_v18, %v2044_v18  ;;  %v3515_v49 = vpack.c.b16 %v3492_v28, %v3491_v20  ;;  %v2350_v33 = vpack.c.bf16 %v2094_v57, %v2094_v57  ;;  %v2087_v36 = vmax.f32 %v6809_v52, 0.0  ;;  %v6812_v52 = vld [vmem:[#allocation57_spill] sm:$0xff] }
 0x300   :  { %v2046_v7 = vmax.f32 %v1524_v8, 0.0  ;;  %v6273_v8 = vpop.f32.mrf.mxu1 }
 0x301   :  { %v2818_v23 = vunpack.c.l.b16 %v2300_v10  ;;  %v2970_v0 = vunpack.c.l.b16 %v2350_v33 }
 0x302   :  { %v2302_v63 = vpack.c.bf16 %v2046_v7, %v2046_v7  ;;  %v3493_v7 = vunpack.c.l.b16 %v2465_v50 }
 0x303   :  { %3412 = vmatpush.bf16.msrb.mxu1 %v3373_v13  ;;  %v2819_v13 = vunpack.c.l.b16 %v2301_v45  ;;  %v2843_v18 = vpack.c.b16 %v2818_v23, %v2817_v15  ;;  %v2842_v45 = vpack.c.b16 %v2816_v30, %v2815_v31  ;;  %v2110_v23 = vmax.f32 %v6806_v24, 0.0  ;;  %v6808_v15 = vld [vmem:[#allocation71_spill] sm:$0xff] }
 0x304   :  { %v2820_v4 = vunpack.c.l.b16 %v2302_v63  ;;  %v3516_v10 = vpack.c.b16 %v3494_v25, %v3493_v7  ;;  %v2345_v7 = vpack.c.bf16 %v2089_v29, %v2089_v29 }
 0x306   :  { %v2844_v6 = vpack.c.b16 %v2820_v4, %v2819_v13  ;;  %v6803_v13 = vld [vmem:[#allocation9_spill] sm:$0xff] }
 0x307   :  { %3553 = vmatpush.bf16.msra.mxu1 %v3522_v35  ;;  %v2468_v35 = vpack.c.bf16 %v2212_v41, %v2212_v41  ;;  %v6269_v46 = vpop.f32.mrf.mxu0  ;;  %v2813_v41 = vunpack.c.l.b16 %v2295_v60  ;;  %v2109_v4 = vmax.f32 %v6803_v13, 0.0  ;;  %v2343_v13 = vpack.c.bf16 %v2087_v36, %v2087_v36 }
 0x308   :  { %2869 = vmatpush.bf16.msra.mxu2 %v2844_v6  ;;  %v1677_v63 = vpop.f32.mrf.mxu1  ;;  %v2349_v6 = vpack.c.bf16 %v2093_v17, %v2093_v17  ;;  %v2047_v50 = vmax.f32 %v6269_v46, 0.0  ;;  %v2142_v36 = vmax.f32 %v6812_v52, 0.0 }
 0x309   :  { %v3496_v9 = vunpack.c.l.b16 %v2468_v35  ;;  %v2091_v35 = vmax.f32 %v6804_v42, 0.0  ;;  %v2365_v40 = vpack.c.bf16 %v2109_v4, %v2109_v4  ;;  %v2107_v20 = vmax.f32 %v1677_v63, 0.0 }
 0x30a   :  { %v2969_v19 = vunpack.c.l.b16 %v2349_v6  ;;  %v2303_v17 = vpack.c.bf16 %v2047_v50, %v2047_v50  ;;  %v2965_v42 = vunpack.c.l.b16 %v2345_v7  ;;  %v2963_v29 = vunpack.c.l.b16 %v2343_v13 }
 0x30b   :  { %3554 = vmatpush.bf16.msra.mxu1 %v3521_v44  ;;  %v2296_v44 = vpack.c.bf16 %v2040_v39, %v2040_v39  ;;  %v3517_v48 = vpack.c.b16 %v3496_v9, %v3495_v37  ;;  %v6805_v39 = vld [vmem:[#allocation75_spill] sm:$0xff]  ;;  %v2090_v37 = vmax.f32 %v6808_v15, 0.0  ;;  %v2347_v9 = vpack.c.bf16 %v2091_v35, %v2091_v35 }
 0x30c   :  { %2870 = vmatpush.bf16.msra.mxu2 %v2843_v18  ;;  %v2092_v22 = vmax.f32 %v6805_v39, 0.0  ;;  %v3087_v18 = vunpack.c.l.b16 %v2365_v40  ;;  %v2363_v63 = vpack.c.bf16 %v2107_v20, %v2107_v20  ;;  %v2821_v40 = vunpack.c.l.b16 %v2303_v17 }
 0x30d   :  { %v2346_v25 = vpack.c.bf16 %v2090_v37, %v2090_v37  ;;  %v2967_v46 = vunpack.c.l.b16 %v2347_v9  ;;  %v2104_v37 = vmax.f32 %v6248_v56, 0.0  ;;  %v6811_v56 = vld [vmem:[#allocation55_spill] sm:$0xff]  ;;  %v2398_v20 = vpack.c.bf16 %v2142_v36, %v2142_v36  ;;  %v6825_v36 = vld [vmem:[#allocation49_spill] sm:$0xff] }
 0x30f   :  { %3555 = vmatpush.bf16.msra.mxu1 %v3520_v14  ;;  %v2814_v14 = vunpack.c.l.b16 %v2296_v44  ;;  %v1529_v53 = vpop.f32.mrf.mxu0  ;;  %v2366_v44 = vpack.c.bf16 %v2110_v23, %v2110_v23  ;;  %v2966_v35 = vunpack.c.l.b16 %v2346_v25  ;;  %v2106_v23 = vmax.f32 %v6273_v8, 0.0 }
 0x310   :  { %2871 = vmatpush.bf16.msra.mxu2 %v2842_v45  ;;  %v1679_v31 = vpop.f32.mrf.mxu1  ;;  %v2103_v8 = vmax.f32 %v6240_v61, 0.0 }
 0x311   :  { %v2841_v58 = vpack.c.b16 %v2814_v14, %v2813_v41  ;;  %v6810_v14 = vld [vmem:[#allocation67_spill] sm:$0xff]  ;;  %v2108_v28 = vmax.f32 %v1679_v31, 0.0  ;;  %v2984_v15 = vpack.c.b16 %v2966_v35, %v2965_v42 }
 0x312   :  { %v2088_v45 = vmax.f32 %v6810_v14, 0.0  ;;  %v2359_v50 = vpack.c.bf16 %v2103_v8, %v2103_v8 }
 0x313   :  { %3556 = vmatpush.bf16.msra.mxu1 %v3519_v27  ;;  %v2364_v6 = vpack.c.bf16 %v2108_v28, %v2108_v28  ;;  %v2097_v28 = vmax.f32 %v6141_v55, 0.0  ;;  %v3222_v55 = vunpack.c.l.b16 %v2398_v20 }
 0x314   :  { %2872 = vmatpush.bf16.msra.mxu2 %v2841_v58  ;;  %v2344_v4 = vpack.c.bf16 %v2088_v45, %v2088_v45  ;;  %v3081_v7 = vunpack.c.l.b16 %v2359_v50 }
 0x317   :  { %3557 = vmatpush.bf16.msra.mxu1 %v3518_v5  ;;  %v1532_v27 = vpop.f32.mrf.mxu0  ;;  %v2348_v5 = vpack.c.bf16 %v2092_v22, %v2092_v22  ;;  %v2105_v22 = vmax.f32 %v6263_v3, 0.0  ;;  %v2964_v3 = vunpack.c.l.b16 %v2344_v4  ;;  %v6817_v4 = vld [vmem:[#allocation47_spill] sm:$0xff] }
 0x318   :  { %2873 = vmatpush.bf16.msra.mxu2 %v6182_v34  ;;  %v2049_v51 = vmax.f32 %v1532_v27, 0.0  ;;  %v2048_v34 = vmax.f32 %v1529_v53, 0.0  ;;  %v2138_v42 = vmax.f32 %v6817_v4, 0.0  ;;  %v5154_v4 = vld [vmem:[%s6711_s2 + $0x44] sm:$0xf0] }
 0x319   :  { %v2968_v53 = vunpack.c.l.b16 %v2348_v5  ;;  %v2361_v5 = vpack.c.bf16 %v2105_v22, %v2105_v22 }
 0x31a   :  { %v2305_v2 = vpack.c.bf16 %v2049_v51, %v2049_v51  ;;  %v2304_v41 = vpack.c.bf16 %v2048_v34, %v2048_v34  ;;  %v4843_v51 = vld [vmem:[%s6711_s2 + $0x28] sm:$0xf0]  ;;  %v2362_v34 = vpack.c.bf16 %v2106_v23, %v2106_v23  ;;  %v2095_v23 = vmax.f32 %v6116_v32, 0.0  ;;  %v5151_v32 = vld [vmem:[%s6711_s2 + $0x34] sm:$0xf] }
 0x31b   :  { %3558 = vmatpush.bf16.msra.mxu1 %v3517_v48  ;;  %v5150_v48 = vld [vmem:[%s6711_s2 + $0x24] sm:$0xf0]  ;;  %v2985_v33 = vpack.c.b16 %v2968_v53, %v2967_v46  ;;  %v3083_v31 = vunpack.c.l.b16 %v2361_v5  ;;  %v6813_v46 = vld [vmem:[#allocation50_spill] sm:$0xff]  ;;  %v6814_v53 = vld [vmem:[#allocation64_spill] sm:$0xff]  ;;  %v2394_v8 = vpack.c.bf16 %v2138_v42, %v2138_v42 }
 0x31c   :  { %2874 = vmatpush.bf16.msra.mxu2 %v6155_v47  ;;  %v4841_v47 = vld [vmem:[%s6711_s2 + $0x20] sm:$0xf]  ;;  %v2823_v57 = vunpack.c.l.b16 %v2305_v2  ;;  %v2822_v39 = vunpack.c.l.b16 %v2304_v41  ;;  %v2983_v2 = vpack.c.b16 %v2964_v3, %v2963_v29  ;;  %v3084_v61 = vunpack.c.l.b16 %v2362_v34  ;;  %v6815_v41 = vld [vmem:[#allocation52_spill] sm:$0xff]  ;;  %v6820_v29 = vld [vmem:[#allocation43_spill] sm:$0xff] }
 0x31d   :  { %v2136_v3 = vmax.f32 %v6820_v29, 0.0 }
 0x31e   :  { %v2845_v9 = vpack.c.b16 %v2822_v39, %v2821_v40  ;;  %v6818_v39 = vld [vmem:[#allocation59_spill] sm:$0xff]  ;;  %v2157_v40 = vmax.f32 %v6190_v1, 0.0 }
 0x31f   :  { %3559 = vmatpush.bf16.msra.mxu1 %v3516_v10  ;;  %v1534_v30 = vpop.f32.mrf.mxu0  ;;  %v4842_v10 = vor.u32 %v5150_v48, %v4841_v47  ;;  %v2141_v48 = vmax.f32 %v6811_v56, 0.0  ;;  %v2392_v52 = vpack.c.bf16 %v2136_v3, %v2136_v3  ;;  %v6833_v3 = vld [vmem:[#allocation25_spill] sm:$0xff] }
 0x320   :  { %v2050_v60 = vmax.f32 %v1534_v30, 0.0  ;;  %2875 = vmatpush.bf16.msra.mxu2 %v6139_v43  ;;  %v2986_v43 = vpack.c.b16 %v2970_v0, %v2969_v19  ;;  %v3086_v19 = vunpack.c.l.b16 %v2364_v6  ;;  %v2101_v30 = vmax.f32 %v6212_v59, 0.0 }
 0x321   :  { %v3110_v59 = vpack.c.b16 %v3084_v61, %v3083_v31  ;;  %v2353_v6 = vpack.c.bf16 %v2097_v28, %v2097_v28  ;;  %v2413_v50 = vpack.c.bf16 %v2157_v40, %v2157_v40  ;;  %v6823_v31 = vld [vmem:[#allocation37_spill] sm:$0xff] }
 0x322   :  { %v2306_v58 = vpack.c.bf16 %v2050_v60, %v2050_v60  ;;  %v2360_v60 = vpack.c.bf16 %v2104_v37, %v2104_v37  ;;  %v2357_v14 = vpack.c.bf16 %v2101_v30, %v2101_v30  ;;  %v6821_v37 = vld [vmem:[#allocation54_spill] sm:$0xff]  ;;  %v2133_v61 = vmax.f32 %v6823_v31, 0.0 }
 0x323   :  { %3560 = vmatpush.bf16.msra.mxu1 %v3515_v49  ;;  %v3088_v49 = vunpack.c.l.b16 %v2366_v44  ;;  %v3085_v44 = vunpack.c.l.b16 %v2363_v63  ;;  %v2096_v63 = vmax.f32 %v6131_v54, 0.0  ;;  %v4851_v54 = vld [vmem:[%s6711_s2 + $0x38] sm:$0xf0]  ;;  %v3237_v20 = vunpack.c.l.b16 %v2413_v50 }
 0x324   :  { %v2824_v27 = vunpack.c.l.b16 %v2306_v58  ;;  %2876 = vmatpush.bf16.msra.mxu2 %v6110_v62  ;;  %v5149_v62 = vld [vmem:[%s6711_s2 + $0x24] sm:$0xf]  ;;  %v3082_v25 = vunpack.c.l.b16 %v2360_v60  ;;  %v2140_v58 = vmax.f32 %v6815_v41, 0.0  ;;  %v4854_v60 = vor.u32 %v5151_v32, %v4851_v54  ;;  %v6835_v32 = vld [vmem:[#allocation31_spill] sm:$0xff] }
 0x325   :  { %v3112_v26 = vpack.c.b16 %v3088_v49, %v3087_v18  ;;  %v4846_v0 = vor.u32 %v5149_v62, %v4843_v51  ;;  %v2102_v18 = vmax.f32 %v6228_v16, 0.0  ;;  %v3111_v47 = vpack.c.b16 %v3086_v19, %v3085_v44  ;;  %v6819_v51 = vld [vmem:[#allocation41_spill] sm:$0xff] }
 0x326   :  { %v2846_v24 = vpack.c.b16 %v2824_v27, %v2823_v57  ;;  %v2139_v16 = vmax.f32 %v6813_v46, 0.0  ;;  %v3079_v49 = vunpack.c.l.b16 %v2357_v14  ;;  %v3109_v57 = vpack.c.b16 %v3082_v25, %v3081_v7  ;;  %v6816_v27 = vld [vmem:[#allocation45_spill] sm:$0xff]  ;;  %v6827_v46 = vld [vmem:[#allocation80_spill] sm:$0xff] }
 0x327   :  { %2877 = vmatmul.bf16.vlgmr.msra.gmra.mxu2 %v4842_v10  ;;  %v2358_v45 = vpack.c.bf16 %v2102_v18, %v2102_v18  ;;  %v2098_v10 = vmax.f32 %v6149_v11, 0.0  ;;  %v2137_v13 = vmax.f32 %v6816_v27, 0.0  ;;  %v2396_v22 = vpack.c.bf16 %v2140_v58, %v2140_v58 }
 0x328   :  { %3017 = vmatpush.bf16.msrb.mxu2 %v2986_v43  ;;  %2889 = vmatpush.bf16.msra.mxu3 %v2846_v24  ;;  %v2397_v43 = vpack.c.bf16 %v2141_v48, %v2141_v48  ;;  %v2395_v35 = vpack.c.bf16 %v2139_v16, %v2139_v16  ;;  %v2158_v62 = vmax.f32 %v6202_v12, 0.0  ;;  %v2351_v12 = vpack.c.bf16 %v2095_v23, %v2095_v23 }
 0x329   :  { %v3080_v17 = vunpack.c.l.b16 %v2358_v45  ;;  %v2354_v11 = vpack.c.bf16 %v2098_v10, %v2098_v10  ;;  %v2352_v5 = vpack.c.bf16 %v2096_v63, %v2096_v63  ;;  %v3075_v44 = vunpack.c.l.b16 %v2353_v6  ;;  %v6828_v10 = vld [vmem:[#allocation33_spill] sm:$0xff]  ;;  %v6831_v63 = vld [vmem:[#allocation78_spill] sm:$0xff] }
 0x32a   :  { %v3221_v24 = vunpack.c.l.b16 %v2397_v43  ;;  %v3219_v1 = vunpack.c.l.b16 %v2395_v35  ;;  %v2156_v18 = vmax.f32 %v6175_v21, 0.0  ;;  %v3218_v45 = vunpack.c.l.b16 %v2394_v8  ;;  %v6834_v8 = vld [vmem:[#allocation29_spill] sm:$0xff] }
 0x32b   :  { %v3076_v19 = vunpack.c.l.b16 %v2354_v11  ;;  %v3073_v7 = vunpack.c.l.b16 %v2351_v12  ;;  %v3074_v25 = vunpack.c.l.b16 %v2352_v5  ;;  %v2154_v16 = vmax.f32 %v6827_v46, 0.0 }
 0x32c   :  { %3018 = vmatpush.bf16.msrb.mxu2 %v2985_v33  ;;  %2890 = vmatpush.bf16.msra.mxu3 %v2845_v9  ;;  %v3108_v33 = vpack.c.b16 %v3080_v17, %v3079_v49  ;;  %v3220_v9 = vunpack.c.l.b16 %v2396_v22  ;;  %v3246_v34 = vpack.c.b16 %v3222_v55, %v3221_v24  ;;  %v2412_v43 = vpack.c.bf16 %v2156_v18, %v2156_v18  ;;  %v6829_v17 = vld [vmem:[#allocation35_spill] sm:$0xff]  ;;  %v6830_v24 = vld [vmem:[#allocation77_spill] sm:$0xff] }
 0x32d   :  { %v2131_v49 = vmax.f32 %v6828_v10, 0.0  ;;  %v3216_v35 = vunpack.c.l.b16 %v2392_v52  ;;  %v2151_v23 = vmax.f32 %v6830_v24, 0.0  ;;  %v2152_v55 = vmax.f32 %v6831_v63, 0.0  ;;  %v6839_v52 = vld [vmem:[#allocation26_spill] sm:$0xff] }
 0x32e   :  { %v3245_v41 = vpack.c.b16 %v3220_v9, %v3219_v1  ;;  %v2410_v11 = vpack.c.bf16 %v2154_v16, %v2154_v16  ;;  %v3236_v40 = vunpack.c.l.b16 %v2412_v43  ;;  %v2130_v54 = vmax.f32 %v6835_v32, 0.0  ;;  %v6842_v16 = vld [vmem:[#allocation72_spill] sm:$0xff] }
 0x32f   :  { %2891 = vmatmul.bf16.vlgmr.msra.gmra.mxu3 %v4846_v0  ;;  %v6822_v0 = vld [vmem:[#allocation81_spill] sm:$0xff]  ;;  %v2387_v1 = vpack.c.bf16 %v2131_v49, %v2131_v49  ;;  %v2408_v50 = vpack.c.bf16 %v2152_v55, %v2152_v55  ;;  %v6843_v49 = vld [vmem:[#allocation23_spill] sm:$0xff]  ;;  %v6846_v55 = vld [vmem:[#allocation68_spill] sm:$0xff] }
 0x330   :  { %3019 = vmatpush.bf16.msrb.mxu2 %v2984_v15  ;;  %3137 = vmatpush.bf16.msrb.mxu3 %v3112_v26  ;;  %v2135_v26 = vmax.f32 %v6819_v51, 0.0  ;;  %v2393_v15 = vpack.c.bf16 %v2137_v13, %v2137_v13  ;;  %v2155_v30 = vmax.f32 %v6822_v0, 0.0  ;;  %v4857_v13 = vld [vmem:[%s6711_s2 + $0x40] sm:$0xf] }
 0x331   :  { %v4858_v51 = vor.u32 %v5154_v4, %v4857_v13  ;;  %v4873_v4 = vld [vmem:[%s6711_s2 + $0x60] sm:$0xf] }
 0x332   :  { %v2391_v48 = vpack.c.bf16 %v2135_v26, %v2135_v26  ;;  %v3217_v14 = vunpack.c.l.b16 %v2393_v15  ;;  %v2411_v58 = vpack.c.bf16 %v2155_v30, %v2155_v30  ;;  %v6832_v26 = vld [vmem:[#allocation15_spill] sm:$0xff]  ;;  %v2127_v15 = vmax.f32 %v6833_v3, 0.0 }
 0x333   :  { %v2179_v29 = vmax.f32 %v6832_v26, 0.0  ;;  %v2407_v30 = vpack.c.bf16 %v2151_v23, %v2151_v23  ;;  %v6845_v23 = vld [vmem:[#allocation66_spill] sm:$0xff]  ;;  %v6868_v26 = vld [vmem:[#allocation11_spill] sm:$0xff] }
 0x334   :  { %3020 = vmatpush.bf16.msrb.mxu2 %v2983_v2  ;;  %3138 = vmatpush.bf16.msrb.mxu3 %v3111_v47  ;;  %v2414_v2 = vpack.c.bf16 %v2158_v62, %v2158_v62  ;;  %v6824_v47 = vld [vmem:[#allocation39_spill] sm:$0xff]  ;;  %v3215_v42 = vunpack.c.l.b16 %v2391_v48  ;;  %v3244_v22 = vpack.c.b16 %v3218_v45, %v3217_v14  ;;  %v2386_v14 = vpack.c.bf16 %v2130_v54, %v2130_v54  ;;  %v6840_v45 = vld [vmem:[#allocation28_spill] sm:$0xff] }
 0x335   :  { %v2134_v56 = vmax.f32 %v6824_v47, 0.0  ;;  %v6838_v47 = vld [vmem:[#allocation27_spill] sm:$0xff]  ;;  %v2145_v63 = vmax.f32 %v6845_v23, 0.0 }
 0x336   :  { %v3238_v28 = vunpack.c.l.b16 %v2414_v2  ;;  %v3243_v18 = vpack.c.b16 %v3216_v35, %v3215_v42  ;;  %v5158_v42 = vld [vmem:[%s6711_s2 + $0x64] sm:$0xf0] }
 0x337   :  { %v2390_v27 = vpack.c.bf16 %v2134_v56, %v2134_v56  ;;  %v2128_v56 = vmax.f32 %v6838_v47, 0.0  ;;  %v4874_v24 = vor.u32 %v5158_v42, %v4873_v4 }
 0x338   :  { %3021 = vmatpush.bf16.msrb.mxu2 %v6814_v53  ;;  %3139 = vmatpush.bf16.msrb.mxu3 %v3110_v59  ;;  %v6826_v59 = vld [vmem:[#allocation79_spill] sm:$0xff]  ;;  %v3106_v53 = vpack.c.b16 %v3076_v19, %v3075_v44  ;;  %v3254_v62 = vpack.c.b16 %v3238_v28, %v3237_v20  ;;  %v6837_v19 = vld [vmem:[#allocation76_spill] sm:$0xff]  ;;  %v3231_v20 = vunpack.c.l.b16 %v2407_v30  ;;  %v3232_v28 = vunpack.c.l.b16 %v2408_v50  ;;  %v6850_v30 = vld [vmem:[#allocation62_spill] sm:$0xff] }
 0x339   :  { %v2153_v21 = vmax.f32 %v6826_v59, 0.0  ;;  %v3214_v5 = vunpack.c.l.b16 %v2390_v27  ;;  %v2150_v0 = vmax.f32 %v6837_v19, 0.0  ;;  %3413 = vmatmul.bf16.vlgmr.msrb.gmra.mxu1 %v4874_v24  ;;  %v6849_v19 = vld [vmem:[#allocation60_spill] sm:$0xff]  ;;  %v2401_v50 = vpack.c.bf16 %v2145_v63, %v2145_v63 }
 0x33a   :  { %v3251_v3 = vpack.c.b16 %v3232_v28, %v3231_v20  ;;  %v6855_v20 = vld [vmem:[#allocation56_spill] sm:$0xff] }
 0x33b   :  { %v2409_v6 = vpack.c.bf16 %v2153_v21, %v2153_v21  ;;  %v6841_v21 = vld [vmem:[#allocation70_spill] sm:$0xff]  ;;  %v2406_v43 = vpack.c.bf16 %v2150_v0, %v2150_v0  ;;  %v2143_v0 = vmax.f32 %v6849_v19, 0.0  ;;  %v2203_v28 = vmax.f32 %v6855_v20, 0.0  ;;  %v2610_v20 = vpop.f32.mrf.mxu1 }
 0x33c   :  { %3022 = vmatpush.bf16.msrb.mxu2 %v6818_v39  ;;  %3140 = vmatpush.bf16.msrb.mxu3 %v3109_v57  ;;  %v2389_v57 = vpack.c.bf16 %v2133_v61, %v2133_v61  ;;  %v3105_v39 = vpack.c.b16 %v3074_v25, %v3073_v7  ;;  %v6355_v61 = vpack.c.bf16 %v2127_v15, %v2127_v15  ;;  %v2190_v7 = vmax.f32 %v6840_v45, 0.0  ;;  %v6847_v15 = vld [vmem:[#allocation21_spill] sm:$0xff]  ;;  %v6854_v45 = vld [vmem:[#allocation63_spill] sm:$0xff] }
 0x33d   :  { %v3233_v2 = vunpack.c.l.b16 %v2409_v6  ;;  %v3211_v25 = vunpack.c.l.b16 %v2387_v1  ;;  %v2147_v46 = vmax.f32 %v6841_v21, 0.0  ;;  %v2146_v6 = vmax.f32 %v6846_v55, 0.0 }
 0x33e   :  { %v3213_v12 = vunpack.c.l.b16 %v2389_v57  ;;  %v6844_v57 = vld [vmem:[#allocation24_spill] sm:$0xff]  ;;  %v3207_v54 = vunpack.c.l.b16 %v6355_v61 }
 0x33f   :  { %v2188_v27 = vmax.f32 %v6844_v57, 0.0  ;;  %v6852_v61 = vld [vmem:[#allocation20_spill] sm:$0xff]  ;;  %v6856_v57 = vld [vmem:[#allocation58_spill] sm:$0xff] }
 0x340   :  { %3023 = vmatpush.bf16.msrb.mxu2 %v6821_v37  ;;  %3141 = vmatpush.bf16.msrb.mxu3 %v3108_v33  ;;  %v3235_v33 = vunpack.c.l.b16 %v2411_v58  ;;  %v2129_v37 = vmax.f32 %v6834_v8, 0.0  ;;  %v3242_v58 = vpack.c.b16 %v3214_v5, %v3213_v12  ;;  %v2185_v8 = vmax.f32 %v6847_v15, 0.0 }
 0x341   :  { %v2444_v12 = vpack.c.bf16 %v2188_v27, %v2188_v27  ;;  %v2204_v27 = vmax.f32 %v6856_v57, 0.0 }
 0x342   :  { %v3253_v31 = vpack.c.b16 %v3236_v40, %v3235_v33  ;;  %v2385_v48 = vpack.c.bf16 %v2129_v37, %v2129_v37  ;;  %v6848_v37 = vld [vmem:[#allocation22_spill] sm:$0xff] }
 0x343   :  { %v2186_v32 = vmax.f32 %v6848_v37, 0.0  ;;  %v2459_v37 = vpack.c.bf16 %v2203_v28, %v2203_v28  ;;  %v6866_v28 = vld [vmem:[#allocation42_spill] sm:$0xff] }
 0x344   :  { %3024 = vmatpush.bf16.msrb.mxu2 %v6825_v36  ;;  %3142 = vmatpush.bf16.msrb.mxu3 %v6188_v38  ;;  %v2132_v38 = vmax.f32 %v6829_v17, 0.0  ;;  %v2189_v36 = vmax.f32 %v6839_v52, 0.0  ;;  %v2187_v17 = vmax.f32 %v6843_v49, 0.0  ;;  %v3209_v13 = vunpack.c.l.b16 %v2385_v48 }
 0x345   :  { %v2184_v52 = vmax.f32 %v6852_v61, 0.0  ;;  %v3225_v49 = vunpack.c.l.b16 %v2401_v50 }
 0x346   :  { %v2388_v9 = vpack.c.bf16 %v2132_v38, %v2132_v38  ;;  %v2384_v38 = vpack.c.bf16 %v2128_v56, %v2128_v56  ;;  %v2445_v35 = vpack.c.bf16 %v2189_v36, %v2189_v36  ;;  %v2443_v1 = vpack.c.bf16 %v2187_v17, %v2187_v17  ;;  %v6851_v56 = vld [vmem:[#allocation19_spill] sm:$0xff]  ;;  %v6853_v36 = vld [vmem:[#allocation61_spill] sm:$0xff] }
 0x347   :  { %3025 = vmatmul.bf16.vlgmr.msrb.gmra.mxu2 %v4854_v60  ;;  %v3234_v60 = vunpack.c.l.b16 %v2410_v11  ;;  %v2403_v11 = vpack.c.bf16 %v2147_v46, %v2147_v46  ;;  %v2183_v48 = vmax.f32 %v6851_v56, 0.0  ;;  %v2440_v63 = vpack.c.bf16 %v2184_v52, %v2184_v52  ;;  %v6863_v56 = vld [vmem:[#allocation48_spill] sm:$0xff] }
 0x348   :  { %3271 = vmatpush.bf16.msra.mxu2 %v3246_v34  ;;  %3143 = vmatpush.bf16.msrb.mxu3 %v3106_v53  ;;  %v6836_v34 = vld [vmem:[#allocation74_spill] sm:$0xff]  ;;  %v3212_v59 = vunpack.c.l.b16 %v2388_v9  ;;  %v2148_v53 = vmax.f32 %v6842_v16, 0.0  ;;  %v3208_v9 = vunpack.c.l.b16 %v2384_v38  ;;  %v3371_v5 = vunpack.c.l.b16 %v2445_v35  ;;  %v4865_v16 = vld [vmem:[%s6711_s2 + $0x50] sm:$0xf]  ;;  %v6857_v35 = vld [vmem:[#allocation17_spill] sm:$0xff] }
 0x349   :  { %v2149_v44 = vmax.f32 %v6836_v34, 0.0  ;;  %v3252_v10 = vpack.c.b16 %v3234_v60, %v3233_v2  ;;  %v2402_v2 = vpack.c.bf16 %v2146_v6, %v2146_v6  ;;  %v3227_v60 = vunpack.c.l.b16 %v2403_v11  ;;  %v6859_v11 = vld [vmem:[#allocation51_spill] sm:$0xff] }
 0x34a   :  { %v3241_v33 = vpack.c.b16 %v3212_v59, %v3211_v25  ;;  %v2404_v40 = vpack.c.bf16 %v2148_v53, %v2148_v53  ;;  %v2441_v25 = vpack.c.bf16 %v2185_v8, %v2185_v8  ;;  %v2442_v59 = vpack.c.bf16 %v2186_v32, %v2186_v32  ;;  %v5156_v53 = vld [vmem:[%s6711_s2 + $0x54] sm:$0xf0] }
 0x34b   :  { %v3369_v21 = vunpack.c.l.b16 %v2443_v1  ;;  %v3239_v46 = vpack.c.b16 %v3208_v9, %v3207_v54  ;;  %v3226_v17 = vunpack.c.l.b16 %v2402_v2  ;;  %v4866_v42 = vor.u32 %v5156_v53, %v4865_v16  ;;  %v5159_v9 = vld [vmem:[%s6711_s2 + $0x74] sm:$0xf] }
 0x34c   :  { %3272 = vmatpush.bf16.msra.mxu2 %v3245_v41  ;;  %3144 = vmatpush.bf16.msrb.mxu3 %v3105_v39  ;;  %v2405_v41 = vpack.c.bf16 %v2149_v44, %v2149_v44  ;;  %v3210_v39 = vunpack.c.l.b16 %v2386_v14  ;;  %v2205_v14 = vmax.f32 %v6853_v36, 0.0  ;;  %v2439_v23 = vpack.c.bf16 %v2183_v48, %v2183_v48 }
 0x34d   :  { %v3367_v55 = vunpack.c.l.b16 %v2441_v25  ;;  %v3368_v6 = vunpack.c.l.b16 %v2442_v59  ;;  %v3248_v8 = vpack.c.b16 %v3226_v17, %v3225_v49  ;;  %v2460_v32 = vpack.c.bf16 %v2204_v27, %v2204_v27  ;;  %v6864_v59 = vld [vmem:[#allocation13_spill] sm:$0xff]  ;;  %v6867_v49 = vld [vmem:[#allocation44_spill] sm:$0xff] }
 0x34e   :  { %v3240_v34 = vpack.c.b16 %v3210_v39, %v3209_v13  ;;  %v2461_v13 = vpack.c.bf16 %v2205_v14, %v2205_v14  ;;  %v2181_v39 = vmax.f32 %v6857_v35, 0.0  ;;  %v3365_v50 = vunpack.c.l.b16 %v2439_v23 }
 0x34f   :  { %3145 = vmatmul.bf16.vlgmr.msrb.gmra.mxu3 %v4858_v51  ;;  %v3230_v51 = vunpack.c.l.b16 %v2406_v43  ;;  %v2399_v43 = vpack.c.bf16 %v2143_v0, %v2143_v0  ;;  %v5155_v0 = vld [vmem:[%s6711_s2 + $0x54] sm:$0xf]  ;;  %v3366_v2 = vunpack.c.l.b16 %v2440_v63  ;;  %v2200_v48 = vmax.f32 %v6863_v56, 0.0 }
 0x350   :  { %3273 = vmatpush.bf16.msra.mxu2 %v3244_v22  ;;  %3285 = vmatpush.bf16.msra.mxu3 %v3254_v62  ;;  %v2446_v22 = vpack.c.bf16 %v2190_v7, %v2190_v7  ;;  %v3229_v62 = vunpack.c.l.b16 %v2405_v41  ;;  %v2206_v7 = vmax.f32 %v6854_v45, 0.0  ;;  %v3370_v41 = vunpack.c.l.b16 %v2444_v12  ;;  %v4883_v12 = vld [vmem:[%s6711_s2 + $0x78] sm:$0xf0] }
 0x351   :  { %v3489_v54 = vunpack.c.l.b16 %v2461_v13  ;;  %v3487_v14 = vunpack.c.l.b16 %v2459_v37  ;;  %v3488_v45 = vunpack.c.l.b16 %v2460_v32  ;;  %v2435_v53 = vpack.c.bf16 %v2179_v29, %v2179_v29  ;;  %v6869_v29 = vld [vmem:[#allocation12_spill] sm:$0xff] }
 0x352   :  { %v3372_v44 = vunpack.c.l.b16 %v2446_v22  ;;  %v3250_v47 = vpack.c.b16 %v3230_v51, %v3229_v62  ;;  %v2462_v4 = vpack.c.bf16 %v2206_v7, %v2206_v7  ;;  %v6858_v22 = vld [vmem:[#allocation18_spill] sm:$0xff]  ;;  %v6860_v62 = vld [vmem:[#allocation53_spill] sm:$0xff]  ;;  %v2198_v17 = vmax.f32 %v6867_v49, 0.0 }
 0x353   :  { %v2182_v24 = vmax.f32 %v6858_v22, 0.0  ;;  %v2202_v51 = vmax.f32 %v6860_v62, 0.0  ;;  %v3385_v57 = vpack.c.b16 %v3366_v2, %v3365_v50  ;;  %v2456_v27 = vpack.c.bf16 %v2200_v48, %v2200_v48 }
 0x354   :  { %3274 = vmatpush.bf16.msra.mxu2 %v3243_v18  ;;  %3286 = vmatpush.bf16.msra.mxu3 %v3253_v31  ;;  %v2144_v18 = vmax.f32 %v6850_v30, 0.0  ;;  %v3228_v31 = vunpack.c.l.b16 %v2404_v40  ;;  %v3387_v40 = vpack.c.b16 %v3370_v41, %v3369_v21  ;;  %v3490_v1 = vunpack.c.l.b16 %v2462_v4  ;;  %v4867_v30 = vld [vmem:[%s6711_s2 + $0x58] sm:$0xf0] }
 0x355   :  { %v2438_v19 = vpack.c.bf16 %v2182_v24, %v2182_v24  ;;  %v2458_v52 = vpack.c.bf16 %v2202_v51, %v2202_v51  ;;  %v4870_v25 = vor.u32 %v5155_v0, %v4867_v30  ;;  %v2177_v21 = vmax.f32 %v6864_v59, 0.0 }
 0x356   :  { %v3249_v38 = vpack.c.b16 %v3228_v31, %v3227_v60  ;;  %v6862_v60 = vld [vmem:[#allocation46_spill] sm:$0xff]  ;;  %v3514_v7 = vpack.c.b16 %v3490_v1, %v3489_v54  ;;  %v2175_v35 = vmax.f32 %v6868_v26, 0.0  ;;  %v3361_v23 = vunpack.c.l.b16 %v2435_v53 }
 0x357   :  { %v2199_v31 = vmax.f32 %v6862_v60, 0.0  ;;  %v3486_v4 = vunpack.c.l.b16 %v2458_v52  ;;  %v2433_v22 = vpack.c.bf16 %v2177_v21, %v2177_v21  ;;  %v3484_v37 = vunpack.c.l.b16 %v2456_v27  ;;  %v6874_v52 = vld [vmem:[#allocation30_spill] sm:$0xff] }
 0x358   :  { %3275 = vmatpush.bf16.msra.mxu2 %v3242_v58  ;;  %3287 = vmatpush.bf16.msra.mxu3 %v3252_v10  ;;  %v3388_v58 = vpack.c.b16 %v3372_v44, %v3371_v5  ;;  %v2400_v10 = vpack.c.bf16 %v2144_v18, %v2144_v18  ;;  %v6861_v5 = vld [vmem:[#allocation16_spill] sm:$0xff]  ;;  %v2437_v44 = vpack.c.bf16 %v2181_v39, %v2181_v39  ;;  %v2176_v39 = vmax.f32 %v6869_v29, 0.0  ;;  %v5157_v53 = vld [vmem:[%s6711_s2 + $0x64] sm:$0xf] }
 0x359   :  { %v4886_v18 = vor.u32 %v5159_v9, %v4883_v12  ;;  %v2431_v54 = vpack.c.bf16 %v2175_v35, %v2175_v35  ;;  %v3359_v9 = vunpack.c.l.b16 %v2433_v22 }
 0x35a   :  { %v3224_v15 = vunpack.c.l.b16 %v2400_v10  ;;  %v2197_v10 = vmax.f32 %v6866_v28, 0.0  ;;  %v2432_v1 = vpack.c.bf16 %v2176_v39, %v2176_v39 }
 0x35b   :  { %3561 = vmatmul.bf16.vlgmr.msra.gmra.mxu1 %v4886_v18 }
 0x35c   :  { %3276 = vmatpush.bf16.msra.mxu2 %v3241_v33  ;;  %3288 = vmatpush.bf16.msra.mxu3 %v3251_v3  ;;  %v2201_v33 = vmax.f32 %v6859_v11, 0.0  ;;  %v3223_v3 = vunpack.c.l.b16 %v2399_v43  ;;  %v3364_v43 = vunpack.c.l.b16 %v2438_v19  ;;  %v6870_v11 = vld [vmem:[#allocation38_spill] sm:$0xff]  ;;  %v2453_v51 = vpack.c.bf16 %v2197_v10, %v2197_v10 }
 0x35d   :  { %v3358_v56 = vunpack.c.l.b16 %v2432_v1 }
 0x35e   :  { %v2457_v61 = vpack.c.bf16 %v2201_v33, %v2201_v33  ;;  %v3247_v36 = vpack.c.b16 %v3224_v15, %v3223_v3  ;;  %v2195_v33 = vmax.f32 %v6870_v11, 0.0  ;;  %v2454_v15 = vpack.c.bf16 %v2198_v17, %v2198_v17 }
 0x35f   :  { %v3481_v50 = vunpack.c.l.b16 %v2453_v51 }
 0x360   :  { %3277 = vmatpush.bf16.msra.mxu2 %v3240_v34  ;;  %3289 = vmatpush.bf16.msra.mxu3 %v3250_v47  ;;  %v2180_v34 = vmax.f32 %v6861_v5, 0.0  ;;  %v3386_v47 = vpack.c.b16 %v3368_v6, %v3367_v55  ;;  %v3485_v13 = vunpack.c.l.b16 %v2457_v61  ;;  %v2624_v6 = vpop.f32.mrf.mxu2  ;;  %v6872_v5 = vld [vmem:[#allocation34_spill] sm:$0xff]  ;;  %v2451_v0 = vpack.c.bf16 %v2195_v33, %v2195_v33 }
 0x361   :  { %v6419_v3 = vadd.f32 %v2624_v6, %v2610_v20  ;;  %v3482_v2 = vunpack.c.l.b16 %v2454_v15 }
 0x362   :  { %v2436_v41 = vpack.c.bf16 %v2180_v34, %v2180_v34  ;;  %v3512_v32 = vpack.c.b16 %v3486_v4, %v3485_v13  ;;  %v2193_v34 = vmax.f32 %v6872_v5, 0.0  ;;  %v3479_v21 = vunpack.c.l.b16 %v2451_v0  ;;  %v4881_v13 = vld [vmem:[%s6711_s2 + $0x70] sm:$0xf]  ;;  %v5160_v4 = vld [vmem:[%s6711_s2 + $0x74] sm:$0xf0] }
 0x363   :  { %v4882_v26 = vor.u32 %v5160_v4, %v4881_v13 }
 0x364   :  { %3278 = vmatpush.bf16.msra.mxu2 %v3239_v46  ;;  %3290 = vmatpush.bf16.msra.mxu3 %v3249_v38  ;;  %v6865_v46 = vld [vmem:[#allocation14_spill] sm:$0xff]  ;;  %v2455_v38 = vpack.c.bf16 %v2199_v31, %v2199_v31  ;;  %v3362_v63 = vunpack.c.l.b16 %v2436_v41  ;;  %v2612_v31 = vpop.f32.mrf.mxu1  ;;  %v4875_v41 = vld [vmem:[%s6711_s2 + $0x68] sm:$0xf0] }
 0x365   :  { %v2178_v16 = vmax.f32 %v6865_v46, 0.0  ;;  %v4878_v17 = vor.u32 %v5157_v53, %v4875_v41 }
 0x366   :  { %v3383_v30 = vpack.c.b16 %v3362_v63, %v3361_v23 }
 0x367   :  { %3279 = vmatmul.bf16.vlgmr.msra.gmra.mxu2 %v4866_v42  ;;  %v3513_v42 = vpack.c.b16 %v3488_v45, %v3487_v14  ;;  %v2434_v24 = vpack.c.bf16 %v2178_v16, %v2178_v16  ;;  %v6875_v14 = vld [vmem:[#allocation32_spill] sm:$0xff]  ;;  %v3510_v16 = vpack.c.b16 %v3482_v2, %v3481_v50 }
 0x368   :  { %3419 = vmatpush.bf16.msrb.mxu2 %v3388_v58  ;;  %3291 = vmatpush.bf16.msra.mxu3 %v3248_v8  ;;  %v3363_v58 = vunpack.c.l.b16 %v2437_v44  ;;  %v3483_v8 = vunpack.c.l.b16 %v2455_v38  ;;  %v6873_v44 = vld [vmem:[#allocation36_spill] sm:$0xff]  ;;  %v2626_v61 = vpop.f32.mrf.mxu2  ;;  %v2192_v45 = vmax.f32 %v6875_v14, 0.0 }
 0x369   :  { %v3360_v12 = vunpack.c.l.b16 %v2434_v24  ;;  %v2194_v19 = vmax.f32 %v6873_v44, 0.0  ;;  %v5225_v44 = vmov 1983009808  }
 0x36a   :  { %v3384_v55 = vpack.c.b16 %v3364_v43, %v3363_v58  ;;  %v3511_v60 = vpack.c.b16 %v3484_v37, %v3483_v8  ;;  %v2448_v20 = vpack.c.bf16 %v2192_v45, %v2192_v45 }
 0x36b   :  { %v3382_v48 = vpack.c.b16 %v3360_v12, %v3359_v9  ;;  %v2450_v59 = vpack.c.bf16 %v2194_v19, %v2194_v19  ;;  %v3573_v19 = vunpack.c.l.s4 %v5225_v44 }
 0x36c   :  { %3420 = vmatpush.bf16.msrb.mxu2 %v3387_v40  ;;  %3292 = vmatpush.bf16.msra.mxu3 %v3247_v36  ;;  %v6871_v40 = vld [vmem:[#allocation40_spill] sm:$0xff]  ;;  %v2191_v36 = vmax.f32 %v6874_v52, 0.0  ;;  %v2758_v35 = vpop.f32.mrf.mxu1 }
 0x36d   :  { %v2196_v62 = vmax.f32 %v6871_v40, 0.0  ;;  %v3478_v10 = vunpack.c.l.b16 %v2450_v59  ;;  %v6444_v2 = vunpack.c.0.s8 %v3573_v19 }
 0x36e   :  { %v2447_v58 = vpack.c.bf16 %v2191_v36, %v2191_v36 }
 0x36f   :  { %3293 = vmatmul.bf16.vlgmr.msra.gmra.mxu3 %v4870_v25  ;;  %v2452_v18 = vpack.c.bf16 %v2196_v62, %v2196_v62  ;;  %v6425_v25 = vadd.f32 %v2626_v61, %v2612_v31 }
 0x370   :  { %3421 = vmatpush.bf16.msrb.mxu2 %v3386_v47  ;;  %3539 = vmatpush.bf16.msrb.mxu3 %v3514_v7  ;;  %v3357_v47 = vunpack.c.l.b16 %v2431_v54  ;;  %v2449_v7 = vpack.c.bf16 %v2193_v34, %v2193_v34  ;;  %v3475_v38 = vunpack.c.l.b16 %v2447_v58 }
 0x371   :  { %v3480_v46 = vunpack.c.l.b16 %v2452_v18  ;;  %v3682_v61 = vrot.slane %v6425_v25, 4 }
 0x372   :  { %v3381_v43 = vpack.c.b16 %v3358_v56, %v3357_v47  ;;  %v3477_v28 = vunpack.c.l.b16 %v2449_v7  ;;  %v3570_v47 = vrot.slane %v6419_v3, 4 }
 0x373   :  { %v3509_v49 = vpack.c.b16 %v3480_v46, %v3479_v21 }
 0x374   :  { %3422 = vmatpush.bf16.msrb.mxu2 %v3385_v57  ;;  %3540 = vmatpush.bf16.msrb.mxu3 %v3513_v42  ;;  %v3476_v57 = vunpack.c.l.b16 %v2448_v20  ;;  %v3508_v27 = vpack.c.b16 %v3478_v10, %v3477_v28  ;;  %v2760_v39 = vpop.f32.mrf.mxu1 }
 0x376   :  { %v3507_v42 = vpack.c.b16 %v3476_v57, %v3475_v38 }
 0x378   :  { %3423 = vmatpush.bf16.msrb.mxu2 %v3384_v55  ;;  %3541 = vmatpush.bf16.msrb.mxu3 %v3512_v32  ;;  %v2744_v29 = vpop.f32.mrf.mxu3 }
 0x379   :  { %v2759_v1 = vadd.f32 %v2758_v35, %v2744_v29 }
 0x37b   :  { %v3582_v0 = vrot.slane %v2759_v1, 4 }
 0x37c   :  { %3424 = vmatpush.bf16.msrb.mxu2 %v3383_v30  ;;  %3542 = vmatpush.bf16.msrb.mxu3 %v3511_v60  ;;  %v3012_v23 = vpop.f32.mrf.mxu1 }
 0x380   :  { %3425 = vmatpush.bf16.msrb.mxu2 %v3382_v48  ;;  %3543 = vmatpush.bf16.msrb.mxu3 %v3510_v16  ;;  %v2746_v22 = vpop.f32.mrf.mxu3  ;;  %v5226_v16 = vmov 1934713408  }
 0x381   :  { %v2761_v56 = vadd.f32 %v2760_v39, %v2746_v22  ;;  %v3621_v53 = vunpack.c.l.s4 %v5226_v16 }
 0x383   :  { %v6461_v13 = vunpack.c.0.s8 %v3621_v53  ;;  %v5166_v53 = vld [vmem:[%s6712_s3 + $0x28] sm:$0xff] }
 0x384   :  { %3426 = vmatpush.bf16.msrb.mxu2 %v3381_v43  ;;  %3544 = vmatpush.bf16.msrb.mxu3 %v3509_v49  ;;  %v3014_v6 = vpop.f32.mrf.mxu1 }
 0x387   :  { %3427 = vmatmul.bf16.vlgmr.msrb.gmra.mxu2 %v4878_v17 }
 0x388   :  { %3545 = vmatpush.bf16.msrb.mxu3 %v3508_v27 }
 0x38c   :  { %3546 = vmatpush.bf16.msrb.mxu3 %v3507_v42  ;;  %v3160_v40 = vpop.f32.mrf.mxu1 }
 0x38f   :  { %3547 = vmatmul.bf16.vlgmr.msrb.gmra.mxu3 %v4882_v26 }
 0x394   :  { %v3162_v15 = vpop.f32.mrf.mxu1 }
 0x3aa   :  { %v2878_v24 = vpop.f32.mrf.mxu2 }
 0x3b2   :  { %v2892_v63 = vpop.f32.mrf.mxu3  ;;  %v2880_v55 = vpop.f32.mrf.mxu2 }
 0x3b3   :  { %v2893_v54 = vadd.f32 %v2892_v63, %v2878_v24 }
 0x3b5   :  { %v3567_v34 = vrot.slane %v2893_v54, 4  ;;  %v3571_v14 = vsel %vm3568_vm1, %v2893_v54, %v3570_v47  ;;  %v5184_v47 = vld [vmem:[%s6712_s3 + $0xb8] sm:$0xff] }
 0x3b6   :  { %v3414_v32 = vpop.f32.mrf.mxu1  ;;  %v3579_v20 = vperm.slane %v3571_v14, %v6444_v2  ;;  %4144 = vmatpush.bf16.msrb.mxu1 %v5184_v47 }
 0x3b7   :  { %v3569_v50 = vsel %vm3568_vm1, %v3567_v34, %v6419_v3  ;;  %v3694_v3 = vrot.slane %v2761_v56, 4 }
 0x3b8   :  { %v3575_v52 = vperm.slane %v3569_v50, %v6444_v2  ;;  %v3630_v29 = vrot.slane %v3579_v20, 4 }
 0x3ba   :  { %v2894_v11 = vpop.f32.mrf.mxu3  ;;  %v3618_v28 = vrot.slane %v3575_v52, 4 }
 0x3bb   :  { %v2895_v60 = vadd.f32 %v2894_v11, %v2880_v55 }
 0x3bd   :  { %v3680_v7 = vrot.slane %v2895_v60, 4  ;;  %v3683_v59 = vsel %vm3568_vm1, %v2895_v60, %v3682_v61 }
 0x3be   :  { %v3416_v31 = vpop.f32.mrf.mxu1  ;;  %v6456_v49 = vperm.slane %v3683_v59, %v6444_v2 }
 0x3bf   :  { %v3681_v27 = vsel %vm3568_vm1, %v3680_v7, %v6425_v25  ;;  %v5183_v7 = vld [vmem:[%s6712_s3 + $0xb0] sm:$0xff] }
 0x3c0   :  { %v6469_v63 = vperm.slane %v3681_v27, %v6444_v2  ;;  %v3742_v25 = vrot.slane %v6456_v49, 4  ;;  %4145 = vmatpush.bf16.msrb.mxu1 %v5183_v7 }
 0x3ca   :  { %v3026_v33 = vpop.f32.mrf.mxu2 }
 0x3cb   :  { %v3027_v9 = vadd.f32 %v3026_v33, %v3012_v23 }
 0x3cd   :  { %v3580_v30 = vrot.slane %v3027_v9, 4  ;;  %v3583_v18 = vsel %vm3568_vm1, %v3027_v9, %v3582_v0  ;;  %v5176_v9 = vld [vmem:[%s6712_s3 + $0x78] sm:$0xff]  ;;  %v5167_v0 = vld [vmem:[%s6712_s3 + $0x30] sm:$0xff] }
 0x3ce   :  { %v3591_v48 = vperm.slane %v3583_v18, %v6444_v2  ;;  %4131 = vmatpush.bf16.msra.mxu3 %v5176_v9 }
 0x3cf   :  { %v3581_v36 = vsel %vm3568_vm1, %v3580_v30, %v2759_v1 }
 0x3d0   :  { %v3587_v41 = vperm.slane %v3581_v36, %v6444_v2  ;;  %v3628_v58 = vrot.slane %v3591_v48, 4 }
 0x3d2   :  { %v3146_v62 = vpop.f32.mrf.mxu3  ;;  %v3028_v51 = vpop.f32.mrf.mxu2  ;;  %v3616_v4 = vrot.slane %v3587_v41, 4  ;;  %v3619_v26 = vsel %vm3568_vm1, %v3587_v41, %v3618_v28  ;;  %v3629_v35 = vsel %vm3568_vm1, %v3628_v58, %v3579_v20  ;;  %v5174_v20 = vld [vmem:[%s6712_s3 + $0x68] sm:$0xff] }
 0x3d3   :  { %v3029_v45 = vadd.f32 %v3028_v51, %v3014_v6  ;;  %v3161_v10 = vadd.f32 %v3160_v40, %v3146_v62  ;;  %v6476_v62 = vperm.slane %v3619_v26, %v6461_v13  ;;  %v6479_v51 = vperm.slane %v3629_v35, %v6461_v13 }
 0x3d4   :  { %v3617_v1 = vsel %vm3568_vm1, %v3616_v4, %v3575_v52 }
 0x3d5   :  { %v3692_v17 = vrot.slane %v3029_v45, 4  ;;  %v3695_v38 = vsel %vm3568_vm1, %v3029_v45, %v3694_v3  ;;  %v3594_v39 = vrot.slane %v3161_v10, 4  ;;  %v3674_v14 = vrot.slane %v6479_v51, 4 }
 0x3d6   :  { %v3703_v24 = vperm.slane %v3695_v38, %v6444_v2 }
 0x3d7   :  { %v3693_v55 = vsel %vm3568_vm1, %v3692_v17, %v2761_v56 }
 0x3d8   :  { %v3562_v23 = vpop.f32.mrf.mxu1  ;;  %v6491_v34 = vperm.slane %v3693_v55, %v6444_v2  ;;  %v3740_v44 = vrot.slane %v3703_v24, 4  ;;  %v3743_v45 = vsel %vm3568_vm1, %v3703_v24, %v3742_v25 }
 0x3d9   :  { %v3751_v24 = vperm.slane %v3743_v45, %v6461_v13 }
 0x3da   :  { %v3148_v8 = vpop.f32.mrf.mxu3  ;;  %v3728_v3 = vrot.slane %v6491_v34, 4 }
 0x3db   :  { %v6465_v22 = vadd.f32 %v3162_v15, %v3148_v8  ;;  %v3631_v15 = vsel %vm3568_vm1, %v3591_v48, %v3630_v29  ;;  %v5168_v8 = vld [vmem:[%s6712_s3 + $0x38] sm:$0xff]  ;;  %v3670_v48 = vrot.slane %v6476_v62, 4 }
 0x3dc   :  { %4118 = vmatpush.bf16.msra.mxu2 %v5168_v8  ;;  %v6512_v61 = vperm.slane %v3631_v15, %v6461_v13 }
 0x3e0   :  { %4119 = vmatpush.bf16.msra.mxu2 %v5167_v0  ;;  %v3564_v17 = vpop.f32.mrf.mxu1  ;;  %v5164_v0 = vld [vmem:[%s6712_s3 + $0x18] sm:$0xff] }
 0x3e4   :  { %4120 = vmatpush.bf16.msra.mxu2 %v5166_v53 }
 0x3ea   :  { %v3280_v37 = vpop.f32.mrf.mxu2 }
 0x3f2   :  { %v3294_v12 = vpop.f32.mrf.mxu3  ;;  %v6439_v5 = vpop.f32.mrf.mxu2 }
 0x3f3   :  { %v3295_v42 = vadd.f32 %v3294_v12, %v3280_v37  ;;  %v3706_v12 = vrot.slane %v6465_v22, 4 }
 0x3f5   :  { %v3606_v37 = vrot.slane %v3295_v42, 4 }
 0x3fa   :  { %v3296_v21 = vpop.f32.mrf.mxu3 }
 0x3fb   :  { %v3297_v30 = vadd.f32 %v3296_v21, %v6439_v5  ;;  %v6509_v5 = vperm.slane %v3617_v1, %v6461_v13 }
 0x3fd   :  { %v3718_v41 = vrot.slane %v3297_v30, 4 }
 0x40a   :  { %v3428_v46 = vpop.f32.mrf.mxu2 }
 0x40b   :  { %v3429_v43 = vadd.f32 %v3428_v46, %v3414_v32 }
 0x40d   :  { %v3592_v57 = vrot.slane %v3429_v43, 4  ;;  %v3595_v33 = vsel %vm3568_vm1, %v3429_v43, %v3594_v39  ;;  %v3741_v43 = vsel %vm3568_vm1, %v3740_v44, %v6456_v49  ;;  %v3666_v39 = vrot.slane %v6509_v5, 4 }
 0x40e   :  { %v3603_v60 = vperm.slane %v3595_v33, %v6444_v2  ;;  %v6563_v15 = vperm.slane %v3741_v43, %v6461_v13 }
 0x40f   :  { %v3593_v6 = vsel %vm3568_vm1, %v3592_v57, %v3161_v10 }
 0x410   :  { %v3599_v19 = vperm.slane %v3593_v6, %v6444_v2  ;;  %v3654_v58 = vrot.slane %v3603_v60, 4 }
 0x412   :  { %v3548_v11 = vpop.f32.mrf.mxu3  ;;  %v3430_v40 = vpop.f32.mrf.mxu2  ;;  %v3642_v46 = vrot.slane %v3599_v19, 4 }
 0x413   :  { %v3563_v32 = vadd.f32 %v3562_v23, %v3548_v11  ;;  %v3431_v54 = vadd.f32 %v3430_v40, %v3416_v31  ;;  %v5175_v31 = vld [vmem:[%s6712_s3 + $0x70] sm:$0xff]  ;;  %v5165_v23 = vld [vmem:[%s6712_s3 + $0x20] sm:$0xff]  ;;  %v3729_v40 = vsel %vm3568_vm1, %v3728_v3, %v6469_v63 }
 0x414   :  { %4132 = vmatpush.bf16.msra.mxu3 %v5175_v31  ;;  %4121 = vmatpush.bf16.msra.mxu2 %v5165_v23  ;;  %v5170_v23 = vld [vmem:[%s6712_s3 + $0x48] sm:$0xff] }
 0x415   :  { %v3604_v18 = vrot.slane %v3563_v32, 4  ;;  %v3607_v50 = vsel %vm3568_vm1, %v3563_v32, %v3606_v37  ;;  %v3707_v36 = vsel %vm3568_vm1, %v3431_v54, %v3706_v12  ;;  %v3704_v16 = vrot.slane %v3431_v54, 4 }
 0x416   :  { %v3615_v56 = vperm.slane %v3607_v50, %v6444_v2  ;;  %v3715_v38 = vperm.slane %v3707_v36, %v6444_v2  ;;  %v3790_v50 = vrot.slane %v3751_v24, 4  ;;  %v3786_v36 = vrot.slane %v6563_v15, 4 }
 0x417   :  { %v3605_v52 = vsel %vm3568_vm1, %v3604_v18, %v3295_v42  ;;  %v3705_v35 = vsel %vm3568_vm1, %v3704_v16, %v6465_v22  ;;  %v5173_v22 = vld [vmem:[%s6712_s3 + $0x60] sm:$0xff] }
 0x418   :  { %v3611_v59 = vperm.slane %v3605_v52, %v6444_v2  ;;  %v3652_v21 = vrot.slane %v3615_v56, 4  ;;  %v3655_v26 = vsel %vm3568_vm1, %v3615_v56, %v3654_v58  ;;  %4133 = vmatpush.bf16.msra.mxu3 %v5174_v20  ;;  %v3766_v32 = vrot.slane %v3715_v38, 4  ;;  %4122 = vmatpush.bf16.msra.mxu2 %v5164_v0 }
 0x419   :  { %v3663_v8 = vperm.slane %v3655_v26, %v6461_v13  ;;  %v3711_v44 = vperm.slane %v3705_v35, %v6444_v2 }
 0x41a   :  { %v3640_v28 = vrot.slane %v3611_v59, 4  ;;  %v3550_v10 = vpop.f32.mrf.mxu3  ;;  %v3643_v57 = vsel %vm3568_vm1, %v3611_v59, %v3642_v46  ;;  %v3653_v27 = vsel %vm3568_vm1, %v3652_v21, %v3603_v60  ;;  %v5172_v60 = vld [vmem:[%s6712_s3 + $0x58] sm:$0xff]  ;;  %v5163_v46 = vld [vmem:[%s6712_s3 + $0x10] sm:$0xff] }
 0x41b   :  { %v3565_v4 = vadd.f32 %v3564_v17, %v3550_v10  ;;  %v6535_v42 = vperm.slane %v3643_v57, %v6461_v13  ;;  %v6538_v49 = vperm.slane %v3653_v27, %v6461_v13  ;;  %v3676_v47 = vrot.slane %v3663_v8, 4  ;;  %v5162_v27 = vld [vmem:[%s6712_s3 + $0x8] sm:$0xff] }
 0x41c   :  { %v3641_v29 = vsel %vm3568_vm1, %v3640_v28, %v3599_v19  ;;  %4134 = vmatpush.bf16.msra.mxu3 %v5173_v22  ;;  %v3754_v45 = vrot.slane %v3711_v44, 4  ;;  %4123 = vmatpush.bf16.msra.mxu2 %v5163_v46  ;;  %v5180_v22 = vld [vmem:[%s6712_s3 + $0x98] sm:$0xff] }
 0x41d   :  { %v3716_v25 = vrot.slane %v3565_v4, 4  ;;  %v3719_v55 = vsel %vm3568_vm1, %v3565_v4, %v3718_v41  ;;  %v3671_v6 = vsel %vm3568_vm1, %v6535_v42, %v3670_v48  ;;  %v6553_v11 = vperm.slane %v3641_v29, %v6461_v13 }
 0x41e   :  { %v3727_v33 = vperm.slane %v3719_v55, %v6444_v2  ;;  %3801 = vrot.lane.b32.xlu1 %v3671_v6, %s5227_s20  ;;  %v3675_v1 = vsel %vm3568_vm1, %v6538_v49, %v3674_v14  ;;  %v3730_v48 = vrot.slane %v6469_v63, 4  ;;  %v3678_v14 = vrot.slane %v6512_v61, 4  ;;  %v5191_v55 = vld [vmem:[%s6712_s3 + $0xf0] sm:$0xff]  ;;  %v5169_v6 = vld [vmem:[%s6712_s3 + $0x40] sm:$0xff] }
 0x41f   :  { %v3717_v37 = vsel %vm3568_vm1, %v3716_v25, %v3297_v30  ;;  %v3667_v54 = vsel %vm3568_vm1, %v6553_v11, %v3666_v39  ;;  %v6577_v30 = vperm.slane %v3729_v40, %v6461_v13  ;;  %v3668_v53 = vrot.slane %v6535_v42, 4  ;;  %v5182_v39 = vld [vmem:[%s6712_s3 + $0xa8] sm:$0xff]  ;;  %v5181_v25 = vld [vmem:[%s6712_s3 + $0xa0] sm:$0xff]  ;;  %v5179_v40 = vld [vmem:[%s6712_s3 + $0x90] sm:$0xff] }
 0x420   :  { %v3723_v9 = vperm.slane %v3717_v37, %v6444_v2  ;;  %v3764_v12 = vrot.slane %v3727_v33, 4  ;;  %v5204_v19 = vpack.i.bf16 %v3675_v1, %v3667_v54  ;;  %v3767_v18 = vsel %vm3568_vm1, %v3727_v33, %v3766_v32  ;;  %4135 = vmatpush.bf16.msra.mxu3 %v5172_v60  ;;  %4124 = vmatpush.bf16.msra.mxu2 %v5162_v27  ;;  %v5190_v33 = vld [vmem:[%s6712_s3 + $0xe8] sm:$0xff]  ;;  %v5188_v32 = vld [vmem:[%s6712_s3 + $0xd8] sm:$0xff]  ;;  %v5177_v54 = vld [vmem:[%s6712_s3 + $0x80] sm:$0xff] }
 0x421   :  { %v3775_v56 = vperm.slane %v3767_v18, %v6461_v13  ;;  %v3778_v16 = vrot.slane %v6577_v30, 4  ;;  %v3679_v3 = vsel %vm3568_vm1, %v3663_v8, %v3678_v14  ;;  %v3677_v58 = vsel %vm3568_vm1, %v3676_v47, %v6512_v61  ;;  %4146 = vmatpush.bf16.msrb.mxu1 %v5182_v39  ;;  %v5189_v8 = vld [vmem:[%s6712_s3 + $0xe0] sm:$0xff]  ;;  %v5178_v37 = vld [vmem:[%s6712_s3 + $0x88] sm:$0xff]  ;;  %v5187_v1 = vld [vmem:[%s6712_s3 + $0xd0] sm:$0xff] }
 0x422   :  { %v3752_v31 = vrot.slane %v3723_v9, 4  ;;  %5205 = vrot.lane.b32.xlu0 %v5204_v19, %s5228_s24  ;;  %v3765_v2 = vsel %vm3568_vm1, %v3764_v12, %v3715_v38  ;;  %v3755_v41 = vsel %vm3568_vm1, %v3723_v9, %v3754_v45  ;;  %v3731_v57 = vsel %vm3568_vm1, %v6491_v34, %v3730_v48  ;;  %v5186_v12 = vld [vmem:[%s6712_s3 + $0xc8] sm:$0xff] }
 0x423   :  { %v6588_v52 = vperm.slane %v3765_v2, %v6461_v13  ;;  %v3788_v59 = vrot.slane %v3775_v56, 4  ;;  %v3791_v21 = vsel %vm3568_vm1, %v3775_v56, %v3790_v50  ;;  %v3669_v61 = vsel %vm3568_vm1, %v3668_v53, %v6476_v62  ;;  %v5161_v62 = vld [vmem:[%s6712_s3] sm:$0xff] }
 0x424   :  { %v3753_v7 = vsel %vm3568_vm1, %v3752_v31, %v3711_v44  ;;  %v5219_v20 = vpack.i.bf16 %v3791_v21, %v3679_v3  ;;  %v3763_v4 = vperm.slane %v3755_v41, %v6461_v13  ;;  %v3739_v42 = vperm.slane %v3731_v57, %v6461_v13  ;;  %4125 = vmatpush.bf16.msra.mxu2 %v5161_v62  ;;  %v5185_v44 = vld [vmem:[%s6712_s3 + $0xc0] sm:$0xff] }
 0x425   :  { %v6598_v63 = vperm.slane %v3753_v7, %v6461_v13  ;;  %v3789_v43 = vsel %vm3568_vm1, %v3788_v59, %v3751_v24  ;;  %v3787_v10 = vsel %vm3568_vm1, %v6588_v52, %v3786_v36  ;;  %v5171_v13 = vld [vmem:[%s6712_s3 + $0x50] sm:$0xff]  ;;  %v5192_v24 = vld [vmem:[%s6712_s3 + $0xf8] sm:$0xff]  ;;  %4147 = vmatpush.bf16.msrb.mxu1 %v5181_v25  ;;  %v3672_v19 = vrot.slane %v6538_v49, 4 }
 0x426   :  { %v5209_v17 = vpack.i.bf16 %v3789_v43, %v3677_v58  ;;  %v3780_v26 = vrot.slane %v3763_v4, 4  ;;  %v3782_v34 = vrot.slane %v3739_v42, 4  ;;  %4136 = vmatpush.bf16.msra.mxu3 %v5171_v13  ;;  %v3664_v47 = vrot.slane %v6553_v11, 4 }
 0x427   :  { %v3779_v28 = vsel %vm3568_vm1, %v6598_v63, %v3778_v16  ;;  %v3673_v2 = vsel %vm3568_vm1, %v3672_v19, %v6479_v51  ;;  %v3776_v53 = vrot.slane %v6598_v63, 4  ;;  %v3784_v41 = vrot.slane %v6588_v52, 4 }
 0x428   :  { %v5214_v38 = vpack.i.bf16 %v3779_v28, %v3787_v10  ;;  %5210 = vrot.lane.b32.xlu2 %v5209_v17, %s5229_s27  ;;  %v3781_v35 = vsel %vm3568_vm1, %v3780_v26, %v3739_v42  ;;  %v3783_v29 = vsel %vm3568_vm1, %v3763_v4, %v3782_v34  ;;  %4157 = vmatpush.bf16.msrb.mxu2 %v5192_v24 }
 0x429   :  { %4148 = vmatpush.bf16.msrb.mxu1 %v5180_v22  ;;  %v3665_v7 = vsel %vm3568_vm1, %v3664_v47, %v6509_v5  ;;  %v3777_v5 = vsel %vm3568_vm1, %v3776_v53, %v6577_v30  ;;  %v3785_v10 = vsel %vm3568_vm1, %v3784_v41, %v6563_v15  ;;  %v5224_v15 = vld [vmem:[%s6713_s4] ss:$0 sm:$0xff] }
 0x42a   :  { %5215 = vrot.lane.b32.xlu1 %v5214_v38, %s5228_s24  ;;  %3797 = vrot.lane.b32.xlu0 %v3669_v61, %s5229_s27 }
 0x42b   :  { %4137 = vmatpush.bf16.msra.mxu3 %v5170_v23 }
 0x42c   :  { %4158 = vmatpush.bf16.msrb.mxu2 %v5191_v55 }
 0x42d   :  { %4149 = vmatpush.bf16.msrb.mxu1 %v5179_v40 }
 0x42f   :  { %4138 = vmatpush.bf16.msra.mxu3 %v5169_v6 }
 0x430   :  { %5220 = vrot.lane.b32.xlu2 %v5219_v20, %s5227_s20  ;;  %4159 = vmatpush.bf16.msrb.mxu2 %v5190_v33 }
 0x431   :  { %4150 = vmatpush.bf16.msrb.mxu1 %v5178_v37 }
 0x432   :  { %3821 = vrot.lane.b32.xlu0 %v3781_v35, %s5229_s27  ;;  %3825 = vrot.lane.b32.xlu1 %v3783_v29, %s5227_s20 }
 0x434   :  { %4160 = vmatpush.bf16.msrb.mxu2 %v5189_v8 }
 0x435   :  { %4151 = vmatpush.bf16.msrb.mxu1 %v5177_v54 }
 0x438   :  { %4161 = vmatpush.bf16.msrb.mxu2 %v5188_v32 }
 0x43c   :  { %4162 = vmatpush.bf16.msrb.mxu2 %v5187_v1 }
 0x440   :  { %4163 = vmatpush.bf16.msrb.mxu2 %v5186_v12 }
 0x444   :  { %4164 = vmatpush.bf16.msrb.mxu2 %v5185_v44 }
 0x482   :  { %v5211_v9 = vpop.permute.xlu2 %5210 }
 0x483   :  { %v5212_v31 = vunpack.i.l.bf16 %v5211_v9  ;;  %v5213_v57 = vunpack.i.h.bf16 %v5211_v9 }
 0x48a   :  { %v5221_v0 = vpop.permute.xlu2 %5220 }
 0x48b   :  { %v5222_v48 = vunpack.i.l.bf16 %v5221_v0  ;;  %v5223_v61 = vunpack.i.h.bf16 %v5221_v0 }
 0x490   :  { %v3802_v18 = vpop.permute.xlu1 %3801 }
 0x494   :  { %v5206_v50 = vpop.permute.xlu0 %5205 }
 0x495   :  { %v5208_v60 = vunpack.i.h.bf16 %v5206_v50  ;;  %v5207_v36 = vunpack.i.l.bf16 %v5206_v50 }
 0x497   :  { %v3845_v56 = vsel %vm933_vm0, %v3673_v2, %v5208_v60  ;;  %v3840_v46 = vsel %vm933_vm0, %v3665_v7, %v5207_v36 }
 0x498   :  { %v3846_v14 = vsel %vm3841_vm2, %v3845_v56, %v5212_v31 }
 0x499   :  { %v3847_v49 = vsel %vm3843_vm3, %v3846_v14, %v5222_v48 }
 0x49a   :  { %v3855_v45 = vpack.c.bf16 %v3847_v49, %v3847_v49 }
 0x49c   :  { %v5216_v59 = vpop.permute.xlu1 %5215  ;;  %v3798_v21 = vpop.permute.xlu0 %3797  ;;  %4139 = vmatmul.bf16.vlgmr.msra.gmra.mxu3 %v3855_v45 }
 0x49d   :  { %v3842_v51 = vsel %vm3841_vm2, %v3840_v46, %v3798_v21  ;;  %v5218_v3 = vunpack.i.h.bf16 %v5216_v59  ;;  %v5217_v58 = vunpack.i.l.bf16 %v5216_v59 }
 0x49e   :  { %v3844_v11 = vsel %vm3843_vm3, %v3842_v51, %v3802_v18 }
 0x49f   :  { %v3854_v16 = vpack.c.bf16 %v3844_v11, %v3844_v11  ;;  %v3848_v43 = vsel %vm933_vm0, %v3777_v5, %v5218_v3  ;;  %v3851_v38 = vsel %vm933_vm0, %v3785_v10, %v5217_v58 }
 0x4a0   :  { %v3852_v27 = vsel %vm3841_vm2, %v3851_v38, %v5213_v57 }
 0x4a1   :  { %4126 = vmatmul.bf16.vlgmr.msra.gmra.mxu2 %v3854_v16  ;;  %v3853_v30 = vsel %vm3843_vm3, %v3852_v27, %v5223_v61 }
 0x4a2   :  { %v3857_v4 = vpack.c.bf16 %v3853_v30, %v3853_v30 }
 0x4a4   :  { %v3822_v20 = vpop.permute.xlu0 %3821  ;;  %v3826_v28 = vpop.permute.xlu1 %3825 }
 0x4a5   :  { %v3849_v17 = vsel %vm3841_vm2, %v3848_v43, %v3822_v20 }
 0x4a6   :  { %v3850_v63 = vsel %vm3843_vm3, %v3849_v17, %v3826_v28 }
 0x4a7   :  { %v3856_v52 = vpack.c.bf16 %v3850_v63, %v3850_v63 }
 0x4a9   :  { %4152 = vmatmul.bf16.vlgmr.msrb.gmra.mxu1 %v3856_v52 }
 0x4b1   :  { %4165 = vmatmul.bf16.vlgmr.msrb.gmra.mxu2 %v3857_v4 }
 0x51f   :  { %v4140_v42 = vpop.f32.mrf.mxu3 }
 0x524   :  { %v4127_v26 = vpop.f32.mrf.mxu2 }
 0x525   :  { %v4128_v29 = vadd.f32 %v5224_v15, %v4127_v26 }
 0x526   :  { %v4153_v34 = vpop.f32.mrf.mxu1 }
 0x527   :  { %v4142_v35 = vpop.f32.mrf.mxu3  ;;  %v4141_v39 = vadd.f32 %v4140_v42, %v4128_v29 }
 0x529   :  { %v4154_v24 = vadd.f32 %v4153_v34, %v4141_v39 }
 0x52c   :  { %v4129_v62 = vpop.f32.mrf.mxu2 }
 0x52e   :  { %v4155_v13 = vpop.f32.mrf.mxu1 }
 0x534   :  { %v4166_v23 = vpop.f32.mrf.mxu2 }
 0x535   :  { %v4167_v25 = vadd.f32 %v4166_v23, %v4154_v24 }
 0x537   :  { %4170 = vst [vmem:[%s6714_s5] sm:$0xff] %v4167_v25 }
 0x53c   :  { %v4168_v55 = vpop.f32.mrf.mxu2 }

</bundles_post_ra>
